<compile_context>
chip_gen: v7x
topology: tpu7x:2x2x1
jax: 0.10.0
libtpu: 0.0.40
codegen_flags: <defaults>
</compile_context>

<pallas_src>
import functools
import math

import jax
import jax.numpy as jnp
import numpy as np
from jax.experimental import pallas as pl
from jax.experimental.pallas import tpu as pltpu

MM_DTYPE = jnp.bfloat16          # MXU operand dtype (accumulation stays f32)


# ----------------------------- shared math -----------------------------------
def _layer_norm(x, g, b, eps=1e-5):
    mu = jnp.mean(x, axis=-1, keepdims=True)
    xc = x - mu
    var = jnp.mean(xc * xc, axis=-1, keepdims=True)
    return xc * jax.lax.rsqrt(var + eps) * g + b


def _mm(x, w):
    # x: f32 activations, w: (pre-cast) matmul weights. bf16 MXU inputs, f32 acc.
    return jnp.dot(x.astype(w.dtype), w, preferred_element_type=jnp.float32)


def _attention(q, k, v, nhead):
    # q: (Lq, D) already scaled (scale folded into the Q projection weights).
    # k, v: (Lk, D).  Head-batched score/context einsums.
    lq, d_model = q.shape
    hd = d_model // nhead

    def split_heads(x):   # (L, D) -> (nhead, L, hd); lane slices, leading-axis stack
        return jnp.stack([x[:, h * hd:(h + 1) * hd] for h in range(nhead)], axis=0)

    qh = split_heads(q).astype(MM_DTYPE)
    kh = split_heads(k).astype(MM_DTYPE)
    vh = split_heads(v).astype(MM_DTYPE)

    s = jnp.einsum('hqd,hkd->hqk', qh, kh, preferred_element_type=jnp.float32)
    s = s - jnp.max(s, axis=-1, keepdims=True)
    p = jnp.exp(s)
    p = p * pl.reciprocal(jnp.sum(p, axis=-1, keepdims=True), approx=True)
    ctx = jnp.einsum('hqk,hkd->hqd', p.astype(MM_DTYPE), vh,
                     preferred_element_type=jnp.float32)
    # merge heads back to (Lq, D) for the full-width output projection
    return jnp.concatenate([ctx[h] for h in range(nhead)], axis=-1)


# ----------------------------- fused Pallas kernel ----------------------------
def _decoder_kernel(*refs, nhead, n_params):
    tgt_ref, mem_ref, pos_ref, qpos_ref = refs[:4]
    param_refs = refs[4:4 + n_params]
    fng_ref = refs[4 + n_params]
    fnb_ref = refs[5 + n_params]
    out_ref = refs[6 + n_params]
    tgt_acc = refs[7 + n_params]      # VMEM carry of tgt across the layer axis
    memk_acc = refs[8 + n_params]     # VMEM cache of mem + pos_embed

    (sa_qk_w, sa_qk_b, sa_v_w, sa_v_b, sa_o_w, sa_o_b,
     ca_q_w, ca_q_b, ca_k_w, ca_k_b, ca_v_w, ca_v_b, ca_o_w, ca_o_b,
     l1_w, l1_b, l2_w, l2_b,
     n1_g, n1_b, n2_g, n2_b, n3_g, n3_b) = tuple(r[...] for r in param_refs)

    layer = pl.program_id(1)

    @pl.when(layer == 0)
    def _init():
        tgt_acc[...] = tgt_ref[...].astype(jnp.float32)
        # hoisted, layer-invariant cross-attention key input
        memk_acc[...] = mem_ref[...] + pos_ref[...]

    t = tgt_acc[...]
    mem = mem_ref[...]
    memk = memk_acc[...]
    qpos = qpos_ref[...]
    d_model = t.shape[-1]

    # ---- self-attention (fused Q/K projection; Q pre-scaled in weights) ----
    q_in = t + qpos
    qk = _mm(q_in, sa_qk_w) + sa_qk_b                    # (Lq, 2D)
    v = _mm(t, sa_v_w) + sa_v_b
    sa = _attention(qk[:, :d_model], qk[:, d_model:], v, nhead)
    sa = _mm(sa, sa_o_w) + sa_o_b
    t = _layer_norm(t + sa, n1_g, n1_b)

    # ---- cross-attention (Q pre-scaled in weights) ----
    q = _mm(t + qpos, ca_q_w) + ca_q_b
    k = _mm(memk, ca_k_w) + ca_k_b
    v = _mm(mem, ca_v_w) + ca_v_b
    ca = _attention(q, k, v, nhead)
    ca = _mm(ca, ca_o_w) + ca_o_b
    t = _layer_norm(t + ca, n2_g, n2_b)

    # ---- FFN ----
    h = jnp.maximum(_mm(t, l1_w) + l1_b, 0.0)
    ff = _mm(h, l2_w) + l2_b
    t = _layer_norm(t + ff, n3_g, n3_b)

    tgt_acc[...] = t

    @pl.when(layer == pl.num_programs(1) - 1)
    def _finalize():
        # final decoder LayerNorm folded into the last layer iteration
        out_ref[...] = _layer_norm(t, fng_ref[...], fnb_ref[...]).astype(out_ref.dtype)


def _batched_spec(shape_no_batch):
    nd = len(shape_no_batch)
    return pl.BlockSpec((None,) + tuple(shape_no_batch),
                        lambda b, l, nd=nd: (b,) + (0,) * nd)


def _stacked_spec(per_layer_shape):
    nd = len(per_layer_shape)
    return pl.BlockSpec((None,) + tuple(per_layer_shape),
                        lambda b, l, nd=nd: (l,) + (0,) * nd)


# ----------------------------- wrapper (glue) ---------------------------------
def prepare_params(params, final_norm, nhead, mm_dtype=MM_DTYPE):
    """Restructure raw per-layer params for the fused kernel:
       fuse self-attn Q/K projections, fold the 1/sqrt(hd) scale into Q weights,
       cast matmul weights to bf16 (biases/norms stay f32), stack on a layer axis."""
    d_model = params[0][0].shape[0]
    scale = 1.0 / math.sqrt(d_model // nhead)
    per_layer = []
    for p in params:
        (sa_qw, sa_qb, sa_kw, sa_kb, sa_vw, sa_vb, sa_ow, sa_ob,
         ca_qw, ca_qb, ca_kw, ca_kb, ca_vw, ca_vb, ca_ow, ca_ob,
         l1_w, l1_b, l2_w, l2_b,
         n1_g, n1_b, n2_g, n2_b, n3_g, n3_b) = p
        sa_qk_w = jnp.concatenate([sa_qw * scale, sa_kw], axis=1)
        sa_qk_b = jnp.concatenate([sa_qb * scale, sa_kb], axis=1)
        per_layer.append((
            sa_qk_w.astype(mm_dtype), sa_qk_b,
            sa_vw.astype(mm_dtype), sa_vb,
            sa_ow.astype(mm_dtype), sa_ob,
            (ca_qw * scale).astype(mm_dtype), ca_qb * scale,
            ca_kw.astype(mm_dtype), ca_kb,
            ca_vw.astype(mm_dtype), ca_vb,
            ca_ow.astype(mm_dtype), ca_ob,
            l1_w.astype(mm_dtype), l1_b,
            l2_w.astype(mm_dtype), l2_b,
            n1_g, n1_b, n2_g, n2_b, n3_g, n3_b,
        ))
    stacked = [jnp.stack(arrs, axis=0) for arrs in zip(*per_layer)]
    return stacked, (final_norm[0], final_norm[1])


def transformer_decoder_forward(x, memory, pos_embed, query_embed,
                                stacked_params, final_norm, nhead):
    # PyTorch seq-first -> batch-first (one-time layout change outside the kernel;
    # inside, each batch element is a lane-dense (L, D) slab).
    tgt = jnp.transpose(x, (1, 0, 2))
    mem = jnp.transpose(memory, (1, 0, 2))
    pos = jnp.transpose(pos_embed, (1, 0, 2))
    qpos = jnp.transpose(query_embed, (1, 0, 2))

    B, NQ, D = tgt.shape
    NM = mem.shape[1]
    num_layers = stacked_params[0].shape[0]
    n_params = len(stacked_params)

    in_specs = [
        _batched_spec((NQ, D)),    # tgt (read at layer 0 only; block is layer-invariant)
        _batched_spec((NM, D)),    # memory
        _batched_spec((NM, D)),    # pos_embed
        _batched_spec((NQ, D)),    # query_embed
    ]
    in_specs += [_stacked_spec(arr.shape[1:]) for arr in stacked_params]
    in_specs += [pl.BlockSpec((1, D), lambda b, l: (0, 0)),   # final-norm gamma
                 pl.BlockSpec((1, D), lambda b, l: (0, 0))]   # final-norm beta

    out = pl.pallas_call(
        functools.partial(_decoder_kernel, nhead=nhead, n_params=n_params),
        out_shape=jax.ShapeDtypeStruct((B, NQ, D), x.dtype),
        grid=(B, num_layers),                       # batch parallel, layer carry last
        in_specs=in_specs,
        out_specs=_batched_spec((NQ, D)),
        scratch_shapes=[pltpu.VMEM((NQ, D), jnp.float32),   # tgt carry
                        pltpu.VMEM((NM, D), jnp.float32)],  # mem + pos cache
        compiler_params=pltpu.CompilerParams(
            dimension_semantics=("parallel", "arbitrary"),
            vmem_limit_bytes=64 * 1024 * 1024),     # explicit cap; tiny footprint here
    )(tgt, mem, pos, qpos, *stacked_params, final_norm[0], final_norm[1])

    out = jnp.transpose(out, (1, 0, 2))
    return out[None]                                # matches output.unsqueeze(0)


# ----------------------------- pure-JAX reference ------------------------------
def _linear_ref(x, w, b):
    B, L, Din = x.shape
    y = jnp.dot(x.reshape(B * L, Din), w, preferred_element_type=jnp.float32)
    return y.reshape(B, L, -1) + b


def _mha_ref(q_in, k_in, v_in, qw, qb, kw, kb, vw, vb, ow, ob, nhead):
    d_model = q_in.shape[-1]
    hd = d_model // nhead
    scale = 1.0 / math.sqrt(hd)
    q = _linear_ref(q_in, qw, qb) * scale
    k = _linear_ref(k_in, kw, kb)
    v = _linear_ref(v_in, vw, vb)
    head_outs = []
    for h in range(nhead):
        sl = slice(h * hd, (h + 1) * hd)
        qh, kh, vh = q[..., sl], k[..., sl], v[..., sl]
        s = jnp.einsum('bqd,bkd->bqk', qh, kh, preferred_element_type=jnp.float32)
        s = s - jnp.max(s, axis=-1, keepdims=True)
        p = jnp.exp(s)
        p = p / jnp.sum(p, axis=-1, keepdims=True)
        head_outs.append(
            jnp.einsum('bqk,bkd->bqd', p, vh, preferred_element_type=jnp.float32))
    o = jnp.concatenate(head_outs, axis=-1)
    return _linear_ref(o, ow, ob)


def _decoder_layer_ref(tgt, mem, pos, qpos, p, nhead):
    (sa_qw, sa_qb, sa_kw, sa_kb, sa_vw, sa_vb, sa_ow, sa_ob,
     ca_qw, ca_qb, ca_kw, ca_kb, ca_vw, ca_vb, ca_ow, ca_ob,
     l1_w, l1_b, l2_w, l2_b,
     n1_g, n1_b, n2_g, n2_b, n3_g, n3_b) = p

    q = tgt + qpos
    sa = _mha_ref(q, q, tgt, sa_qw, sa_qb, sa_kw, sa_kb, sa_vw, sa_vb, sa_ow, sa_ob, nhead)
    tgt = _layer_norm(tgt + sa, n1_g, n1_b)

    ca = _mha_ref(tgt + qpos, mem + pos, mem,
                  ca_qw, ca_qb, ca_kw, ca_kb, ca_vw, ca_vb, ca_ow, ca_ob, nhead)
    tgt = _layer_norm(tgt + ca, n2_g, n2_b)

    h = jnp.maximum(_linear_ref(tgt, l1_w, l1_b), 0.0)
    ff = _linear_ref(h, l2_w, l2_b)
    tgt = _layer_norm(tgt + ff, n3_g, n3_b)
    return tgt


def reference_forward(x, memory, pos_embed, query_embed, params, final_norm, nhead):
    tgt = jnp.transpose(x, (1, 0, 2))
    mem = jnp.transpose(memory, (1, 0, 2))
    pos = jnp.transpose(pos_embed, (1, 0, 2))
    qpos = jnp.transpose(query_embed, (1, 0, 2))
    for lp in params:
        tgt = _decoder_layer_ref(tgt, mem, pos, qpos, lp, nhead)
    tgt = _layer_norm(tgt, final_norm[0], final_norm[1])
    return jnp.transpose(tgt, (1, 0, 2))[None]


# ----------------------------- parameter init ----------------------------------
def init_params(key, num_layers, d_model, dim_ff):
    def w(k, shape, scale):
        return jax.random.uniform(k, shape, jnp.float32, -1.0, 1.0) * scale

    s_d = 1.0 / math.sqrt(d_model)
    s_f = 1.0 / math.sqrt(dim_ff)
    ones = jnp.ones((1, d_model), jnp.float32)
    zeros = jnp.zeros((1, d_model), jnp.float32)

    params = []
    for _ in range(num_layers):
        key, *ks = jax.random.split(key, 21)
        layer = (
            w(ks[0], (d_model, d_model), s_d), w(ks[1], (1, d_model), s_d),    # self q
            w(ks[2], (d_model, d_model), s_d), w(ks[3], (1, d_model), s_d),    # self k
            w(ks[4], (d_model, d_model), s_d), w(ks[5], (1, d_model), s_d),    # self v
            w(ks[6], (d_model, d_model), s_d), w(ks[7], (1, d_model), s_d),    # self out
            w(ks[8], (d_model, d_model), s_d), w(ks[9], (1, d_model), s_d),    # cross q
            w(ks[10], (d_model, d_model), s_d), w(ks[11], (1, d_model), s_d),  # cross k
            w(ks[12], (d_model, d_model), s_d), w(ks[13], (1, d_model), s_d),  # cross v
            w(ks[14], (d_model, d_model), s_d), w(ks[15], (1, d_model), s_d),  # cross out
            w(ks[16], (d_model, dim_ff), s_d), w(ks[17], (1, dim_ff), s_d),    # linear1
            w(ks[18], (dim_ff, d_model), s_f), w(ks[19], (1, d_model), s_f),   # linear2
            ones, zeros,   # norm1
            ones, zeros,   # norm2
            ones, zeros,   # norm3
        )
        params.append(layer)
    final_norm = (ones, zeros)
    return params, final_norm


if __name__ == "__main__":
    NQ, NM, B, D, NHEAD, FF, NLAYERS = 8, 16, 2, 32, 4, 64, 2

    key = jax.random.PRNGKey(0)
    k1, k2, k3, k4, k5 = jax.random.split(key, 5)
    x = jax.random.normal(k1, (NQ, B, D), jnp.float32)          # decoder input (queries)
    memory = jax.random.normal(k2, (NM, B, D), jnp.float32)     # encoder memory
    pos_embed = jax.random.normal(k3, (NM, B, D), jnp.float32)
    query_embed = jax.random.normal(k4, (NQ, B, D), jnp.float32)

    params, final_norm = init_params(k5, NLAYERS, D, FF)
    stacked_params, fused_norm = prepare_params(params, final_norm, NHEAD)

    out = transformer_decoder_forward(x, memory, pos_embed, query_embed,
                                      stacked_params, fused_norm, NHEAD)
    out = jax.block_until_ready(out)
    assert out.shape == (1, NQ, B, D), out.shape

    ref = reference_forward(x, memory, pos_embed, query_embed, params, final_norm, NHEAD)
    # kernel uses bf16 MXU operands (f32 accumulation) vs the pure-f32 reference
    np.testing.assert_allclose(np.asarray(out), np.asarray(ref), atol=5e-2, rtol=5e-2)

    print("KERNEL_OK")
</pallas_src>

<mosaic_0001>
module attributes {stable_mosaic.version = 11 : i64} {
  func.func @_decoder_kernel(%arg0: i32, %arg1: i32, %arg2: memref<1x8x32xf32, #tpu.memory_space<vmem>>, %arg3: memref<1x16x32xf32, #tpu.memory_space<vmem>>, %arg4: memref<1x16x32xf32, #tpu.memory_space<vmem>>, %arg5: memref<1x8x32xf32, #tpu.memory_space<vmem>>, %arg6: memref<1x32x64xbf16, #tpu.memory_space<vmem>>, %arg7: memref<1x1x64xf32, #tpu.memory_space<vmem>>, %arg8: memref<1x32x32xbf16, #tpu.memory_space<vmem>>, %arg9: memref<1x1x32xf32, #tpu.memory_space<vmem>>, %arg10: memref<1x32x32xbf16, #tpu.memory_space<vmem>>, %arg11: memref<1x1x32xf32, #tpu.memory_space<vmem>>, %arg12: memref<1x32x32xbf16, #tpu.memory_space<vmem>>, %arg13: memref<1x1x32xf32, #tpu.memory_space<vmem>>, %arg14: memref<1x32x32xbf16, #tpu.memory_space<vmem>>, %arg15: memref<1x1x32xf32, #tpu.memory_space<vmem>>, %arg16: memref<1x32x32xbf16, #tpu.memory_space<vmem>>, %arg17: memref<1x1x32xf32, #tpu.memory_space<vmem>>, %arg18: memref<1x32x32xbf16, #tpu.memory_space<vmem>>, %arg19: memref<1x1x32xf32, #tpu.memory_space<vmem>>, %arg20: memref<1x32x64xbf16, #tpu.memory_space<vmem>>, %arg21: memref<1x1x64xf32, #tpu.memory_space<vmem>>, %arg22: memref<1x64x32xbf16, #tpu.memory_space<vmem>>, %arg23: memref<1x1x32xf32, #tpu.memory_space<vmem>>, %arg24: memref<1x1x32xf32, #tpu.memory_space<vmem>>, %arg25: memref<1x1x32xf32, #tpu.memory_space<vmem>>, %arg26: memref<1x1x32xf32, #tpu.memory_space<vmem>>, %arg27: memref<1x1x32xf32, #tpu.memory_space<vmem>>, %arg28: memref<1x1x32xf32, #tpu.memory_space<vmem>>, %arg29: memref<1x1x32xf32, #tpu.memory_space<vmem>>, %arg30: memref<1x32xf32, #tpu.memory_space<vmem>>, %arg31: memref<1x32xf32, #tpu.memory_space<vmem>>, %arg32: memref<1x8x32xf32, #tpu.memory_space<vmem>>, %arg33: memref<8x32xf32, #tpu.memory_space<vmem>>, %arg34: memref<16x32xf32, #tpu.memory_space<vmem>>) attributes {dimension_semantics = [#tpu.dimension_semantics<parallel>, #tpu.dimension_semantics<arbitrary>], iteration_bounds = array<i64: 2, 2>, scalar_prefetch = 0 : i64, scratch_operands = 2 : i64, tpu.core_type = #tpu.core_type<tc>, window_params = [{transform_indices = @transform_0, window_bounds = array<i64: 1, 8, 32>}, {transform_indices = @transform_1, window_bounds = array<i64: 1, 16, 32>}, {transform_indices = @transform_2, window_bounds = array<i64: 1, 16, 32>}, {transform_indices = @transform_3, window_bounds = array<i64: 1, 8, 32>}, {transform_indices = @transform_4, window_bounds = array<i64: 1, 32, 64>}, {transform_indices = @transform_5, window_bounds = array<i64: 1, 1, 64>}, {transform_indices = @transform_6, window_bounds = array<i64: 1, 32, 32>}, {transform_indices = @transform_7, window_bounds = array<i64: 1, 1, 32>}, {transform_indices = @transform_8, window_bounds = array<i64: 1, 32, 32>}, {transform_indices = @transform_9, window_bounds = array<i64: 1, 1, 32>}, {transform_indices = @transform_10, window_bounds = array<i64: 1, 32, 32>}, {transform_indices = @transform_11, window_bounds = array<i64: 1, 1, 32>}, {transform_indices = @transform_12, window_bounds = array<i64: 1, 32, 32>}, {transform_indices = @transform_13, window_bounds = array<i64: 1, 1, 32>}, {transform_indices = @transform_14, window_bounds = array<i64: 1, 32, 32>}, {transform_indices = @transform_15, window_bounds = array<i64: 1, 1, 32>}, {transform_indices = @transform_16, window_bounds = array<i64: 1, 32, 32>}, {transform_indices = @transform_17, window_bounds = array<i64: 1, 1, 32>}, {transform_indices = @transform_18, window_bounds = array<i64: 1, 32, 64>}, {transform_indices = @transform_19, window_bounds = array<i64: 1, 1, 64>}, {transform_indices = @transform_20, window_bounds = array<i64: 1, 64, 32>}, {transform_indices = @transform_21, window_bounds = array<i64: 1, 1, 32>}, {transform_indices = @transform_22, window_bounds = array<i64: 1, 1, 32>}, {transform_indices = @transform_23, window_bounds = array<i64: 1, 1, 32>}, {transform_indices = @transform_24, window_bounds = array<i64: 1, 1, 32>}, {transform_indices = @transform_25, window_bounds = array<i64: 1, 1, 32>}, {transform_indices = @transform_26, window_bounds = array<i64: 1, 1, 32>}, {transform_indices = @transform_27, window_bounds = array<i64: 1, 1, 32>}, {pipeline_mode = #tpu.pipeline_mode<synchronous>, transform_indices = @transform_28, window_bounds = array<i64: 1, 32>}, {pipeline_mode = #tpu.pipeline_mode<synchronous>, transform_indices = @transform_29, window_bounds = array<i64: 1, 32>}, {transform_indices = @transform_30, window_bounds = array<i64: 1, 8, 32>}]} {
    %c0 = arith.constant 0 : index
    %c0_0 = arith.constant 0 : index
    %c0_1 = arith.constant 0 : index
    %0 = vector.load %arg6[%c0, %c0_0, %c0_1] : memref<1x32x64xbf16, #tpu.memory_space<vmem>>, vector<1x32x64xbf16>
    %1 = vector.shape_cast %0 : vector<1x32x64xbf16> to vector<32x64xbf16>
    %c0_2 = arith.constant 0 : index
    %c0_3 = arith.constant 0 : index
    %c0_4 = arith.constant 0 : index
    %2 = vector.load %arg7[%c0_2, %c0_3, %c0_4] : memref<1x1x64xf32, #tpu.memory_space<vmem>>, vector<1x1x64xf32>
    %3 = vector.shape_cast %2 : vector<1x1x64xf32> to vector<1x64xf32>
    %c0_5 = arith.constant 0 : index
    %c0_6 = arith.constant 0 : index
    %c0_7 = arith.constant 0 : index
    %4 = vector.load %arg8[%c0_5, %c0_6, %c0_7] : memref<1x32x32xbf16, #tpu.memory_space<vmem>>, vector<1x32x32xbf16>
    %5 = vector.shape_cast %4 : vector<1x32x32xbf16> to vector<32x32xbf16>
    %c0_8 = arith.constant 0 : index
    %c0_9 = arith.constant 0 : index
    %c0_10 = arith.constant 0 : index
    %6 = vector.load %arg9[%c0_8, %c0_9, %c0_10] : memref<1x1x32xf32, #tpu.memory_space<vmem>>, vector<1x1x32xf32>
    %7 = vector.shape_cast %6 : vector<1x1x32xf32> to vector<1x32xf32>
    %c0_11 = arith.constant 0 : index
    %c0_12 = arith.constant 0 : index
    %c0_13 = arith.constant 0 : index
    %8 = vector.load %arg10[%c0_11, %c0_12, %c0_13] : memref<1x32x32xbf16, #tpu.memory_space<vmem>>, vector<1x32x32xbf16>
    %9 = vector.shape_cast %8 : vector<1x32x32xbf16> to vector<32x32xbf16>
    %c0_14 = arith.constant 0 : index
    %c0_15 = arith.constant 0 : index
    %c0_16 = arith.constant 0 : index
    %10 = vector.load %arg11[%c0_14, %c0_15, %c0_16] : memref<1x1x32xf32, #tpu.memory_space<vmem>>, vector<1x1x32xf32>
    %11 = vector.shape_cast %10 : vector<1x1x32xf32> to vector<1x32xf32>
    %c0_17 = arith.constant 0 : index
    %c0_18 = arith.constant 0 : index
    %c0_19 = arith.constant 0 : index
    %12 = vector.load %arg12[%c0_17, %c0_18, %c0_19] : memref<1x32x32xbf16, #tpu.memory_space<vmem>>, vector<1x32x32xbf16>
    %13 = vector.shape_cast %12 : vector<1x32x32xbf16> to vector<32x32xbf16>
    %c0_20 = arith.constant 0 : index
    %c0_21 = arith.constant 0 : index
    %c0_22 = arith.constant 0 : index
    %14 = vector.load %arg13[%c0_20, %c0_21, %c0_22] : memref<1x1x32xf32, #tpu.memory_space<vmem>>, vector<1x1x32xf32>
    %15 = vector.shape_cast %14 : vector<1x1x32xf32> to vector<1x32xf32>
    %c0_23 = arith.constant 0 : index
    %c0_24 = arith.constant 0 : index
    %c0_25 = arith.constant 0 : index
    %16 = vector.load %arg14[%c0_23, %c0_24, %c0_25] : memref<1x32x32xbf16, #tpu.memory_space<vmem>>, vector<1x32x32xbf16>
    %17 = vector.shape_cast %16 : vector<1x32x32xbf16> to vector<32x32xbf16>
    %c0_26 = arith.constant 0 : index
    %c0_27 = arith.constant 0 : index
    %c0_28 = arith.constant 0 : index
    %18 = vector.load %arg15[%c0_26, %c0_27, %c0_28] : memref<1x1x32xf32, #tpu.memory_space<vmem>>, vector<1x1x32xf32>
    %19 = vector.shape_cast %18 : vector<1x1x32xf32> to vector<1x32xf32>
    %c0_29 = arith.constant 0 : index
    %c0_30 = arith.constant 0 : index
    %c0_31 = arith.constant 0 : index
    %20 = vector.load %arg16[%c0_29, %c0_30, %c0_31] : memref<1x32x32xbf16, #tpu.memory_space<vmem>>, vector<1x32x32xbf16>
    %21 = vector.shape_cast %20 : vector<1x32x32xbf16> to vector<32x32xbf16>
    %c0_32 = arith.constant 0 : index
    %c0_33 = arith.constant 0 : index
    %c0_34 = arith.constant 0 : index
    %22 = vector.load %arg17[%c0_32, %c0_33, %c0_34] : memref<1x1x32xf32, #tpu.memory_space<vmem>>, vector<1x1x32xf32>
    %23 = vector.shape_cast %22 : vector<1x1x32xf32> to vector<1x32xf32>
    %c0_35 = arith.constant 0 : index
    %c0_36 = arith.constant 0 : index
    %c0_37 = arith.constant 0 : index
    %24 = vector.load %arg18[%c0_35, %c0_36, %c0_37] : memref<1x32x32xbf16, #tpu.memory_space<vmem>>, vector<1x32x32xbf16>
    %25 = vector.shape_cast %24 : vector<1x32x32xbf16> to vector<32x32xbf16>
    %c0_38 = arith.constant 0 : index
    %c0_39 = arith.constant 0 : index
    %c0_40 = arith.constant 0 : index
    %26 = vector.load %arg19[%c0_38, %c0_39, %c0_40] : memref<1x1x32xf32, #tpu.memory_space<vmem>>, vector<1x1x32xf32>
    %27 = vector.shape_cast %26 : vector<1x1x32xf32> to vector<1x32xf32>
    %c0_41 = arith.constant 0 : index
    %c0_42 = arith.constant 0 : index
    %c0_43 = arith.constant 0 : index
    %28 = vector.load %arg20[%c0_41, %c0_42, %c0_43] : memref<1x32x64xbf16, #tpu.memory_space<vmem>>, vector<1x32x64xbf16>
    %29 = vector.shape_cast %28 : vector<1x32x64xbf16> to vector<32x64xbf16>
    %c0_44 = arith.constant 0 : index
    %c0_45 = arith.constant 0 : index
    %c0_46 = arith.constant 0 : index
    %30 = vector.load %arg21[%c0_44, %c0_45, %c0_46] : memref<1x1x64xf32, #tpu.memory_space<vmem>>, vector<1x1x64xf32>
    %31 = vector.shape_cast %30 : vector<1x1x64xf32> to vector<1x64xf32>
    %c0_47 = arith.constant 0 : index
    %c0_48 = arith.constant 0 : index
    %c0_49 = arith.constant 0 : index
    %32 = vector.load %arg22[%c0_47, %c0_48, %c0_49] : memref<1x64x32xbf16, #tpu.memory_space<vmem>>, vector<1x64x32xbf16>
    %33 = vector.shape_cast %32 : vector<1x64x32xbf16> to vector<64x32xbf16>
    %c0_50 = arith.constant 0 : index
    %c0_51 = arith.constant 0 : index
    %c0_52 = arith.constant 0 : index
    %34 = vector.load %arg23[%c0_50, %c0_51, %c0_52] : memref<1x1x32xf32, #tpu.memory_space<vmem>>, vector<1x1x32xf32>
    %35 = vector.shape_cast %34 : vector<1x1x32xf32> to vector<1x32xf32>
    %c0_53 = arith.constant 0 : index
    %c0_54 = arith.constant 0 : index
    %c0_55 = arith.constant 0 : index
    %36 = vector.load %arg24[%c0_53, %c0_54, %c0_55] : memref<1x1x32xf32, #tpu.memory_space<vmem>>, vector<1x1x32xf32>
    %37 = vector.shape_cast %36 : vector<1x1x32xf32> to vector<1x32xf32>
    %c0_56 = arith.constant 0 : index
    %c0_57 = arith.constant 0 : index
    %c0_58 = arith.constant 0 : index
    %38 = vector.load %arg25[%c0_56, %c0_57, %c0_58] : memref<1x1x32xf32, #tpu.memory_space<vmem>>, vector<1x1x32xf32>
    %39 = vector.shape_cast %38 : vector<1x1x32xf32> to vector<1x32xf32>
    %c0_59 = arith.constant 0 : index
    %c0_60 = arith.constant 0 : index
    %c0_61 = arith.constant 0 : index
    %40 = vector.load %arg26[%c0_59, %c0_60, %c0_61] : memref<1x1x32xf32, #tpu.memory_space<vmem>>, vector<1x1x32xf32>
    %41 = vector.shape_cast %40 : vector<1x1x32xf32> to vector<1x32xf32>
    %c0_62 = arith.constant 0 : index
    %c0_63 = arith.constant 0 : index
    %c0_64 = arith.constant 0 : index
    %42 = vector.load %arg27[%c0_62, %c0_63, %c0_64] : memref<1x1x32xf32, #tpu.memory_space<vmem>>, vector<1x1x32xf32>
    %43 = vector.shape_cast %42 : vector<1x1x32xf32> to vector<1x32xf32>
    %c0_65 = arith.constant 0 : index
    %c0_66 = arith.constant 0 : index
    %c0_67 = arith.constant 0 : index
    %44 = vector.load %arg28[%c0_65, %c0_66, %c0_67] : memref<1x1x32xf32, #tpu.memory_space<vmem>>, vector<1x1x32xf32>
    %45 = vector.shape_cast %44 : vector<1x1x32xf32> to vector<1x32xf32>
    %c0_68 = arith.constant 0 : index
    %c0_69 = arith.constant 0 : index
    %c0_70 = arith.constant 0 : index
    %46 = vector.load %arg29[%c0_68, %c0_69, %c0_70] : memref<1x1x32xf32, #tpu.memory_space<vmem>>, vector<1x1x32xf32>
    %47 = vector.shape_cast %46 : vector<1x1x32xf32> to vector<1x32xf32>
    %c0_i32 = arith.constant 0 : i32
    %48 = arith.cmpi eq, %arg1, %c0_i32 : i32
    %49 = arith.extui %48 : i1 to i32
    %c0_i32_71 = arith.constant 0 : i32
    %50 = arith.cmpi ne, %49, %c0_i32_71 : i32
    scf.if %50 {
      %c0_117 = arith.constant 0 : index
      %c0_118 = arith.constant 0 : index
      %c0_119 = arith.constant 0 : index
      %270 = vector.load %arg2[%c0_117, %c0_118, %c0_119] : memref<1x8x32xf32, #tpu.memory_space<vmem>>, vector<1x8x32xf32>
      %271 = vector.shape_cast %270 : vector<1x8x32xf32> to vector<8x32xf32>
      %c0_120 = arith.constant 0 : index
      %c0_121 = arith.constant 0 : index
      %272 = vector.load %arg33[%c0_120, %c0_121] : memref<8x32xf32, #tpu.memory_space<vmem>>, vector<8x32xf32>
      tpu.vector_store %arg33[%c0_120, %c0_121], %271 {strides = array<i32>} : memref<8x32xf32, #tpu.memory_space<vmem>>, vector<8x32xf32>,
      %c0_122 = arith.constant 0 : index
      %c0_123 = arith.constant 0 : index
      %c0_124 = arith.constant 0 : index
      %273 = vector.load %arg3[%c0_122, %c0_123, %c0_124] : memref<1x16x32xf32, #tpu.memory_space<vmem>>, vector<1x16x32xf32>
      %274 = vector.shape_cast %273 : vector<1x16x32xf32> to vector<16x32xf32>
      %c0_125 = arith.constant 0 : index
      %c0_126 = arith.constant 0 : index
      %c0_127 = arith.constant 0 : index
      %275 = vector.load %arg4[%c0_125, %c0_126, %c0_127] : memref<1x16x32xf32, #tpu.memory_space<vmem>>, vector<1x16x32xf32>
      %276 = vector.shape_cast %275 : vector<1x16x32xf32> to vector<16x32xf32>
      %277 = arith.addf %274, %276 : vector<16x32xf32>
      %c0_128 = arith.constant 0 : index
      %c0_129 = arith.constant 0 : index
      %278 = vector.load %arg34[%c0_128, %c0_129] : memref<16x32xf32, #tpu.memory_space<vmem>>, vector<16x32xf32>
      tpu.vector_store %arg34[%c0_128, %c0_129], %277 {strides = array<i32>} : memref<16x32xf32, #tpu.memory_space<vmem>>, vector<16x32xf32>,
    } else {
    }
    %c0_72 = arith.constant 0 : index
    %c0_73 = arith.constant 0 : index
    %51 = vector.load %arg33[%c0_72, %c0_73] : memref<8x32xf32, #tpu.memory_space<vmem>>, vector<8x32xf32>
    %c0_74 = arith.constant 0 : index
    %c0_75 = arith.constant 0 : index
    %c0_76 = arith.constant 0 : index
    %52 = vector.load %arg3[%c0_74, %c0_75, %c0_76] : memref<1x16x32xf32, #tpu.memory_space<vmem>>, vector<1x16x32xf32>
    %53 = vector.shape_cast %52 : vector<1x16x32xf32> to vector<16x32xf32>
    %c0_77 = arith.constant 0 : index
    %c0_78 = arith.constant 0 : index
    %54 = vector.load %arg34[%c0_77, %c0_78] : memref<16x32xf32, #tpu.memory_space<vmem>>, vector<16x32xf32>
    %c0_79 = arith.constant 0 : index
    %c0_80 = arith.constant 0 : index
    %c0_81 = arith.constant 0 : index
    %55 = vector.load %arg5[%c0_79, %c0_80, %c0_81] : memref<1x8x32xf32, #tpu.memory_space<vmem>>, vector<1x8x32xf32>
    %56 = vector.shape_cast %55 : vector<1x8x32xf32> to vector<8x32xf32>
    %57 = arith.addf %51, %56 : vector<8x32xf32>
    %58 = arith.truncf %57 : vector<8x32xf32> to vector<8x32xbf16>
    %cst = arith.constant dense<0.000000e+00> : vector<8x64xf32>
    %59 = tpu.matmul %58, %1, %cst {dimension_numbers = #tpu.dot_dimension_numbers<[1], [0], [0], [1], [0, 0, 1, 1], [], []>} : vector<8x32xbf16>, vector<32x64xbf16>, vector<8x64xf32> -> vector<8x64xf32>
    %60 = vector.broadcast %3 : vector<1x64xf32> to vector<8x64xf32>
    %61 = arith.addf %59, %60 : vector<8x64xf32>
    %62 = arith.truncf %51 : vector<8x32xf32> to vector<8x32xbf16>
    %cst_82 = arith.constant dense<0.000000e+00> : vector<8x32xf32>
    %63 = tpu.matmul %62, %5, %cst_82 {dimension_numbers = #tpu.dot_dimension_numbers<[1], [0], [0], [1], [0, 0, 1, 1], [], []>} : vector<8x32xbf16>, vector<32x32xbf16>, vector<8x32xf32> -> vector<8x32xf32>
    %64 = vector.broadcast %7 : vector<1x32xf32> to vector<8x32xf32>
    %65 = arith.addf %63, %64 : vector<8x32xf32>
    %66 = vector.extract_strided_slice %61 {offsets = [0, 0], sizes = [8, 32], strides = [1, 1]} : vector<8x64xf32> to vector<8x32xf32>
    %67 = vector.extract_strided_slice %61 {offsets = [0, 32], sizes = [8, 32], strides = [1, 1]} : vector<8x64xf32> to vector<8x32xf32>
    %68 = vector.extract_strided_slice %66 {offsets = [0, 0], sizes = [8, 8], strides = [1, 1]} : vector<8x32xf32> to vector<8x8xf32>
    %69 = vector.extract_strided_slice %66 {offsets = [0, 8], sizes = [8, 8], strides = [1, 1]} : vector<8x32xf32> to vector<8x8xf32>
    %70 = vector.extract_strided_slice %66 {offsets = [0, 16], sizes = [8, 8], strides = [1, 1]} : vector<8x32xf32> to vector<8x8xf32>
    %71 = vector.extract_strided_slice %66 {offsets = [0, 24], sizes = [8, 8], strides = [1, 1]} : vector<8x32xf32> to vector<8x8xf32>
    %72 = vector.shape_cast %68 : vector<8x8xf32> to vector<1x8x8xf32>
    %73 = vector.shape_cast %69 : vector<8x8xf32> to vector<1x8x8xf32>
    %74 = vector.shape_cast %70 : vector<8x8xf32> to vector<1x8x8xf32>
    %75 = vector.shape_cast %71 : vector<8x8xf32> to vector<1x8x8xf32>
    %76 = tpu.concatenate %72, %73, %74, %75 in 0 : vector<1x8x8xf32>, vector<1x8x8xf32>, vector<1x8x8xf32>, vector<1x8x8xf32> -> vector<4x8x8xf32>
    %77 = arith.truncf %76 : vector<4x8x8xf32> to vector<4x8x8xbf16>
    %78 = vector.extract_strided_slice %67 {offsets = [0, 0], sizes = [8, 8], strides = [1, 1]} : vector<8x32xf32> to vector<8x8xf32>
    %79 = vector.extract_strided_slice %67 {offsets = [0, 8], sizes = [8, 8], strides = [1, 1]} : vector<8x32xf32> to vector<8x8xf32>
    %80 = vector.extract_strided_slice %67 {offsets = [0, 16], sizes = [8, 8], strides = [1, 1]} : vector<8x32xf32> to vector<8x8xf32>
    %81 = vector.extract_strided_slice %67 {offsets = [0, 24], sizes = [8, 8], strides = [1, 1]} : vector<8x32xf32> to vector<8x8xf32>
    %82 = vector.shape_cast %78 : vector<8x8xf32> to vector<1x8x8xf32>
    %83 = vector.shape_cast %79 : vector<8x8xf32> to vector<1x8x8xf32>
    %84 = vector.shape_cast %80 : vector<8x8xf32> to vector<1x8x8xf32>
    %85 = vector.shape_cast %81 : vector<8x8xf32> to vector<1x8x8xf32>
    %86 = tpu.concatenate %82, %83, %84, %85 in 0 : vector<1x8x8xf32>, vector<1x8x8xf32>, vector<1x8x8xf32>, vector<1x8x8xf32> -> vector<4x8x8xf32>
    %87 = arith.truncf %86 : vector<4x8x8xf32> to vector<4x8x8xbf16>
    %88 = vector.extract_strided_slice %65 {offsets = [0, 0], sizes = [8, 8], strides = [1, 1]} : vector<8x32xf32> to vector<8x8xf32>
    %89 = vector.extract_strided_slice %65 {offsets = [0, 8], sizes = [8, 8], strides = [1, 1]} : vector<8x32xf32> to vector<8x8xf32>
    %90 = vector.extract_strided_slice %65 {offsets = [0, 16], sizes = [8, 8], strides = [1, 1]} : vector<8x32xf32> to vector<8x8xf32>
    %91 = vector.extract_strided_slice %65 {offsets = [0, 24], sizes = [8, 8], strides = [1, 1]} : vector<8x32xf32> to vector<8x8xf32>
    %92 = vector.shape_cast %88 : vector<8x8xf32> to vector<1x8x8xf32>
    %93 = vector.shape_cast %89 : vector<8x8xf32> to vector<1x8x8xf32>
    %94 = vector.shape_cast %90 : vector<8x8xf32> to vector<1x8x8xf32>
    %95 = vector.shape_cast %91 : vector<8x8xf32> to vector<1x8x8xf32>
    %96 = tpu.concatenate %92, %93, %94, %95 in 0 : vector<1x8x8xf32>, vector<1x8x8xf32>, vector<1x8x8xf32>, vector<1x8x8xf32> -> vector<4x8x8xf32>
    %97 = arith.truncf %96 : vector<4x8x8xf32> to vector<4x8x8xbf16>
    "tpu.trace_start"() <{level = 10 : i32, message = "hqd,hkd->hqk"}> : () -> ()
    %cst_83 = arith.constant dense<0.000000e+00> : vector<4x8x8xf32>
    %98 = tpu.matmul %77, %87, %cst_83 {dimension_numbers = #tpu.dot_dimension_numbers<[2], [2], [1], [1], [0, 0, 0, 1, 1, 1], [0], [0]>} : vector<4x8x8xbf16>, vector<4x8x8xbf16>, vector<4x8x8xf32> -> vector<4x8x8xf32>
    "tpu.trace_stop"() : () -> ()
    %cst_84 = arith.constant dense<0xFF800000> : vector<4x8xf32>
    %99 = vector.multi_reduction <maximumf>, %98, %cst_84 [2] : vector<4x8x8xf32> to vector<4x8xf32>
    %100 = vector.shape_cast %99 : vector<4x8xf32> to vector<4x8x1xf32>
    %101 = vector.broadcast %100 : vector<4x8x1xf32> to vector<4x8x8xf32>
    %102 = arith.subf %98, %101 : vector<4x8x8xf32>
    %103 = math.exp %102 : vector<4x8x8xf32>
    %cst_85 = arith.constant dense<0.000000e+00> : vector<4x8xf32>
    %104 = vector.multi_reduction <add>, %103, %cst_85 [2] : vector<4x8x8xf32> to vector<4x8xf32>
    %105 = vector.shape_cast %104 : vector<4x8xf32> to vector<4x8x1xf32>
    %106 = tpu.reciprocal %105 {approx = true} : vector<4x8x1xf32> -> vector<4x8x1xf32>
    %107 = vector.broadcast %106 : vector<4x8x1xf32> to vector<4x8x8xf32>
    %108 = arith.mulf %103, %107 : vector<4x8x8xf32>
    %109 = arith.truncf %108 : vector<4x8x8xf32> to vector<4x8x8xbf16>
    "tpu.trace_start"() <{level = 10 : i32, message = "hqk,hkd->hqd"}> : () -> ()
    %cst_86 = arith.constant dense<0.000000e+00> : vector<4x8x8xf32>
    %110 = tpu.matmul %109, %97, %cst_86 {dimension_numbers = #tpu.dot_dimension_numbers<[2], [1], [1], [2], [0, 0, 0, 1, 1, 2], [0], [0]>} : vector<4x8x8xbf16>, vector<4x8x8xbf16>, vector<4x8x8xf32> -> vector<4x8x8xf32>
    "tpu.trace_stop"() : () -> ()
    %111 = vector.extract_strided_slice %110 {offsets = [0, 0, 0], sizes = [1, 8, 8], strides = [1, 1, 1]} : vector<4x8x8xf32> to vector<1x8x8xf32>
    %112 = vector.shape_cast %111 : vector<1x8x8xf32> to vector<8x8xf32>
    %113 = vector.extract_strided_slice %110 {offsets = [1, 0, 0], sizes = [1, 8, 8], strides = [1, 1, 1]} : vector<4x8x8xf32> to vector<1x8x8xf32>
    %114 = vector.shape_cast %113 : vector<1x8x8xf32> to vector<8x8xf32>
    %115 = vector.extract_strided_slice %110 {offsets = [2, 0, 0], sizes = [1, 8, 8], strides = [1, 1, 1]} : vector<4x8x8xf32> to vector<1x8x8xf32>
    %116 = vector.shape_cast %115 : vector<1x8x8xf32> to vector<8x8xf32>
    %117 = vector.extract_strided_slice %110 {offsets = [3, 0, 0], sizes = [1, 8, 8], strides = [1, 1, 1]} : vector<4x8x8xf32> to vector<1x8x8xf32>
    %118 = vector.shape_cast %117 : vector<1x8x8xf32> to vector<8x8xf32>
    %119 = tpu.concatenate %112, %114, %116, %118 in 1 : vector<8x8xf32>, vector<8x8xf32>, vector<8x8xf32>, vector<8x8xf32> -> vector<8x32xf32>
    %120 = arith.truncf %119 : vector<8x32xf32> to vector<8x32xbf16>
    %cst_87 = arith.constant dense<0.000000e+00> : vector<8x32xf32>
    %121 = tpu.matmul %120, %9, %cst_87 {dimension_numbers = #tpu.dot_dimension_numbers<[1], [0], [0], [1], [0, 0, 1, 1], [], []>} : vector<8x32xbf16>, vector<32x32xbf16>, vector<8x32xf32> -> vector<8x32xf32>
    %122 = vector.broadcast %11 : vector<1x32xf32> to vector<8x32xf32>
    %123 = arith.addf %121, %122 : vector<8x32xf32>
    %124 = arith.addf %51, %123 : vector<8x32xf32>
    %cst_88 = arith.constant dense<0.000000e+00> : vector<8xf32>
    %125 = vector.multi_reduction <add>, %124, %cst_88 [1] : vector<8x32xf32> to vector<8xf32>
    %126 = vector.shape_cast %125 : vector<8xf32> to vector<8x1xf32>
    %cst_89 = arith.constant 3.200000e+01 : f32
    %127 = vector.broadcast %cst_89 : f32 to vector<8x1xf32>
    %128 = arith.divf %126, %127 : vector<8x1xf32>
    %129 = vector.broadcast %128 : vector<8x1xf32> to vector<8x32xf32>
    %130 = arith.subf %124, %129 : vector<8x32xf32>
    %131 = arith.mulf %130, %130 : vector<8x32xf32>
    %cst_90 = arith.constant dense<0.000000e+00> : vector<8xf32>
    %132 = vector.multi_reduction <add>, %131, %cst_90 [1] : vector<8x32xf32> to vector<8xf32>
    %133 = vector.shape_cast %132 : vector<8xf32> to vector<8x1xf32>
    %cst_91 = arith.constant 3.200000e+01 : f32
    %134 = vector.broadcast %cst_91 : f32 to vector<8x1xf32>
    %135 = arith.divf %133, %134 : vector<8x1xf32>
    %cst_92 = arith.constant 9.99999974E-6 : f32
    %136 = vector.broadcast %cst_92 : f32 to vector<8x1xf32>
    %137 = arith.addf %135, %136 : vector<8x1xf32>
    %138 = math.rsqrt %137 : vector<8x1xf32>
    %139 = vector.broadcast %138 : vector<8x1xf32> to vector<8x32xf32>
    %140 = arith.mulf %130, %139 : vector<8x32xf32>
    %141 = vector.broadcast %37 : vector<1x32xf32> to vector<8x32xf32>
    %142 = arith.mulf %140, %141 : vector<8x32xf32>
    %143 = vector.broadcast %39 : vector<1x32xf32> to vector<8x32xf32>
    %144 = arith.addf %142, %143 : vector<8x32xf32>
    %145 = arith.addf %144, %56 : vector<8x32xf32>
    %146 = arith.truncf %145 : vector<8x32xf32> to vector<8x32xbf16>
    %cst_93 = arith.constant dense<0.000000e+00> : vector<8x32xf32>
    %147 = tpu.matmul %146, %13, %cst_93 {dimension_numbers = #tpu.dot_dimension_numbers<[1], [0], [0], [1], [0, 0, 1, 1], [], []>} : vector<8x32xbf16>, vector<32x32xbf16>, vector<8x32xf32> -> vector<8x32xf32>
    %148 = vector.broadcast %15 : vector<1x32xf32> to vector<8x32xf32>
    %149 = arith.addf %147, %148 : vector<8x32xf32>
    %150 = arith.truncf %54 : vector<16x32xf32> to vector<16x32xbf16>
    %cst_94 = arith.constant dense<0.000000e+00> : vector<16x32xf32>
    %151 = tpu.matmul %150, %17, %cst_94 {dimension_numbers = #tpu.dot_dimension_numbers<[1], [0], [0], [1], [0, 0, 1, 1], [], []>} : vector<16x32xbf16>, vector<32x32xbf16>, vector<16x32xf32> -> vector<16x32xf32>
    %152 = vector.broadcast %19 : vector<1x32xf32> to vector<16x32xf32>
    %153 = arith.addf %151, %152 : vector<16x32xf32>
    %154 = arith.truncf %53 : vector<16x32xf32> to vector<16x32xbf16>
    %cst_95 = arith.constant dense<0.000000e+00> : vector<16x32xf32>
    %155 = tpu.matmul %154, %21, %cst_95 {dimension_numbers = #tpu.dot_dimension_numbers<[1], [0], [0], [1], [0, 0, 1, 1], [], []>} : vector<16x32xbf16>, vector<32x32xbf16>, vector<16x32xf32> -> vector<16x32xf32>
    %156 = vector.broadcast %23 : vector<1x32xf32> to vector<16x32xf32>
    %157 = arith.addf %155, %156 : vector<16x32xf32>
    %158 = vector.extract_strided_slice %149 {offsets = [0, 0], sizes = [8, 8], strides = [1, 1]} : vector<8x32xf32> to vector<8x8xf32>
    %159 = vector.extract_strided_slice %149 {offsets = [0, 8], sizes = [8, 8], strides = [1, 1]} : vector<8x32xf32> to vector<8x8xf32>
    %160 = vector.extract_strided_slice %149 {offsets = [0, 16], sizes = [8, 8], strides = [1, 1]} : vector<8x32xf32> to vector<8x8xf32>
    %161 = vector.extract_strided_slice %149 {offsets = [0, 24], sizes = [8, 8], strides = [1, 1]} : vector<8x32xf32> to vector<8x8xf32>
    %162 = vector.shape_cast %158 : vector<8x8xf32> to vector<1x8x8xf32>
    %163 = vector.shape_cast %159 : vector<8x8xf32> to vector<1x8x8xf32>
    %164 = vector.shape_cast %160 : vector<8x8xf32> to vector<1x8x8xf32>
    %165 = vector.shape_cast %161 : vector<8x8xf32> to vector<1x8x8xf32>
    %166 = tpu.concatenate %162, %163, %164, %165 in 0 : vector<1x8x8xf32>, vector<1x8x8xf32>, vector<1x8x8xf32>, vector<1x8x8xf32> -> vector<4x8x8xf32>
    %167 = arith.truncf %166 : vector<4x8x8xf32> to vector<4x8x8xbf16>
    %168 = vector.extract_strided_slice %153 {offsets = [0, 0], sizes = [16, 8], strides = [1, 1]} : vector<16x32xf32> to vector<16x8xf32>
    %169 = vector.extract_strided_slice %153 {offsets = [0, 8], sizes = [16, 8], strides = [1, 1]} : vector<16x32xf32> to vector<16x8xf32>
    %170 = vector.extract_strided_slice %153 {offsets = [0, 16], sizes = [16, 8], strides = [1, 1]} : vector<16x32xf32> to vector<16x8xf32>
    %171 = vector.extract_strided_slice %153 {offsets = [0, 24], sizes = [16, 8], strides = [1, 1]} : vector<16x32xf32> to vector<16x8xf32>
    %172 = vector.shape_cast %168 : vector<16x8xf32> to vector<1x16x8xf32>
    %173 = vector.shape_cast %169 : vector<16x8xf32> to vector<1x16x8xf32>
    %174 = vector.shape_cast %170 : vector<16x8xf32> to vector<1x16x8xf32>
    %175 = vector.shape_cast %171 : vector<16x8xf32> to vector<1x16x8xf32>
    %176 = tpu.concatenate %172, %173, %174, %175 in 0 : vector<1x16x8xf32>, vector<1x16x8xf32>, vector<1x16x8xf32>, vector<1x16x8xf32> -> vector<4x16x8xf32>
    %177 = arith.truncf %176 : vector<4x16x8xf32> to vector<4x16x8xbf16>
    %178 = vector.extract_strided_slice %157 {offsets = [0, 0], sizes = [16, 8], strides = [1, 1]} : vector<16x32xf32> to vector<16x8xf32>
    %179 = vector.extract_strided_slice %157 {offsets = [0, 8], sizes = [16, 8], strides = [1, 1]} : vector<16x32xf32> to vector<16x8xf32>
    %180 = vector.extract_strided_slice %157 {offsets = [0, 16], sizes = [16, 8], strides = [1, 1]} : vector<16x32xf32> to vector<16x8xf32>
    %181 = vector.extract_strided_slice %157 {offsets = [0, 24], sizes = [16, 8], strides = [1, 1]} : vector<16x32xf32> to vector<16x8xf32>
    %182 = vector.shape_cast %178 : vector<16x8xf32> to vector<1x16x8xf32>
    %183 = vector.shape_cast %179 : vector<16x8xf32> to vector<1x16x8xf32>
    %184 = vector.shape_cast %180 : vector<16x8xf32> to vector<1x16x8xf32>
    %185 = vector.shape_cast %181 : vector<16x8xf32> to vector<1x16x8xf32>
    %186 = tpu.concatenate %182, %183, %184, %185 in 0 : vector<1x16x8xf32>, vector<1x16x8xf32>, vector<1x16x8xf32>, vector<1x16x8xf32> -> vector<4x16x8xf32>
    %187 = arith.truncf %186 : vector<4x16x8xf32> to vector<4x16x8xbf16>
    "tpu.trace_start"() <{level = 10 : i32, message = "hqd,hkd->hqk"}> : () -> ()
    %cst_96 = arith.constant dense<0.000000e+00> : vector<4x8x16xf32>
    %188 = tpu.matmul %167, %177, %cst_96 {dimension_numbers = #tpu.dot_dimension_numbers<[2], [2], [1], [1], [0, 0, 0, 1, 1, 1], [0], [0]>} : vector<4x8x8xbf16>, vector<4x16x8xbf16>, vector<4x8x16xf32> -> vector<4x8x16xf32>
    "tpu.trace_stop"() : () -> ()
    %cst_97 = arith.constant dense<0xFF800000> : vector<4x8xf32>
    %189 = vector.multi_reduction <maximumf>, %188, %cst_97 [2] : vector<4x8x16xf32> to vector<4x8xf32>
    %190 = vector.shape_cast %189 : vector<4x8xf32> to vector<4x8x1xf32>
    %191 = vector.broadcast %190 : vector<4x8x1xf32> to vector<4x8x16xf32>
    %192 = arith.subf %188, %191 : vector<4x8x16xf32>
    %193 = math.exp %192 : vector<4x8x16xf32>
    %cst_98 = arith.constant dense<0.000000e+00> : vector<4x8xf32>
    %194 = vector.multi_reduction <add>, %193, %cst_98 [2] : vector<4x8x16xf32> to vector<4x8xf32>
    %195 = vector.shape_cast %194 : vector<4x8xf32> to vector<4x8x1xf32>
    %196 = tpu.reciprocal %195 {approx = true} : vector<4x8x1xf32> -> vector<4x8x1xf32>
    %197 = vector.broadcast %196 : vector<4x8x1xf32> to vector<4x8x16xf32>
    %198 = arith.mulf %193, %197 : vector<4x8x16xf32>
    %199 = arith.truncf %198 : vector<4x8x16xf32> to vector<4x8x16xbf16>
    "tpu.trace_start"() <{level = 10 : i32, message = "hqk,hkd->hqd"}> : () -> ()
    %cst_99 = arith.constant dense<0.000000e+00> : vector<4x8x8xf32>
    %200 = tpu.matmul %199, %187, %cst_99 {dimension_numbers = #tpu.dot_dimension_numbers<[2], [1], [1], [2], [0, 0, 0, 1, 1, 2], [0], [0]>} : vector<4x8x16xbf16>, vector<4x16x8xbf16>, vector<4x8x8xf32> -> vector<4x8x8xf32>
    "tpu.trace_stop"() : () -> ()
    %201 = vector.extract_strided_slice %200 {offsets = [0, 0, 0], sizes = [1, 8, 8], strides = [1, 1, 1]} : vector<4x8x8xf32> to vector<1x8x8xf32>
    %202 = vector.shape_cast %201 : vector<1x8x8xf32> to vector<8x8xf32>
    %203 = vector.extract_strided_slice %200 {offsets = [1, 0, 0], sizes = [1, 8, 8], strides = [1, 1, 1]} : vector<4x8x8xf32> to vector<1x8x8xf32>
    %204 = vector.shape_cast %203 : vector<1x8x8xf32> to vector<8x8xf32>
    %205 = vector.extract_strided_slice %200 {offsets = [2, 0, 0], sizes = [1, 8, 8], strides = [1, 1, 1]} : vector<4x8x8xf32> to vector<1x8x8xf32>
    %206 = vector.shape_cast %205 : vector<1x8x8xf32> to vector<8x8xf32>
    %207 = vector.extract_strided_slice %200 {offsets = [3, 0, 0], sizes = [1, 8, 8], strides = [1, 1, 1]} : vector<4x8x8xf32> to vector<1x8x8xf32>
    %208 = vector.shape_cast %207 : vector<1x8x8xf32> to vector<8x8xf32>
    %209 = tpu.concatenate %202, %204, %206, %208 in 1 : vector<8x8xf32>, vector<8x8xf32>, vector<8x8xf32>, vector<8x8xf32> -> vector<8x32xf32>
    %210 = arith.truncf %209 : vector<8x32xf32> to vector<8x32xbf16>
    %cst_100 = arith.constant dense<0.000000e+00> : vector<8x32xf32>
    %211 = tpu.matmul %210, %25, %cst_100 {dimension_numbers = #tpu.dot_dimension_numbers<[1], [0], [0], [1], [0, 0, 1, 1], [], []>} : vector<8x32xbf16>, vector<32x32xbf16>, vector<8x32xf32> -> vector<8x32xf32>
    %212 = vector.broadcast %27 : vector<1x32xf32> to vector<8x32xf32>
    %213 = arith.addf %211, %212 : vector<8x32xf32>
    %214 = arith.addf %144, %213 : vector<8x32xf32>
    %cst_101 = arith.constant dense<0.000000e+00> : vector<8xf32>
    %215 = vector.multi_reduction <add>, %214, %cst_101 [1] : vector<8x32xf32> to vector<8xf32>
    %216 = vector.shape_cast %215 : vector<8xf32> to vector<8x1xf32>
    %cst_102 = arith.constant 3.200000e+01 : f32
    %217 = vector.broadcast %cst_102 : f32 to vector<8x1xf32>
    %218 = arith.divf %216, %217 : vector<8x1xf32>
    %219 = vector.broadcast %218 : vector<8x1xf32> to vector<8x32xf32>
    %220 = arith.subf %214, %219 : vector<8x32xf32>
    %221 = arith.mulf %220, %220 : vector<8x32xf32>
    %cst_103 = arith.constant dense<0.000000e+00> : vector<8xf32>
    %222 = vector.multi_reduction <add>, %221, %cst_103 [1] : vector<8x32xf32> to vector<8xf32>
    %223 = vector.shape_cast %222 : vector<8xf32> to vector<8x1xf32>
    %cst_104 = arith.constant 3.200000e+01 : f32
    %224 = vector.broadcast %cst_104 : f32 to vector<8x1xf32>
    %225 = arith.divf %223, %224 : vector<8x1xf32>
    %cst_105 = arith.constant 9.99999974E-6 : f32
    %226 = vector.broadcast %cst_105 : f32 to vector<8x1xf32>
    %227 = arith.addf %225, %226 : vector<8x1xf32>
    %228 = math.rsqrt %227 : vector<8x1xf32>
    %229 = vector.broadcast %228 : vector<8x1xf32> to vector<8x32xf32>
    %230 = arith.mulf %220, %229 : vector<8x32xf32>
    %231 = vector.broadcast %41 : vector<1x32xf32> to vector<8x32xf32>
    %232 = arith.mulf %230, %231 : vector<8x32xf32>
    %233 = vector.broadcast %43 : vector<1x32xf32> to vector<8x32xf32>
    %234 = arith.addf %232, %233 : vector<8x32xf32>
    %235 = arith.truncf %234 : vector<8x32xf32> to vector<8x32xbf16>
    %cst_106 = arith.constant dense<0.000000e+00> : vector<8x64xf32>
    %236 = tpu.matmul %235, %29, %cst_106 {dimension_numbers = #tpu.dot_dimension_numbers<[1], [0], [0], [1], [0, 0, 1, 1], [], []>} : vector<8x32xbf16>, vector<32x64xbf16>, vector<8x64xf32> -> vector<8x64xf32>
    %237 = vector.broadcast %31 : vector<1x64xf32> to vector<8x64xf32>
    %238 = arith.addf %236, %237 : vector<8x64xf32>
    %cst_107 = arith.constant 0.000000e+00 : f32
    %239 = vector.broadcast %cst_107 : f32 to vector<8x64xf32>
    %240 = arith.maximumf %238, %239 : vector<8x64xf32>
    %241 = arith.truncf %240 : vector<8x64xf32> to vector<8x64xbf16>
    %cst_108 = arith.constant dense<0.000000e+00> : vector<8x32xf32>
    %242 = tpu.matmul %241, %33, %cst_108 {dimension_numbers = #tpu.dot_dimension_numbers<[1], [0], [0], [1], [0, 0, 1, 1], [], []>} : vector<8x64xbf16>, vector<64x32xbf16>, vector<8x32xf32> -> vector<8x32xf32>
    %243 = vector.broadcast %35 : vector<1x32xf32> to vector<8x32xf32>
    %244 = arith.addf %242, %243 : vector<8x32xf32>
    %245 = arith.addf %234, %244 : vector<8x32xf32>
    %cst_109 = arith.constant dense<0.000000e+00> : vector<8xf32>
    %246 = vector.multi_reduction <add>, %245, %cst_109 [1] : vector<8x32xf32> to vector<8xf32>
    %247 = vector.shape_cast %246 : vector<8xf32> to vector<8x1xf32>
    %cst_110 = arith.constant 3.200000e+01 : f32
    %248 = vector.broadcast %cst_110 : f32 to vector<8x1xf32>
    %249 = arith.divf %247, %248 : vector<8x1xf32>
    %250 = vector.broadcast %249 : vector<8x1xf32> to vector<8x32xf32>
    %251 = arith.subf %245, %250 : vector<8x32xf32>
    %252 = arith.mulf %251, %251 : vector<8x32xf32>
    %cst_111 = arith.constant dense<0.000000e+00> : vector<8xf32>
    %253 = vector.multi_reduction <add>, %252, %cst_111 [1] : vector<8x32xf32> to vector<8xf32>
    %254 = vector.shape_cast %253 : vector<8xf32> to vector<8x1xf32>
    %cst_112 = arith.constant 3.200000e+01 : f32
    %255 = vector.broadcast %cst_112 : f32 to vector<8x1xf32>
    %256 = arith.divf %254, %255 : vector<8x1xf32>
    %cst_113 = arith.constant 9.99999974E-6 : f32
    %257 = vector.broadcast %cst_113 : f32 to vector<8x1xf32>
    %258 = arith.addf %256, %257 : vector<8x1xf32>
    %259 = math.rsqrt %258 : vector<8x1xf32>
    %260 = vector.broadcast %259 : vector<8x1xf32> to vector<8x32xf32>
    %261 = arith.mulf %251, %260 : vector<8x32xf32>
    %262 = vector.broadcast %45 : vector<1x32xf32> to vector<8x32xf32>
    %263 = arith.mulf %261, %262 : vector<8x32xf32>
    %264 = vector.broadcast %47 : vector<1x32xf32> to vector<8x32xf32>
    %265 = arith.addf %263, %264 : vector<8x32xf32>
    %c0_114 = arith.constant 0 : index
    %c0_115 = arith.constant 0 : index
    %266 = vector.load %arg33[%c0_114, %c0_115] : memref<8x32xf32, #tpu.memory_space<vmem>>, vector<8x32xf32>
    tpu.vector_store %arg33[%c0_114, %c0_115], %265 {strides = array<i32>} : memref<8x32xf32, #tpu.memory_space<vmem>>, vector<8x32xf32>,
    %c1_i32 = arith.constant 1 : i32
    %267 = arith.cmpi eq, %arg1, %c1_i32 : i32
    %268 = arith.extui %267 : i1 to i32
    %c0_i32_116 = arith.constant 0 : i32
    %269 = arith.cmpi ne, %268, %c0_i32_116 : i32
    scf.if %269 {
      %c0_117 = arith.constant 0 : index
      %c0_118 = arith.constant 0 : index
      %270 = vector.load %arg30[%c0_117, %c0_118] : memref<1x32xf32, #tpu.memory_space<vmem>>, vector<1x32xf32>
      %c0_119 = arith.constant 0 : index
      %c0_120 = arith.constant 0 : index
      %271 = vector.load %arg31[%c0_119, %c0_120] : memref<1x32xf32, #tpu.memory_space<vmem>>, vector<1x32xf32>
      %cst_121 = arith.constant dense<0.000000e+00> : vector<8xf32>
      %272 = vector.multi_reduction <add>, %265, %cst_121 [1] : vector<8x32xf32> to vector<8xf32>
      %273 = vector.shape_cast %272 : vector<8xf32> to vector<8x1xf32>
      %cst_122 = arith.constant 3.200000e+01 : f32
      %274 = vector.broadcast %cst_122 : f32 to vector<8x1xf32>
      %275 = arith.divf %273, %274 : vector<8x1xf32>
      %276 = vector.broadcast %275 : vector<8x1xf32> to vector<8x32xf32>
      %277 = arith.subf %265, %276 : vector<8x32xf32>
      %278 = arith.mulf %277, %277 : vector<8x32xf32>
      %cst_123 = arith.constant dense<0.000000e+00> : vector<8xf32>
      %279 = vector.multi_reduction <add>, %278, %cst_123 [1] : vector<8x32xf32> to vector<8xf32>
      %280 = vector.shape_cast %279 : vector<8xf32> to vector<8x1xf32>
      %cst_124 = arith.constant 3.200000e+01 : f32
      %281 = vector.broadcast %cst_124 : f32 to vector<8x1xf32>
      %282 = arith.divf %280, %281 : vector<8x1xf32>
      %cst_125 = arith.constant 9.99999974E-6 : f32
      %283 = vector.broadcast %cst_125 : f32 to vector<8x1xf32>
      %284 = arith.addf %282, %283 : vector<8x1xf32>
      %285 = math.rsqrt %284 : vector<8x1xf32>
      %286 = vector.broadcast %285 : vector<8x1xf32> to vector<8x32xf32>
      %287 = arith.mulf %277, %286 : vector<8x32xf32>
      %288 = vector.broadcast %270 : vector<1x32xf32> to vector<8x32xf32>
      %289 = arith.mulf %287, %288 : vector<8x32xf32>
      %290 = vector.broadcast %271 : vector<1x32xf32> to vector<8x32xf32>
      %291 = arith.addf %289, %290 : vector<8x32xf32>
      %c0_126 = arith.constant 0 : index
      %c0_127 = arith.constant 0 : index
      %c0_128 = arith.constant 0 : index
      %292 = vector.load %arg32[%c0_126, %c0_127, %c0_128] : memref<1x8x32xf32, #tpu.memory_space<vmem>>, vector<1x8x32xf32>
      %293 = vector.shape_cast %292 : vector<1x8x32xf32> to vector<8x32xf32>
      %294 = vector.shape_cast %291 : vector<8x32xf32> to vector<1x8x32xf32>
      tpu.vector_store %arg32[%c0_126, %c0_127, %c0_128], %294 {strides = array<i32>} : memref<1x8x32xf32, #tpu.memory_space<vmem>>, vector<1x8x32xf32>,
    } else {
    }
    return
  }
  func.func @transform_0(%arg0: i32, %arg1: i32) -> (i32, i32, i32) {
    %c0_i32 = arith.constant 0 : i32
    %c0_i32_0 = arith.constant 0 : i32
    %c0_i32_1 = arith.constant 0 : i32
    return %arg0, %c0_i32, %c0_i32_0 : i32, i32, i32
  }
  func.func @transform_1(%arg0: i32, %arg1: i32) -> (i32, i32, i32) {
    %c0_i32 = arith.constant 0 : i32
    %c0_i32_0 = arith.constant 0 : i32
    %c0_i32_1 = arith.constant 0 : i32
    return %arg0, %c0_i32, %c0_i32_0 : i32, i32, i32
  }
  func.func @transform_2(%arg0: i32, %arg1: i32) -> (i32, i32, i32) {
    %c0_i32 = arith.constant 0 : i32
    %c0_i32_0 = arith.constant 0 : i32
    %c0_i32_1 = arith.constant 0 : i32
    return %arg0, %c0_i32, %c0_i32_0 : i32, i32, i32
  }
  func.func @transform_3(%arg0: i32, %arg1: i32) -> (i32, i32, i32) {
    %c0_i32 = arith.constant 0 : i32
    %c0_i32_0 = arith.constant 0 : i32
    %c0_i32_1 = arith.constant 0 : i32
    return %arg0, %c0_i32, %c0_i32_0 : i32, i32, i32
  }
  func.func @transform_4(%arg0: i32, %arg1: i32) -> (i32, i32, i32) {
    %c0_i32 = arith.constant 0 : i32
    %c0_i32_0 = arith.constant 0 : i32
    %c0_i32_1 = arith.constant 0 : i32
    return %arg1, %c0_i32, %c0_i32_0 : i32, i32, i32
  }
  func.func @transform_5(%arg0: i32, %arg1: i32) -> (i32, i32, i32) {
    %c0_i32 = arith.constant 0 : i32
    %c0_i32_0 = arith.constant 0 : i32
    %c0_i32_1 = arith.constant 0 : i32
    return %arg1, %c0_i32, %c0_i32_0 : i32, i32, i32
  }
  func.func @transform_6(%arg0: i32, %arg1: i32) -> (i32, i32, i32) {
    %c0_i32 = arith.constant 0 : i32
    %c0_i32_0 = arith.constant 0 : i32
    %c0_i32_1 = arith.constant 0 : i32
    return %arg1, %c0_i32, %c0_i32_0 : i32, i32, i32
  }
  func.func @transform_7(%arg0: i32, %arg1: i32) -> (i32, i32, i32) {
    %c0_i32 = arith.constant 0 : i32
    %c0_i32_0 = arith.constant 0 : i32
    %c0_i32_1 = arith.constant 0 : i32
    return %arg1, %c0_i32, %c0_i32_0 : i32, i32, i32
  }
  func.func @transform_8(%arg0: i32, %arg1: i32) -> (i32, i32, i32) {
    %c0_i32 = arith.constant 0 : i32
    %c0_i32_0 = arith.constant 0 : i32
    %c0_i32_1 = arith.constant 0 : i32
    return %arg1, %c0_i32, %c0_i32_0 : i32, i32, i32
  }
  func.func @transform_9(%arg0: i32, %arg1: i32) -> (i32, i32, i32) {
    %c0_i32 = arith.constant 0 : i32
    %c0_i32_0 = arith.constant 0 : i32
    %c0_i32_1 = arith.constant 0 : i32
    return %arg1, %c0_i32, %c0_i32_0 : i32, i32, i32
  }
  func.func @transform_10(%arg0: i32, %arg1: i32) -> (i32, i32, i32) {
    %c0_i32 = arith.constant 0 : i32
    %c0_i32_0 = arith.constant 0 : i32
    %c0_i32_1 = arith.constant 0 : i32
    return %arg1, %c0_i32, %c0_i32_0 : i32, i32, i32
  }
  func.func @transform_11(%arg0: i32, %arg1: i32) -> (i32, i32, i32) {
    %c0_i32 = arith.constant 0 : i32
    %c0_i32_0 = arith.constant 0 : i32
    %c0_i32_1 = arith.constant 0 : i32
    return %arg1, %c0_i32, %c0_i32_0 : i32, i32, i32
  }
  func.func @transform_12(%arg0: i32, %arg1: i32) -> (i32, i32, i32) {
    %c0_i32 = arith.constant 0 : i32
    %c0_i32_0 = arith.constant 0 : i32
    %c0_i32_1 = arith.constant 0 : i32
    return %arg1, %c0_i32, %c0_i32_0 : i32, i32, i32
  }
  func.func @transform_13(%arg0: i32, %arg1: i32) -> (i32, i32, i32) {
    %c0_i32 = arith.constant 0 : i32
    %c0_i32_0 = arith.constant 0 : i32
    %c0_i32_1 = arith.constant 0 : i32
    return %arg1, %c0_i32, %c0_i32_0 : i32, i32, i32
  }
  func.func @transform_14(%arg0: i32, %arg1: i32) -> (i32, i32, i32) {
    %c0_i32 = arith.constant 0 : i32
    %c0_i32_0 = arith.constant 0 : i32
    %c0_i32_1 = arith.constant 0 : i32
    return %arg1, %c0_i32, %c0_i32_0 : i32, i32, i32
  }
  func.func @transform_15(%arg0: i32, %arg1: i32) -> (i32, i32, i32) {
    %c0_i32 = arith.constant 0 : i32
    %c0_i32_0 = arith.constant 0 : i32
    %c0_i32_1 = arith.constant 0 : i32
    return %arg1, %c0_i32, %c0_i32_0 : i32, i32, i32
  }
  func.func @transform_16(%arg0: i32, %arg1: i32) -> (i32, i32, i32) {
    %c0_i32 = arith.constant 0 : i32
    %c0_i32_0 = arith.constant 0 : i32
    %c0_i32_1 = arith.constant 0 : i32
    return %arg1, %c0_i32, %c0_i32_0 : i32, i32, i32
  }
  func.func @transform_17(%arg0: i32, %arg1: i32) -> (i32, i32, i32) {
    %c0_i32 = arith.constant 0 : i32
    %c0_i32_0 = arith.constant 0 : i32
    %c0_i32_1 = arith.constant 0 : i32
    return %arg1, %c0_i32, %c0_i32_0 : i32, i32, i32
  }
  func.func @transform_18(%arg0: i32, %arg1: i32) -> (i32, i32, i32) {
    %c0_i32 = arith.constant 0 : i32
    %c0_i32_0 = arith.constant 0 : i32
    %c0_i32_1 = arith.constant 0 : i32
    return %arg1, %c0_i32, %c0_i32_0 : i32, i32, i32
  }
  func.func @transform_19(%arg0: i32, %arg1: i32) -> (i32, i32, i32) {
    %c0_i32 = arith.constant 0 : i32
    %c0_i32_0 = arith.constant 0 : i32
    %c0_i32_1 = arith.constant 0 : i32
    return %arg1, %c0_i32, %c0_i32_0 : i32, i32, i32
  }
  func.func @transform_20(%arg0: i32, %arg1: i32) -> (i32, i32, i32) {
    %c0_i32 = arith.constant 0 : i32
    %c0_i32_0 = arith.constant 0 : i32
    %c0_i32_1 = arith.constant 0 : i32
    return %arg1, %c0_i32, %c0_i32_0 : i32, i32, i32
  }
  func.func @transform_21(%arg0: i32, %arg1: i32) -> (i32, i32, i32) {
    %c0_i32 = arith.constant 0 : i32
    %c0_i32_0 = arith.constant 0 : i32
    %c0_i32_1 = arith.constant 0 : i32
    return %arg1, %c0_i32, %c0_i32_0 : i32, i32, i32
  }
  func.func @transform_22(%arg0: i32, %arg1: i32) -> (i32, i32, i32) {
    %c0_i32 = arith.constant 0 : i32
    %c0_i32_0 = arith.constant 0 : i32
    %c0_i32_1 = arith.constant 0 : i32
    return %arg1, %c0_i32, %c0_i32_0 : i32, i32, i32
  }
  func.func @transform_23(%arg0: i32, %arg1: i32) -> (i32, i32, i32) {
    %c0_i32 = arith.constant 0 : i32
    %c0_i32_0 = arith.constant 0 : i32
    %c0_i32_1 = arith.constant 0 : i32
    return %arg1, %c0_i32, %c0_i32_0 : i32, i32, i32
  }
  func.func @transform_24(%arg0: i32, %arg1: i32) -> (i32, i32, i32) {
    %c0_i32 = arith.constant 0 : i32
    %c0_i32_0 = arith.constant 0 : i32
    %c0_i32_1 = arith.constant 0 : i32
    return %arg1, %c0_i32, %c0_i32_0 : i32, i32, i32
  }
  func.func @transform_25(%arg0: i32, %arg1: i32) -> (i32, i32, i32) {
    %c0_i32 = arith.constant 0 : i32
    %c0_i32_0 = arith.constant 0 : i32
    %c0_i32_1 = arith.constant 0 : i32
    return %arg1, %c0_i32, %c0_i32_0 : i32, i32, i32
  }
  func.func @transform_26(%arg0: i32, %arg1: i32) -> (i32, i32, i32) {
    %c0_i32 = arith.constant 0 : i32
    %c0_i32_0 = arith.constant 0 : i32
    %c0_i32_1 = arith.constant 0 : i32
    return %arg1, %c0_i32, %c0_i32_0 : i32, i32, i32
  }
  func.func @transform_27(%arg0: i32, %arg1: i32) -> (i32, i32, i32) {
    %c0_i32 = arith.constant 0 : i32
    %c0_i32_0 = arith.constant 0 : i32
    %c0_i32_1 = arith.constant 0 : i32
    return %arg1, %c0_i32, %c0_i32_0 : i32, i32, i32
  }
  func.func @transform_28(%arg0: i32, %arg1: i32) -> (i32, i32) {
    %c0_i32 = arith.constant 0 : i32
    %c0_i32_0 = arith.constant 0 : i32
    %c0_i32_1 = arith.constant 0 : i32
    return %c0_i32, %c0_i32_0 : i32, i32
  }
  func.func @transform_29(%arg0: i32, %arg1: i32) -> (i32, i32) {
    %c0_i32 = arith.constant 0 : i32
    %c0_i32_0 = arith.constant 0 : i32
    %c0_i32_1 = arith.constant 0 : i32
    return %c0_i32, %c0_i32_0 : i32, i32
  }
  func.func @transform_30(%arg0: i32, %arg1: i32) -> (i32, i32, i32) {
    %c0_i32 = arith.constant 0 : i32
    %c0_i32_0 = arith.constant 0 : i32
    %c0_i32_1 = arith.constant 0 : i32
    return %arg0, %c0_i32, %c0_i32_0 : i32, i32, i32
  }
}

</mosaic_0001>

<bundles_post_ra>
// kernel: tpu_custom_call.1
= control target key start
LH: loop header
LB: loop body
LE: loop exit
PB: predicated region body
PF: predicated region fallthrough
CT: control target
= control target key end

     0   :  { %s6046_s6 = smov 1   ;;  %s6047_s10 = smov 2   ;;  %s7847_s0 = inlined_call_operand.smem [shape: u32[31], index: -1, kind: input, shape index: {}] }
   0x1   :  { %s6128_s5 = sld [smem:[%s7847_s0]]   ;;  %s6048_s14 = smov 3  }
   0x2   :  { %s6133_s9 = sld [smem:[%s7847_s0 + %s6046_s6]]   ;;  %s6049_s18 = smov 4  }
   0x3   :  { %s6138_s13 = sld [smem:[%s7847_s0 + %s6047_s10]]   ;;  %s6050_s22 = smov 5  }
   0x4   :  { %s6143_s17 = sld [smem:[%s7847_s0 + %s6048_s14]]   ;;  %s6051_s26 = smov 6  }
   0x5   :  { %s6148_s21 = sld [smem:[%s7847_s0 + %s6049_s18]]   ;;  %s6052_s30 = smov 7  }
   0x6   :  { %s6153_s25 = sld [smem:[%s7847_s0 + %s6050_s22]]   ;;  %s6053_s4 = smov 8  }
   0x7   :  { %7938 = sst [smem:[#allocation71_spill]] %s6128_s5  ;;  %s6054_s10 = smov 9  }
   0x8   :  { %7939 = sst [smem:[#allocation72_spill]] %s6133_s9  ;;  %s6055_s15 = smov 10  }
   0x9   :  { %7940 = sst [smem:[#allocation73_spill]] %s6138_s13  ;;  %s6056_s20 = smov 11  }
   0xa   :  { %7941 = sst [smem:[#allocation74_spill]] %s6143_s17  ;;  %s6058_s1 = smov 13  }
   0xb   :  { %7942 = sst [smem:[#allocation75_spill]] %s6148_s21  ;;  %s6059_s7 = smov 14  }
   0xc   :  { %7943 = sst [smem:[#allocation76_spill]] %s6153_s25  ;;  %s6061_s22 = smov 16  }
   0xd   :  { %s6158_s29 = sld [smem:[%s7847_s0 + %s6051_s26]]   ;;  %s6057_s26 = smov 12  }
   0xe   :  { %s6163_s3 = sld [smem:[%s7847_s0 + %s6052_s30]]   ;;  %s6062_s28 = smov 17  }
   0xf   :  { %s6168_s8 = sld [smem:[%s7847_s0 + %s6053_s4]]  }
  0x10   :  { %s6173_s14 = sld [smem:[%s7847_s0 + %s6054_s10]]  }
  0x11   :  { %s6178_s19 = sld [smem:[%s7847_s0 + %s6055_s15]]   ;;  %s6060_s15 = smov 15  }
  0x12   :  { %s6183_s24 = sld [smem:[%s7847_s0 + %s6056_s20]]  }
  0x13   :  { %7944 = sst [smem:[#allocation77_spill]] %s6158_s29 }
  0x14   :  { %7945 = sst [smem:[#allocation78_spill]] %s6163_s3 }
  0x15   :  { %7946 = sst [smem:[#allocation79_spill]] %s6168_s8 }
  0x16   :  { %7947 = sst [smem:[#allocation80_spill]] %s6173_s14 }
  0x17   :  { %7948 = sst [smem:[#allocation81_spill]] %s6178_s19 }
  0x18   :  { %7949 = sst [smem:[#allocation82_spill]] %s6183_s24 }
  0x19   :  { %s6188_s30 = sld [smem:[%s7847_s0 + %s6057_s26]]  }
  0x1a   :  { %s6193_s6 = sld [smem:[%s7847_s0 + %s6058_s1]]  }
  0x1b   :  { %s6198_s12 = sld [smem:[%s7847_s0 + %s6059_s7]]   ;;  %s6063_s7 = smov 18  }
  0x1c   :  { %s6203_s20 = sld [smem:[%s7847_s0 + %s6060_s15]]   ;;  %s6064_s15 = smov 19  }
  0x1d   :  { %s6208_s27 = sld [smem:[%s7847_s0 + %s6061_s22]]   ;;  %s6065_s22 = smov 20  }
  0x1e   :  { %s6213_s4 = sld [smem:[%s7847_s0 + %s6062_s28]]   ;;  %s6066_s28 = smov 21  }
  0x1f   :  { %7950 = sst [smem:[#allocation83_spill]] %s6188_s30 }
  0x20   :  { %7951 = sst [smem:[#allocation84_spill]] %s6193_s6 }
  0x21   :  { %7952 = sst [smem:[#allocation85_spill]] %s6198_s12 }
  0x22   :  { %7953 = sst [smem:[#allocation86_spill]] %s6203_s20 }
  0x23   :  { %7954 = sst [smem:[#allocation87_spill]] %s6208_s27 }
  0x24   :  { %7955 = sst [smem:[#allocation88_spill]] %s6213_s4 }
  0x25   :  { %s6218_s12 = sld [smem:[%s7847_s0 + %s6063_s7]]   ;;  %s6067_s7 = smov 22  }
  0x26   :  { %s6223_s30 = sld [smem:[%s7847_s0 + %s6064_s15]]   ;;  %s6068_s15 = smov 23  }
  0x27   :  { %s6228_s27 = sld [smem:[%s7847_s0 + %s6065_s22]]   ;;  %s6069_s22 = smov 24  }
  0x28   :  { %s6233_s19 = sld [smem:[%s7847_s0 + %s6066_s28]]   ;;  %s6070_s28 = smov 25  }
  0x29   :  { %s6243_s8 = sld [smem:[%s7847_s0 + %s6068_s15]]   ;;  %s6072_s15 = smov 27  }
  0x2a   :  { %s6253_s29 = sld [smem:[%s7847_s0 + %s6070_s28]]   ;;  %s6074_s28 = smov 29  }
  0x2b   :  { %7956 = sst [smem:[#allocation89_spill]] %s6218_s12 }
  0x2c   :  { %7957 = sst [smem:[#allocation90_spill]] %s6223_s30 }
  0x2d   :  { %7958 = sst [smem:[#allocation91_spill]] %s6228_s27 }
  0x2e   :  { %7959 = sst [smem:[#allocation92_spill]] %s6233_s19 }
  0x2f   :  { %s6238_s12 = sld [smem:[%s7847_s0 + %s6067_s7]]   ;;  %s6071_s7 = smov 26  }
  0x30   :  { %7961 = sst [smem:[#allocation94_spill]] %s6243_s8 }
  0x31   :  { %s6248_s27 = sld [smem:[%s7847_s0 + %s6069_s22]]   ;;  %s6073_s22 = smov 28  }
  0x32   :  { %7963 = sst [smem:[#allocation96_spill]] %s6253_s29 }
  0x33   :  { %s6263_s21 = sld [smem:[%s7847_s0 + %s6072_s15]]  }
  0x34   :  { %s6273_s5 = sld [smem:[%s7847_s0 + %s6074_s28]]  }
  0x35   :  { %7960 = sst [smem:[#allocation93_spill]] %s6238_s12 }
  0x36   :  { %s6258_s12 = sld [smem:[%s7847_s0 + %s6071_s7]]   ;;  %s6075_s7 = smov 30  }
  0x37   :  { %7962 = sst [smem:[#allocation95_spill]] %s6248_s27 }
  0x38   :  { %s6268_s27 = sld [smem:[%s7847_s0 + %s6073_s22]]  }
  0x39   :  { %7965 = sst [smem:[#allocation98_spill]] %s6263_s21 }
  0x3a   :  { %7967 = sst [smem:[#allocation100_spill]] %s6273_s5 }
  0x3c   :  { %7964 = sst [smem:[#allocation97_spill]] %s6258_s12 }
  0x3d   :  { %s6278_s12 = sld [smem:[%s7847_s0 + %s6075_s7]]  }
  0x3e   :  { %7966 = sst [smem:[#allocation99_spill]] %s6268_s27 }
  0x43   :  { %7968 = sst [smem:[#allocation101_spill]] %s6278_s12 }
  0x44   :  { %66 = vsyncpa [#allocation5], 0 }
  0x45   :  { %68 = vsyncpa [#allocation5 + $0x1], 0 }
  0x46   :  { %69 = vsyncpa [#allocation8], 0 }
  0x47   :  { %71 = vsyncpa [#allocation8 + $0x1], 0 }
  0x48   :  { %72 = vsyncpa [#allocation11], 0 }
  0x49   :  { %74 = vsyncpa [#allocation11 + $0x1], 0 }
  0x4a   :  { %75 = vsyncpa [#allocation14], 0 }
  0x4b   :  { %77 = vsyncpa [#allocation14 + $0x1], 0 }
  0x4c   :  { %78 = vsyncpa [#allocation17], 0 }
  0x4d   :  { %80 = vsyncpa [#allocation17 + $0x1], 0 }
  0x4e   :  { %81 = vsyncpa [#allocation20], 0 }
  0x4f   :  { %83 = vsyncpa [#allocation20 + $0x1], 0 }
  0x50   :  { %84 = vsyncpa [#allocation23], 0 }
  0x51   :  { %86 = vsyncpa [#allocation23 + $0x1], 0 }
  0x52   :  { %87 = vsyncpa [#allocation26], 0 }
  0x53   :  { %89 = vsyncpa [#allocation26 + $0x1], 0 }
  0x54   :  { %90 = vsyncpa [#allocation29], 0 }
  0x55   :  { %92 = vsyncpa [#allocation29 + $0x1], 0 }
  0x56   :  { %93 = vsyncpa [#allocation32], 0 }
  0x57   :  { %95 = vsyncpa [#allocation32 + $0x1], 0 }
  0x58   :  { %96 = vsyncpa [#allocation35], 0 }
  0x59   :  { %98 = vsyncpa [#allocation35 + $0x1], 0 }
  0x5a   :  { %99 = vsyncpa [#allocation38], 0 }
  0x5b   :  { %101 = vsyncpa [#allocation38 + $0x1], 0 }
  0x5c   :  { %102 = vsyncpa [#allocation41], 0 }
  0x5d   :  { %104 = vsyncpa [#allocation41 + $0x1], 0 }
  0x5e   :  { %105 = vsyncpa [#allocation44], 0 }
  0x5f   :  { %107 = vsyncpa [#allocation44 + $0x1], 0 }
  0x60   :  { %108 = vsyncpa [#allocation47], 0 }
  0x61   :  { %110 = vsyncpa [#allocation47 + $0x1], 0 }
  0x62   :  { %111 = vsyncpa [#allocation50], 0 }
  0x63   :  { %112 = vsyncpa [#allocation6], 0 }
  0x64   :  { %114 = vsyncpa [#allocation6 + $0x1], 0  ;;  %s6280_s0 = smov 0   ;;  %s6282_s15 = smov 0  }
  0x65   :  { %s6284_s16 = smov 0   ;;  %s6286_s18 = smov 0  }
  0x66   :  { %s6288_s22 = smov 0   ;;  %s6290_s23 = smov 0  }
  0x67   :  { %s6292_s26 = smov 0   ;;  %s6294_s28 = smov 0  }
  0x68   :  { %s6296_s1 = smov 0   ;;  %s6298_s2 = smov 0  }
  0x69   :  { %s6300_s7 = smov 0  }
  0x6a LB: > { %s7969_s25 = sld [smem:[#allocation76_spill]]  ;;  %s7970_s24 = sld [smem:[#allocation82_spill]]  ;;  %s6036_s1 = sphi %s6296_s1, %s8100_s1   ;;  %s6032_s28 = sphi %s6294_s28, %s8099_s28   ;;  %s6028_s26 = sphi %s6292_s26, %s8098_s26   ;;  %s6024_s23 = sphi %s6290_s23, %s8090_s23   ;;  %s6020_s22 = sphi %s6288_s22, %s8097_s22   ;;  %s6016_s18 = sphi %s6286_s18, %s8096_s18   ;;  %s6012_s16 = sphi %s6284_s16, %s8095_s16   ;;  %s6008_s15 = sphi %s6282_s15, %s8094_s15   ;;  %s6004_s0 = sphi %s6280_s0, %s8093_s0   ;;  %s6044_s7 = sphi %s6300_s7, %s120_s7   ;;  %s6040_s2 = sphi %s6298_s2, %s8101_s2  }
  0x6b   : > { %s7971_s13 = sld [smem:[#allocation73_spill]]  ;;  %s7972_s17 = sld [smem:[#allocation74_spill]] }
  0x6c   : > { %s7973_s14 = sld [smem:[#allocation80_spill]]  ;;  %s7974_s3 = sld [smem:[#allocation78_spill]] }
  0x6d   : > { %s7975_s9 = sld [smem:[#allocation72_spill]]  ;;  %s7976_s27 = sld [smem:[#allocation99_spill]] }
  0x6e   : > { %s7977_s5 = sld [smem:[#allocation100_spill]]  ;;  %7978 = sst [smem:[#allocation102_spill]] %s6016_s18 }
  0x6f   : > { %7979 = sst [smem:[#allocation103_spill]] %s6024_s23  ;;  %s6336_s10 = sadd.s32 4294967295, %s6044_s7  }
  0x70   : > { %7980 = sst [smem:[#allocation104_spill]] %s6028_s26  ;;  %s4343_s11 = sadd.s32 4294967294, %s6044_s7  }
  0x71   : > { %7981 = sst [smem:[#allocation105_spill]] %s6032_s28  ;;  %s129_s12 = sadd.s32 1, %s6036_s1 }
  0x72   : > { %7982 = sst [smem:[#allocation106_spill]] %s6044_s7  ;;  %s132_s28 = sadd.s32 1, %s6040_s2 }
  0x73   : > { %p130_p0 = scmp.ge.s32.totalorder %s129_s12, 2  ;;  %s139_s26 = sadd.s32 1, %s6024_s23 }
  0x74   : > { %p146_p1 = scmp.ne.s32.totalorder %s6024_s23, %s6020_s22  ;;  %p147_p2 = scmp.eq.s32.totalorder %s6044_s7, 0 }
  0x75   : > { %s8103_s12 = smov (%p130_p0, %s129_s12), 0  ;;  %s8105_s28 = smov (!%p130_p0, %s132_s28), %s6040_s2 }
  0x76   : > { %7983 = sst [smem:[#allocation107_spill]] %s8103_s12  ;;  %p6353_p3 = por %p147_p2, %p146_p1 }
  0x77   : > { %p7871_p4 = scmp.ne.s32.totalorder %s6020_s22, %s6016_s18  ;;  %p134_p5 = scmp.ge.s32.totalorder %s8105_s28, 2 }
  0x78   : > { %s7984_s21 = scalar_select %p6353_p3, 1, 0 }
  0x79   : > { %p7872_p6 = scmp.eq.s32.totalorder %s6336_s10, 0  ;;  %s240_s29 = ssub.s32 %s6036_s1, %s8103_s12 }
  0x7a   : > { %s243_s8 = sadd.s32 1, %s6012_s16  ;;  %s8107_s28 = smov (%p134_p5, %s8105_s28), 0 }
  0x7b   : > { %7985 = sst [smem:[#allocation108_spill]] %s8107_s28  ;;  %p6370_p7 = por %p7872_p6, %p7871_p4 }
  0x7c   : > { %p241_p8 = scmp.eq.s32.totalorder %s240_s29, 0  ;;  %s136_s30 = ssub.s32 %s6040_s2, %s8107_s28 }
  0x7d   : > { %s7986_s19 = scalar_select %p6370_p7, 1, 0 }
  0x7e   : > { %p250_p9 = scmp.ne.s32.totalorder %s6012_s16, %s6008_s15  ;;  %p137_p10 = scmp.eq.s32.totalorder %s136_s30, 0 }
  0x7f   : > { %p256_p11 = scmp.ne.s32.totalorder %s6008_s15, %s6004_s0  ;;  %p920_p0 = scmp.eq.s32.totalorder %s6336_s10, 3 }
  0x80   : > { %s6381_s12 = scalar_select %p241_p8, %s6012_s16, %s243_s8  }
  0x81   : > { %s6384_s4 = scalar_select %p137_p10, %s6024_s23, %s139_s26  }
  0x82   : > { %7987 = sst [smem:[#allocation109_spill]] %s6381_s12  ;;  %p6388_p12 = por %p250_p9, %p147_p2 }
  0x83   : > { %7988 = sst [smem:[#allocation110_spill]] %s6384_s4  ;;  %p6394_p13 = por %p256_p11, %p7872_p6 }
  0x84   : > { %s7989_s20 = scalar_select %p6388_p12, 1, 0 }
  0x85   : > { %s7990_s6 = scalar_select %p6394_p13, 1, 0 }
  0x86   : > { %p926_p5 = scmp.eq.s32.totalorder %s4343_s11, 3  ;;  %p4344_p4 = scmp.ge.s32.totalorder %s6044_s7, 1 }
  0x87   : > { %7991 = sst [smem:[#allocation111_spill]] %s7990_s6  ;;  %p933_p8 = scmp.lt.s32.totalorder %s6044_s7, 5 }
  0x88   : > { %p6404_p10 = por %p920_p0, %p146_p1  ;;  %p7994_p2 = scmp.ne.s32.totalorder %s6020_s22, %s6016_s18 }
  0x89   : > { %p6415_p11 = pnand %p4344_p4, %p933_p8  ;;  %s6076_s0 = smov [#allocation48]  }
  0x8a   : > { %s7992_s29 = scalar_select %p6404_p10, 1, 0 }
  0x8b   : > { %p6411_p9 = por %p926_p5, %p7994_p2  ;;  %p4795_p6 = pneg %p6415_p11 }
  0x8c   : > { %7993 = sst [smem:[#allocation112_spill]] %s7992_s29  ;;  %s946_s26 = sshll.u32 %s6076_s0, 4  ;;  %s947_s26 = int_to_ptr.vmem [resolvable:$true] %s946_s26 }
  0x8d   : > { %s7995_s8 = scalar_select %p6411_p9, 1, 0 }
  0x8e   : > { %s7997_s30 = scalar_select %p6415_p11, 1, 0 }
  0x8f   : > { %7996 = sst [smem:[#allocation113_spill]] %s7995_s8  ;;  %s6077_s11 = smov [#allocation49]  }
  0x90   : > { %s957_s28 = sshll.u32 %s6077_s11, 4  ;;  %p7998_p1 = scmp.eq.s32.totalorder %s6336_s10, 0  ;;  %s6427_s28 = int_to_ptr.vmem [resolvable:$true] %s957_s28 }
  0x91   : > { %s5014_s12 = scalar_lea.hbm %s7976_s27, 16 }
  0x92   : > { %p6423_p0 = pnand %p4795_p6, %p7998_p1  ;;  %p5015_p4 = scmp.ne.s32.totalorder %s7976_s27, %s5014_s12 }
  0x93   : > { %p5021_p9 = scmp.lt.u32.totalorder %s5014_s12, %s7976_s27 }
  0x94   : > { %p5016_p5 = pneg %p6423_p0 }
  0x96   : > { %p5017_p8 = pnand %p5016_p5, %p5015_p4 }
  0x98   : > { %p5018_p2 = pneg %p5017_p8 }
  0x9a   : > { %p5023_p10 = pnand %p5021_p9, %p5018_p2 }
  0x9c   : > { %5026 = shalt.err (!%p5023_p10)
}
  0x9d   : > { %s5027_s0 = scalar_lea.vmem %s947_s26, 16  ;;  %s5034_s11 = scalar_lea.vmem %s947_s26, 32 }
  0x9e   : > { %p5028_p6 = scmp.ne.s32.totalorder %s947_s26, %s5027_s0  ;;  %p5035_p7 = scmp.lt.s32.totalorder %s947_s26, %s947_s26 }
  0x9f   : > { %p5036_p11 = scmp.lt.s32.totalorder %s5034_s11, %s5027_s0 }
  0xa0   : > { %p5030_p1 = pnand %p5028_p6, %p5016_p5 }
  0xa1   : > { %p5037_p12 = por %p5036_p11, %p5035_p7 }
  0xa2   : > { %p5031_p13 = pneg %p5030_p1 }
  0xa4   : > { %p5038_p3 = pnand %p5037_p12, %p5031_p13 }
  0xa6   : > { %5041 = shalt.err (!%p5038_p3)
}
  0xa7   : > { %4798 = dma.hbm_to_vmem [thread:$0]  (!%p6423_p0), %s7976_s27, 16, %s947_s26, [#allocation47]  }
  0xa8   : > { %s5042_s12 = scalar_lea.hbm %s7977_s5, 16 }
  0xa9   : > { %p5043_p10 = scmp.ne.s32.totalorder %s7977_s5, %s5042_s12  ;;  %p5049_p8 = scmp.lt.u32.totalorder %s5042_s12, %s7977_s5 }
  0xab   : > { %p5045_p9 = pnand %p5043_p10, %p5016_p5 }
  0xad   : > { %p5046_p4 = pneg %p5045_p9 }
  0xaf   : > { %p5051_p2 = pnand %p5049_p8, %p5046_p4 }
  0xb1   : > { %5054 = shalt.err (!%p5051_p2)
}
  0xb2   : > { %s5055_s0 = scalar_lea.vmem %s6427_s28, 16  ;;  %s5062_s26 = scalar_lea.vmem %s6427_s28, 32 }
  0xb3   : > { %p5056_p3 = scmp.ne.s32.totalorder %s6427_s28, %s5055_s0  ;;  %p5063_p13 = scmp.lt.s32.totalorder %s6427_s28, %s6427_s28 }
  0xb4   : > { %p5064_p11 = scmp.lt.s32.totalorder %s5062_s26, %s5055_s0 }
  0xb5   : > { %p5058_p7 = pnand %p5056_p3, %p5016_p5 }
  0xb6   : > { %p5065_p6 = por %p5064_p11, %p5063_p13 }
  0xb7   : > { %p5059_p12 = pneg %p5058_p7 }
  0xb9   : > { %p5066_p1 = pnand %p5065_p6, %p5059_p12 }
  0xbb   : > { %5069 = shalt.err (!%p5066_p1)
}
  0xbc   : > { %4801 = dma.hbm_to_vmem [thread:$0]  (!%p6423_p0), %s7977_s5, 16, %s6427_s28, [#allocation50]  }
  0xbd   : > { %p4347_p10 = scmp.ge.s32.totalorder %s6044_s7, 4 }
  0xbe   : > { %s6463_s11 = sand.u32 (!%p4347_p10), 1, %s6024_s23   ;;  %s6466_s12 = sand.u32 (!%p4347_p10), 1, %s6044_s7  }
  0xbf   : > { %964 = sbr.rel (%p4347_p10) target bundleno = 913 (0x391), region = 24  ;;  %s7884_s4 = sshll.u32 (!%p4347_p10), %s6463_s11, 4 }
  0xc0   : > { %s7885_s28 = sshll.u32 (!%p4347_p10), %s6040_s2, 8  ;;  %s990_s26 = scalar_lea.vmem (!%p4347_p10), [#allocation7], %s7884_s4 }
  0xc1   : > { %s6473_s0 = scalar_lea.hbm (!%p4347_p10), %s7975_s9, %s7885_s28  ;;  %s997_s5 = sshll.u32 (!%p4347_p10), %s990_s26, 4  ;;  %s6477_s5 = int_to_ptr.vmem [resolvable:$true] %s997_s5 }
  0xc2   : > { %s5070_s23 = scalar_lea.hbm (!%p4347_p10), %s6473_s0, 256  ;;  %p8000_p5 = scmp.ne.s32.totalorder (!%p4347_p10), %s7984_s21, 0 }
  0xc3   : > { %p5071_p0 = scmp.ne.s32.totalorder (!%p4347_p10), %s6473_s0, %s5070_s23  ;;  %s5074_s8 = scalar_lea.hbm (!%p4347_p10), %s7975_s9, 512 }
  0xc4   : > { %p5075_p8 = scmp.lt.u32.totalorder (!%p4347_p10), %s6473_s0, %s7975_s9  ;;  %p5076_p2 = scmp.lt.u32.totalorder (!%p4347_p10), %s5074_s8, %s5070_s23 }
  0xc5   : > { %p5072_p9 = pnand (!%p4347_p10), %p5071_p0, %p8000_p5  ;;  %p5078_p7 = scmp.lt.u32.totalorder (!%p4347_p10), %s5070_s23, %s6473_s0 }
  0xc6   : > { %p5077_p3 = por %p5076_p2, %p5075_p8 }
  0xc7   : > { %p5073_p4 = pneg %p5072_p9 }
  0xc8   : > { %p5079_p12 = por %p5078_p7, %p5077_p3 }
  0xca   : > { %p5080_p13 = pnand %p5079_p12, %p5073_p4 }
  0xcc   : > { %5083 = shalt.err (!%p5080_p13)
}
  0xcd   : > { %s5084_s26 = scalar_lea.vmem %s6477_s5, 256  ;;  %s6078_s4 = smov [#allocation7]  }
  0xce   : > { %p5085_p11 = scmp.ne.s32.totalorder %s6477_s5, %s5084_s26  ;;  %s5088_s28 = sshll.u32 %s6078_s4, 4  ;;  %s5089_s28 = int_to_ptr.vmem [resolvable:$false] %s5088_s28 }
  0xcf   : > { %s5090_s27 = scalar_lea.vmem %s5089_s28, 512  ;;  %p5091_p10 = scmp.lt.s32.totalorder %s6477_s5, %s5089_s28 }
  0xd0   : > { %p5086_p6 = pnand %p5085_p11, %p8000_p5  ;;  %p5092_p0 = scmp.lt.s32.totalorder %s5090_s27, %s5084_s26 }
  0xd2   : > { %p5087_p1 = pneg %p5086_p6  ;;  %p5093_p9 = por %p5092_p0, %p5091_p10 }
  0xd4   : > { %p5094_p8 = pnand %p5093_p9, %p5087_p1 }
  0xd6   : > { %5097 = shalt.err (!%p5094_p8)
}
  0xd7   : > { %s7894_s23 = smov 128   ;;  %s7895_s27 = smov 8  }
  0xd8   : > { %s8001_s8 = scalar_lea.sflag [#allocation8], %s6466_s12  ;;  %s8002_s4 = sshll.u32 %s6040_s2, 8 }
  0xd9   : > { %4734 = dma.hbm_to_vmem [thread:$0]  (%p8000_p5), %s6473_s0, 256, %s6477_s5, %s8001_s8, %s7894_s23, %s7894_s23, %s7895_s27  }
  0xda   : > { %s6505_s28 = scalar_lea.hbm %s7971_s13, %s8002_s4  ;;  %s8003_s26 = sshll.u32 %s6463_s11, 4 }
  0xdb   : > { %s6509_s9 = scalar_lea.vmem [#allocation9], %s8003_s26  ;;  %s7896_s7 = sshll.u32 %s6463_s11, 3 }
  0xdc   : > { %s7897_s29 = sshll.u32 %s6040_s2, 7  ;;  %s1032_s5 = scalar_lea.vmem [#allocation10], %s7896_s7 }
  0xdd   : > { %s6517_s6 = scalar_lea.hbm %s7972_s17, %s7897_s29  ;;  %s1039_s0 = sshll.u32 %s1032_s5, 4  ;;  %s6521_s0 = int_to_ptr.vmem [resolvable:$true] %s1039_s0 }
  0xde   : > { %s6524_s8 = sand.u32 1, %s6012_s16   ;;  %s7898_s4 = scalar_lea.sflag [#allocation11], %s6466_s12 }
  0xdf   : > { %s5098_s26 = scalar_lea.hbm %s6517_s6, 128  ;;  %s5102_s23 = scalar_lea.hbm %s7972_s17, 256 }
  0xe0   : > { %p5099_p4 = scmp.ne.s32.totalorder %s6517_s6, %s5098_s26  ;;  %p5103_p7 = scmp.lt.u32.totalorder %s6517_s6, %s7972_s17 }
  0xe1   : > { %p5104_p12 = scmp.lt.u32.totalorder %s5102_s23, %s5098_s26  ;;  %p5106_p11 = scmp.lt.u32.totalorder %s5098_s26, %s6517_s6 }
  0xe2   : > { %p5100_p2 = pnand %p5099_p4, %p8000_p5 }
  0xe3   : > { %p5105_p13 = por %p5104_p12, %p5103_p7 }
  0xe4   : > { %p5101_p3 = pneg %p5100_p2 }
  0xe5   : > { %p5107_p6 = por %p5106_p11, %p5105_p13 }
  0xe7   : > { %p5108_p1 = pnand %p5107_p6, %p5101_p3 }
  0xe9   : > { %5111 = shalt.err (!%p5108_p1)
}
  0xea   : > { %s5112_s5 = scalar_lea.vmem %s6521_s0, 128  ;;  %s6081_s27 = smov [#allocation10]  }
  0xeb   : > { %p5113_p10 = scmp.ne.s32.totalorder %s6521_s0, %s5112_s5  ;;  %s5116_s18 = sshll.u32 %s6081_s27, 4  ;;  %s5117_s18 = int_to_ptr.vmem [resolvable:$false] %s5116_s18 }
  0xec   : > { %s5118_s7 = scalar_lea.vmem %s5117_s18, 256  ;;  %p5119_p8 = scmp.lt.s32.totalorder %s6521_s0, %s5117_s18 }
  0xed   : > { %p5114_p0 = pnand %p5113_p10, %p8000_p5  ;;  %p5120_p4 = scmp.lt.s32.totalorder %s5118_s7, %s5112_s5 }
  0xef   : > { %p5115_p9 = pneg %p5114_p0  ;;  %p5121_p2 = por %p5120_p4, %p5119_p8 }
  0xf1   : > { %p5122_p7 = pnand %p5121_p2, %p5115_p9 }
  0xf3   : > { %5125 = shalt.err (!%p5122_p7)
}
  0xf4   : > { %4736 = dma.hbm_to_vmem [thread:$0]  (%p8000_p5), %s6517_s6, 128, %s6521_s0, %s7898_s4  }
  0xf5   : > { %s6547_s23 = sshll.u32 %s6036_s1, 4  ;;  %s1070_s18 = scalar_lea.vmem [#allocation13], %s6524_s8 }
  0xf6   : > { %s1077_s7 = sshll.u32 %s1070_s18, 4  ;;  %s6552_s27 = scalar_lea.hbm %s7969_s25, %s6547_s23  ;;  %s1078_s7 = int_to_ptr.vmem [resolvable:$true] %s1077_s7 }
  0xf7   : > { %s7900_s26 = scalar_lea.sflag [#allocation14], %s6466_s12  ;;  %s5126_s5 = scalar_lea.hbm %s6552_s27, 16 }
  0xf8   : > { %p5127_p3 = scmp.ne.s32.totalorder %s6552_s27, %s5126_s5  ;;  %p8004_p12 = scmp.ne.s32.totalorder %s7989_s20, 0 }
  0xf9   : > { %s5130_s29 = scalar_lea.hbm %s7969_s25, 32  ;;  %p5131_p6 = scmp.lt.u32.totalorder %s6552_s27, %s7969_s25 }
  0xfa   : > { %p5128_p13 = pnand %p5127_p3, %p8004_p12  ;;  %p5132_p1 = scmp.lt.u32.totalorder %s5130_s29, %s5126_s5 }
  0xfb   : > { %p5134_p0 = scmp.lt.u32.totalorder %s5126_s5, %s6552_s27 }
  0xfc   : > { %p5129_p11 = pneg %p5128_p13  ;;  %p5133_p10 = por %p5132_p1, %p5131_p6 }
  0xfe   : > { %p5135_p9 = por %p5134_p0, %p5133_p10 }
 0x100   : > { %p5136_p8 = pnand %p5135_p9, %p5129_p11 }
 0x102   : > { %5139 = shalt.err (!%p5136_p8)
}
 0x103   : > { %s5140_s6 = scalar_lea.vmem %s1078_s7, 16  ;;  %s6082_s0 = smov [#allocation13]  }
 0x104   : > { %p5141_p4 = scmp.ne.s32.totalorder %s1078_s7, %s5140_s6  ;;  %s5144_s18 = sshll.u32 %s6082_s0, 4  ;;  %s5145_s18 = int_to_ptr.vmem [resolvable:$false] %s5144_s18 }
 0x105   : > { %s5146_s4 = scalar_lea.vmem %s5145_s18, 32  ;;  %p5147_p3 = scmp.lt.s32.totalorder %s1078_s7, %s5145_s18 }
 0x106   : > { %p5142_p2 = pnand %p5141_p4, %p8004_p12  ;;  %p5148_p13 = scmp.lt.s32.totalorder %s5146_s4, %s5140_s6 }
 0x108   : > { %p5143_p7 = pneg %p5142_p2  ;;  %p5149_p5 = por %p5148_p13, %p5147_p3 }
 0x10a   : > { %p5150_p1 = pnand %p5149_p5, %p5143_p7 }
 0x10c   : > { %5153 = shalt.err (!%p5150_p1)
}
 0x10d   : > { %4738 = dma.hbm_to_vmem [thread:$0]  (%p8004_p12), %s6552_s27, 16, %s1078_s7, %s7900_s26  }
 0x10e   : > { %s6572_s29 = scalar_lea.hbm %s7974_s3, %s6547_s23  ;;  %s1108_s4 = scalar_lea.vmem [#allocation16], %s6524_s8 }
 0x10f   : > { %s1115_s5 = sshll.u32 %s1108_s4, 4  ;;  %s7901_s6 = scalar_lea.sflag [#allocation17], %s6466_s12  ;;  %s1116_s5 = int_to_ptr.vmem [resolvable:$true] %s1115_s5 }
 0x110   : > { %s5154_s0 = scalar_lea.hbm %s6572_s29, 16  ;;  %s5158_s18 = scalar_lea.hbm %s7974_s3, 32 }
 0x111   : > { %p5155_p5 = scmp.ne.s32.totalorder %s6572_s29, %s5154_s0  ;;  %p5159_p10 = scmp.lt.u32.totalorder %s6572_s29, %s7974_s3 }
 0x112   : > { %p5160_p0 = scmp.lt.u32.totalorder %s5158_s18, %s5154_s0  ;;  %p5162_p8 = scmp.lt.u32.totalorder %s5154_s0, %s6572_s29 }
 0x113   : > { %p5156_p11 = pnand %p5155_p5, %p8004_p12 }
 0x114   : > { %p5161_p9 = por %p5160_p0, %p5159_p10 }
 0x115   : > { %p5157_p6 = pneg %p5156_p11 }
 0x116   : > { %p5163_p4 = por %p5162_p8, %p5161_p9 }
 0x118   : > { %p5164_p2 = pnand %p5163_p4, %p5157_p6 }
 0x11a   : > { %5167 = shalt.err (!%p5164_p2)
}
 0x11b   : > { %s5168_s7 = scalar_lea.vmem %s1116_s5, 16  ;;  %s6083_s27 = smov [#allocation16]  }
 0x11c   : > { %p5169_p7 = scmp.ne.s32.totalorder %s1116_s5, %s5168_s7  ;;  %s5172_s4 = sshll.u32 %s6083_s27, 4  ;;  %s5173_s4 = int_to_ptr.vmem [resolvable:$false] %s5172_s4 }
 0x11d   : > { %s5174_s26 = scalar_lea.vmem %s5173_s4, 32  ;;  %p5175_p1 = scmp.lt.s32.totalorder %s1116_s5, %s5173_s4 }
 0x11e   : > { %p5170_p3 = pnand %p5169_p7, %p8004_p12  ;;  %p5176_p5 = scmp.lt.s32.totalorder %s5174_s26, %s5168_s7 }
 0x120   : > { %p5171_p13 = pneg %p5170_p3  ;;  %p5177_p11 = por %p5176_p5, %p5175_p1 }
 0x122   : > { %p5178_p0 = pnand %p5177_p11, %p5171_p13 }
 0x124   : > { %5181 = shalt.err (!%p5178_p0)
}
 0x125   : > { %4740 = dma.hbm_to_vmem [thread:$0]  (%p8004_p12), %s6572_s29, 16, %s1116_s5, %s7901_s6  }
 0x126   : > { %s6593_s0 = scalar_lea.hbm %s7973_s14, %s6547_s23  ;;  %s1146_s26 = scalar_lea.vmem [#allocation19], %s6524_s8 }
 0x127   : > { %s1153_s18 = sshll.u32 %s1146_s26, 4  ;;  %s7902_s7 = scalar_lea.sflag [#allocation20], %s6466_s12  ;;  %s1154_s18 = int_to_ptr.vmem [resolvable:$true] %s1153_s18 }
 0x128   : > { %s5182_s27 = scalar_lea.hbm %s6593_s0, 16  ;;  %s5186_s4 = scalar_lea.hbm %s7973_s14, 32 }
 0x129   : > { %p5183_p6 = scmp.ne.s32.totalorder %s6593_s0, %s5182_s27  ;;  %p5187_p8 = scmp.lt.u32.totalorder %s6593_s0, %s7973_s14 }
 0x12a   : > { %p5188_p4 = scmp.lt.u32.totalorder %s5186_s4, %s5182_s27  ;;  %p5190_p7 = scmp.lt.u32.totalorder %s5182_s27, %s6593_s0 }
 0x12b   : > { %p5184_p10 = pnand %p5183_p6, %p8004_p12 }
 0x12c   : > { %p5189_p2 = por %p5188_p4, %p5187_p8 }
 0x12d   : > { %p5185_p9 = pneg %p5184_p10 }
 0x12e   : > { %p5191_p3 = por %p5190_p7, %p5189_p2 }
 0x130   : > { %p5192_p13 = pnand %p5191_p3, %p5185_p9 }
 0x132   : > { %5195 = shalt.err (!%p5192_p13)
}
 0x133   : > { %s5196_s29 = scalar_lea.vmem %s1154_s18, 16  ;;  %s6084_s5 = smov [#allocation19]  }
 0x134   : > { %p5197_p1 = scmp.ne.s32.totalorder %s1154_s18, %s5196_s29  ;;  %s5200_s26 = sshll.u32 %s6084_s5, 4  ;;  %s5201_s26 = int_to_ptr.vmem [resolvable:$false] %s5200_s26 }
 0x135   : > { %s5202_s6 = scalar_lea.vmem %s5201_s26, 32  ;;  %p5203_p0 = scmp.lt.s32.totalorder %s1154_s18, %s5201_s26 }
 0x136   : > { %p5198_p5 = pnand %p5197_p1, %p8004_p12  ;;  %p5204_p6 = scmp.lt.s32.totalorder %s5202_s6, %s5196_s29 }
 0x138   : > { %p5199_p11 = pneg %p5198_p5  ;;  %p5205_p10 = por %p5204_p6, %p5203_p0 }
 0x13a   : > { %p5206_p4 = pnand %p5205_p10, %p5199_p11 }
 0x13c   : > { %5209 = shalt.err (!%p5206_p4)
}
 0x13d   : > { %4742 = dma.hbm_to_vmem [thread:$0]  (%p8004_p12), %s6593_s0, 16, %s1154_s18, %s7902_s7  }
 0x13e   : > { %s6614_s27 = scalar_lea.hbm %s7970_s24, %s6547_s23  ;;  %s1184_s6 = scalar_lea.vmem [#allocation22], %s6524_s8 }
 0x13f   : > { %s1191_s4 = sshll.u32 %s1184_s6, 4  ;;  %s7904_s29 = scalar_lea.sflag [#allocation23], %s6466_s12  ;;  %s1192_s4 = int_to_ptr.vmem [resolvable:$true] %s1191_s4 }
 0x140   : > { %s5210_s5 = scalar_lea.hbm %s6614_s27, 16  ;;  %s5214_s26 = scalar_lea.hbm %s7970_s24, 32 }
 0x141   : > { %p5211_p9 = scmp.ne.s32.totalorder %s6614_s27, %s5210_s5  ;;  %p5215_p7 = scmp.lt.u32.totalorder %s6614_s27, %s7970_s24 }
 0x142   : > { %p5216_p3 = scmp.lt.u32.totalorder %s5214_s26, %s5210_s5  ;;  %p5218_p1 = scmp.lt.u32.totalorder %s5210_s5, %s6614_s27 }
 0x143   : > { %p5212_p8 = pnand %p5211_p9, %p8004_p12 }
 0x144   : > { %p5217_p13 = por %p5216_p3, %p5215_p7 }
 0x145   : > { %p5213_p2 = pneg %p5212_p8 }
 0x146   : > { %p5219_p5 = por %p5218_p1, %p5217_p13 }
 0x148   : > { %p5220_p11 = pnand %p5219_p5, %p5213_p2 }
 0x14a   : > { %5223 = shalt.err (!%p5220_p11)
}
 0x14b   : > { %s5224_s0 = scalar_lea.vmem %s1192_s4, 16  ;;  %s6085_s18 = smov [#allocation22]  }
 0x14c   : > { %p5225_p0 = scmp.ne.s32.totalorder %s1192_s4, %s5224_s0  ;;  %s5228_s6 = sshll.u32 %s6085_s18, 4  ;;  %s5229_s6 = int_to_ptr.vmem [resolvable:$false] %s5228_s6 }
 0x14d   : > { %s5230_s7 = scalar_lea.vmem %s5229_s6, 32  ;;  %p5231_p4 = scmp.lt.s32.totalorder %s1192_s4, %s5229_s6 }
 0x14e   : > { %p5226_p6 = pnand %p5225_p0, %p8004_p12  ;;  %p5232_p9 = scmp.lt.s32.totalorder %s5230_s7, %s5224_s0 }
 0x150   : > { %p5227_p10 = pneg %p5226_p6  ;;  %p5233_p8 = por %p5232_p9, %p5231_p4 }
 0x152   : > { %p5234_p3 = pnand %p5233_p8, %p5227_p10 }
 0x154   : > { %5237 = shalt.err (!%p5234_p3)
}
 0x155   : > { %s8005_s5 = sld [smem:[#allocation84_spill]]  ;;  %s1222_s7 = scalar_lea.vmem [#allocation25], %s6524_s8 }
 0x156   : > { %4744 = dma.hbm_to_vmem [thread:$0]  (%p8004_p12), %s6614_s27, 16, %s1192_s4, %s7904_s29  }
 0x157   : > { %s1229_s0 = sshll.u32 %s1222_s7, 4  ;;  %s7906_s18 = scalar_lea.sflag [#allocation26], %s6466_s12  ;;  %s1230_s0 = int_to_ptr.vmem [resolvable:$true] %s1229_s0 }
 0x15b   : > { %s6635_s26 = scalar_lea.hbm %s8005_s5, %s6547_s23  ;;  %s5242_s3 = scalar_lea.hbm %s8005_s5, 32 }
 0x15c   : > { %s5238_s6 = scalar_lea.hbm %s6635_s26, 16  ;;  %p5243_p1 = scmp.lt.u32.totalorder %s6635_s26, %s8005_s5 }
 0x15d   : > { %p5239_p2 = scmp.ne.s32.totalorder %s6635_s26, %s5238_s6  ;;  %p5244_p5 = scmp.lt.u32.totalorder %s5242_s3, %s5238_s6 }
 0x15e   : > { %p5246_p0 = scmp.lt.u32.totalorder %s5238_s6, %s6635_s26 }
 0x15f   : > { %p5240_p7 = pnand %p5239_p2, %p8004_p12  ;;  %p5245_p11 = por %p5244_p5, %p5243_p1 }
 0x161   : > { %p5241_p13 = pneg %p5240_p7  ;;  %p5247_p6 = por %p5246_p0, %p5245_p11 }
 0x163   : > { %p5248_p10 = pnand %p5247_p6, %p5241_p13 }
 0x165   : > { %5251 = shalt.err (!%p5248_p10)
}
 0x166   : > { %s5252_s27 = scalar_lea.vmem %s1230_s0, 16  ;;  %s6086_s4 = smov [#allocation25]  }
 0x167   : > { %p5253_p4 = scmp.ne.s32.totalorder %s1230_s0, %s5252_s27  ;;  %s5256_s7 = sshll.u32 %s6086_s4, 4  ;;  %s5257_s7 = int_to_ptr.vmem [resolvable:$false] %s5256_s7 }
 0x168   : > { %s5258_s29 = scalar_lea.vmem %s5257_s7, 32  ;;  %p5259_p3 = scmp.lt.s32.totalorder %s1230_s0, %s5257_s7 }
 0x169   : > { %p5254_p9 = pnand %p5253_p4, %p8004_p12  ;;  %p5260_p2 = scmp.lt.s32.totalorder %s5258_s29, %s5252_s27 }
 0x16b   : > { %p5255_p8 = pneg %p5254_p9  ;;  %p5261_p7 = por %p5260_p2, %p5259_p3 }
 0x16d   : > { %p5262_p1 = pnand %p5261_p7, %p5255_p8 }
 0x16f   : > { %5265 = shalt.err (!%p5262_p1)
}
 0x170   : > { %s8006_s3 = sld [smem:[#allocation86_spill]]  ;;  %s1260_s29 = scalar_lea.vmem [#allocation28], %s6524_s8 }
 0x171   : > { %4746 = dma.hbm_to_vmem [thread:$0]  (%p8004_p12), %s6635_s26, 16, %s1230_s0, %s7906_s18  }
 0x172   : > { %s1267_s27 = sshll.u32 %s1260_s29, 4  ;;  %s7908_s4 = scalar_lea.sflag [#allocation29], %s6466_s12  ;;  %s1268_s27 = int_to_ptr.vmem [resolvable:$true] %s1267_s27 }
 0x176   : > { %s6656_s6 = scalar_lea.hbm %s8006_s3, %s6547_s23  ;;  %s5270_s5 = scalar_lea.hbm %s8006_s3, 32 }
 0x177   : > { %s5266_s7 = scalar_lea.hbm %s6656_s6, 16  ;;  %p5271_p0 = scmp.lt.u32.totalorder %s6656_s6, %s8006_s3 }
 0x178   : > { %p5267_p13 = scmp.ne.s32.totalorder %s6656_s6, %s5266_s7  ;;  %p5272_p6 = scmp.lt.u32.totalorder %s5270_s5, %s5266_s7 }
 0x179   : > { %p5274_p4 = scmp.lt.u32.totalorder %s5266_s7, %s6656_s6 }
 0x17a   : > { %p5268_p5 = pnand %p5267_p13, %p8004_p12  ;;  %p5273_p10 = por %p5272_p6, %p5271_p0 }
 0x17c   : > { %p5269_p11 = pneg %p5268_p5  ;;  %p5275_p9 = por %p5274_p4, %p5273_p10 }
 0x17e   : > { %p5276_p8 = pnand %p5275_p9, %p5269_p11 }
 0x180   : > { %5279 = shalt.err (!%p5276_p8)
}
 0x181   : > { %s5280_s26 = scalar_lea.vmem %s1268_s27, 16  ;;  %s6087_s0 = smov [#allocation28]  }
 0x182   : > { %p5281_p3 = scmp.ne.s32.totalorder %s1268_s27, %s5280_s26  ;;  %s5284_s29 = sshll.u32 %s6087_s0, 4  ;;  %s5285_s29 = int_to_ptr.vmem [resolvable:$false] %s5284_s29 }
 0x183   : > { %s5286_s18 = scalar_lea.vmem %s5285_s29, 32  ;;  %p5287_p1 = scmp.lt.s32.totalorder %s1268_s27, %s5285_s29 }
 0x184   : > { %p5282_p2 = pnand %p5281_p3, %p8004_p12  ;;  %p5288_p13 = scmp.lt.s32.totalorder %s5286_s18, %s5280_s26 }
 0x186   : > { %p5283_p7 = pneg %p5282_p2  ;;  %p5289_p5 = por %p5288_p13, %p5287_p1 }
 0x188   : > { %p5290_p0 = pnand %p5289_p5, %p5283_p7 }
 0x18a   : > { %5293 = shalt.err (!%p5290_p0)
}
 0x18b   : > { %s8007_s5 = sld [smem:[#allocation88_spill]]  ;;  %s1298_s18 = scalar_lea.vmem [#allocation31], %s6524_s8 }
 0x18c   : > { %4748 = dma.hbm_to_vmem [thread:$0]  (%p8004_p12), %s6656_s6, 16, %s1268_s27, %s7908_s4  }
 0x18d   : > { %s1305_s26 = sshll.u32 %s1298_s18, 4  ;;  %s7910_s0 = scalar_lea.sflag [#allocation32], %s6466_s12  ;;  %s1306_s26 = int_to_ptr.vmem [resolvable:$true] %s1305_s26 }
 0x191   : > { %s6677_s7 = scalar_lea.hbm %s8007_s5, %s6547_s23  ;;  %s5298_s3 = scalar_lea.hbm %s8007_s5, 32 }
 0x192   : > { %s5294_s29 = scalar_lea.hbm %s6677_s7, 16  ;;  %p5299_p4 = scmp.lt.u32.totalorder %s6677_s7, %s8007_s5 }
 0x193   : > { %p5295_p11 = scmp.ne.s32.totalorder %s6677_s7, %s5294_s29  ;;  %p5300_p9 = scmp.lt.u32.totalorder %s5298_s3, %s5294_s29 }
 0x194   : > { %p5302_p3 = scmp.lt.u32.totalorder %s5294_s29, %s6677_s7 }
 0x195   : > { %p5296_p6 = pnand %p5295_p11, %p8004_p12  ;;  %p5301_p8 = por %p5300_p9, %p5299_p4 }
 0x197   : > { %p5297_p10 = pneg %p5296_p6  ;;  %p5303_p2 = por %p5302_p3, %p5301_p8 }
 0x199   : > { %p5304_p7 = pnand %p5303_p2, %p5297_p10 }
 0x19b   : > { %5307 = shalt.err (!%p5304_p7)
}
 0x19c   : > { %s5308_s6 = scalar_lea.vmem %s1306_s26, 16  ;;  %s6088_s27 = smov [#allocation31]  }
 0x19d   : > { %p5309_p1 = scmp.ne.s32.totalorder %s1306_s26, %s5308_s6  ;;  %s5312_s18 = sshll.u32 %s6088_s27, 4  ;;  %s5313_s18 = int_to_ptr.vmem [resolvable:$false] %s5312_s18 }
 0x19e   : > { %s5314_s4 = scalar_lea.vmem %s5313_s18, 32  ;;  %p5315_p0 = scmp.lt.s32.totalorder %s1306_s26, %s5313_s18 }
 0x19f   : > { %p5310_p13 = pnand %p5309_p1, %p8004_p12  ;;  %p5316_p11 = scmp.lt.s32.totalorder %s5314_s4, %s5308_s6 }
 0x1a1   : > { %p5311_p5 = pneg %p5310_p13  ;;  %p5317_p6 = por %p5316_p11, %p5315_p0 }
 0x1a3   : > { %p5318_p4 = pnand %p5317_p6, %p5311_p5 }
 0x1a5   : > { %5321 = shalt.err (!%p5318_p4)
}
 0x1a6   : > { %s8008_s3 = sld [smem:[#allocation90_spill]]  ;;  %s1336_s4 = scalar_lea.vmem [#allocation34], %s6524_s8 }
 0x1a7   : > { %4750 = dma.hbm_to_vmem [thread:$0]  (%p8004_p12), %s6677_s7, 16, %s1306_s26, %s7910_s0  }
 0x1a8   : > { %s1343_s6 = sshll.u32 %s1336_s4, 4  ;;  %s7912_s27 = scalar_lea.sflag [#allocation35], %s6466_s12  ;;  %s1344_s6 = int_to_ptr.vmem [resolvable:$true] %s1343_s6 }
 0x1ac   : > { %s6698_s29 = scalar_lea.hbm %s8008_s3, %s6547_s23  ;;  %s5326_s5 = scalar_lea.hbm %s8008_s3, 32 }
 0x1ad   : > { %s5322_s18 = scalar_lea.hbm %s6698_s29, 16  ;;  %p5327_p3 = scmp.lt.u32.totalorder %s6698_s29, %s8008_s3 }
 0x1ae   : > { %p5323_p10 = scmp.ne.s32.totalorder %s6698_s29, %s5322_s18  ;;  %p5328_p2 = scmp.lt.u32.totalorder %s5326_s5, %s5322_s18 }
 0x1af   : > { %p5330_p1 = scmp.lt.u32.totalorder %s5322_s18, %s6698_s29 }
 0x1b0   : > { %p5324_p9 = pnand %p5323_p10, %p8004_p12  ;;  %p5329_p7 = por %p5328_p2, %p5327_p3 }
 0x1b2   : > { %p5325_p8 = pneg %p5324_p9  ;;  %p5331_p13 = por %p5330_p1, %p5329_p7 }
 0x1b4   : > { %p5332_p5 = pnand %p5331_p13, %p5325_p8 }
 0x1b6   : > { %5335 = shalt.err (!%p5332_p5)
}
 0x1b7   : > { %s5336_s7 = scalar_lea.vmem %s1344_s6, 16  ;;  %s6089_s26 = smov [#allocation34]  }
 0x1b8   : > { %p5337_p0 = scmp.ne.s32.totalorder %s1344_s6, %s5336_s7  ;;  %s5340_s4 = sshll.u32 %s6089_s26, 4  ;;  %s5341_s4 = int_to_ptr.vmem [resolvable:$false] %s5340_s4 }
 0x1b9   : > { %s5342_s0 = scalar_lea.vmem %s5341_s4, 32  ;;  %p5343_p4 = scmp.lt.s32.totalorder %s1344_s6, %s5341_s4 }
 0x1ba   : > { %p5338_p11 = pnand %p5337_p0, %p8004_p12  ;;  %p5344_p10 = scmp.lt.s32.totalorder %s5342_s0, %s5336_s7 }
 0x1bc   : > { %p5339_p6 = pneg %p5338_p11  ;;  %p5345_p9 = por %p5344_p10, %p5343_p4 }
 0x1be   : > { %p5346_p2 = pnand %p5345_p9, %p5339_p6 }
 0x1c0   : > { %5349 = shalt.err (!%p5346_p2)
}
 0x1c1   : > { %s8009_s5 = sld [smem:[#allocation92_spill]]  ;;  %s1374_s0 = scalar_lea.vmem [#allocation37], %s6524_s8 }
 0x1c2   : > { %4752 = dma.hbm_to_vmem [thread:$0]  (%p8004_p12), %s6698_s29, 16, %s1344_s6, %s7912_s27  }
 0x1c3   : > { %s1381_s7 = sshll.u32 %s1374_s0, 4  ;;  %s7914_s26 = scalar_lea.sflag [#allocation38], %s6466_s12  ;;  %s1382_s7 = int_to_ptr.vmem [resolvable:$true] %s1381_s7 }
 0x1c7   : > { %s6719_s18 = scalar_lea.hbm %s8009_s5, %s6547_s23  ;;  %s5354_s3 = scalar_lea.hbm %s8009_s5, 32 }
 0x1c8   : > { %s5350_s4 = scalar_lea.hbm %s6719_s18, 16  ;;  %p5355_p1 = scmp.lt.u32.totalorder %s6719_s18, %s8009_s5 }
 0x1c9   : > { %p5351_p8 = scmp.ne.s32.totalorder %s6719_s18, %s5350_s4  ;;  %p5356_p13 = scmp.lt.u32.totalorder %s5354_s3, %s5350_s4 }
 0x1ca   : > { %p5358_p0 = scmp.lt.u32.totalorder %s5350_s4, %s6719_s18 }
 0x1cb   : > { %p5352_p3 = pnand %p5351_p8, %p8004_p12  ;;  %p5357_p5 = por %p5356_p13, %p5355_p1 }
 0x1cd   : > { %p5353_p7 = pneg %p5352_p3  ;;  %p5359_p11 = por %p5358_p0, %p5357_p5 }
 0x1cf   : > { %p5360_p6 = pnand %p5359_p11, %p5353_p7 }
 0x1d1   : > { %5363 = shalt.err (!%p5360_p6)
}
 0x1d2   : > { %s5364_s29 = scalar_lea.vmem %s1382_s7, 16  ;;  %s6090_s6 = smov [#allocation37]  }
 0x1d3   : > { %p5365_p4 = scmp.ne.s32.totalorder %s1382_s7, %s5364_s29  ;;  %s5368_s0 = sshll.u32 %s6090_s6, 4  ;;  %s5369_s0 = int_to_ptr.vmem [resolvable:$false] %s5368_s0 }
 0x1d4   : > { %s5370_s27 = scalar_lea.vmem %s5369_s0, 32  ;;  %p5371_p2 = scmp.lt.s32.totalorder %s1382_s7, %s5369_s0 }
 0x1d5   : > { %p5366_p10 = pnand %p5365_p4, %p8004_p12  ;;  %p5372_p8 = scmp.lt.s32.totalorder %s5370_s27, %s5364_s29 }
 0x1d7   : > { %p5367_p9 = pneg %p5366_p10  ;;  %p5373_p3 = por %p5372_p8, %p5371_p2 }
 0x1d9   : > { %p5374_p1 = pnand %p5373_p3, %p5367_p9 }
 0x1db   : > { %5377 = shalt.err (!%p5374_p1)
}
 0x1dc   : > { %s8010_s3 = sld [smem:[#allocation94_spill]]  ;;  %s1408_s27 = scalar_lea.vmem [#allocation40], %s6524_s8 }
 0x1dd   : > { %4754 = dma.hbm_to_vmem [thread:$0]  (%p8004_p12), %s6719_s18, 16, %s1382_s7, %s7914_s26  }
 0x1de   : > { %s1415_s29 = sshll.u32 %s1408_s27, 4  ;;  %s7916_s6 = scalar_lea.sflag [#allocation41], %s6466_s12  ;;  %s1416_s29 = int_to_ptr.vmem [resolvable:$true] %s1415_s29 }
 0x1e2   : > { %s6740_s4 = scalar_lea.hbm %s8010_s3, %s6547_s23  ;;  %s5382_s5 = scalar_lea.hbm %s8010_s3, 32 }
 0x1e3   : > { %s5378_s0 = scalar_lea.hbm %s6740_s4, 16  ;;  %p5383_p0 = scmp.lt.u32.totalorder %s6740_s4, %s8010_s3 }
 0x1e4   : > { %p5379_p7 = scmp.ne.s32.totalorder %s6740_s4, %s5378_s0  ;;  %p5384_p11 = scmp.lt.u32.totalorder %s5382_s5, %s5378_s0 }
 0x1e5   : > { %p5386_p4 = scmp.lt.u32.totalorder %s5378_s0, %s6740_s4 }
 0x1e6   : > { %p5380_p13 = pnand %p5379_p7, %p8004_p12  ;;  %p5385_p6 = por %p5384_p11, %p5383_p0 }
 0x1e8   : > { %p5381_p5 = pneg %p5380_p13  ;;  %p5387_p10 = por %p5386_p4, %p5385_p6 }
 0x1ea   : > { %p5388_p9 = pnand %p5387_p10, %p5381_p5 }
 0x1ec   : > { %5391 = shalt.err (!%p5388_p9)
}
 0x1ed   : > { %s5392_s18 = scalar_lea.vmem %s1416_s29, 16  ;;  %s6091_s7 = smov [#allocation40]  }
 0x1ee   : > { %p5393_p2 = scmp.ne.s32.totalorder %s1416_s29, %s5392_s18  ;;  %s5396_s27 = sshll.u32 %s6091_s7, 4  ;;  %s5397_s27 = int_to_ptr.vmem [resolvable:$false] %s5396_s27 }
 0x1ef   : > { %s5398_s26 = scalar_lea.vmem %s5397_s27, 32  ;;  %p5399_p1 = scmp.lt.s32.totalorder %s1416_s29, %s5397_s27 }
 0x1f0   : > { %p5394_p8 = pnand %p5393_p2, %p8004_p12  ;;  %p5400_p7 = scmp.lt.s32.totalorder %s5398_s26, %s5392_s18 }
 0x1f2   : > { %p5395_p3 = pneg %p5394_p8  ;;  %p5401_p13 = por %p5400_p7, %p5399_p1 }
 0x1f4   : > { %p5402_p0 = pnand %p5401_p13, %p5395_p3 }
 0x1f6   : > { %5405 = shalt.err (!%p5402_p0)
}
 0x1f7   : > { %s8011_s5 = sld [smem:[#allocation96_spill]]  ;;  %s1442_s26 = scalar_lea.vmem [#allocation43], %s6524_s8 }
 0x1f8   : > { %4756 = dma.hbm_to_vmem [thread:$0]  (%p8004_p12), %s6740_s4, 16, %s1416_s29, %s7916_s6  }
 0x1f9   : > { %s1449_s18 = sshll.u32 %s1442_s26, 4  ;;  %s7920_s7 = scalar_lea.sflag [#allocation44], %s6466_s12  ;;  %s1450_s18 = int_to_ptr.vmem [resolvable:$true] %s1449_s18 }
 0x1fd   : > { %s6761_s0 = scalar_lea.hbm %s8011_s5, %s6547_s23  ;;  %s5410_s3 = scalar_lea.hbm %s8011_s5, 32 }
 0x1fe   : > { %s5406_s27 = scalar_lea.hbm %s6761_s0, 16  ;;  %p5411_p4 = scmp.lt.u32.totalorder %s6761_s0, %s8011_s5 }
 0x1ff   : > { %p5407_p5 = scmp.ne.s32.totalorder %s6761_s0, %s5406_s27  ;;  %p5412_p10 = scmp.lt.u32.totalorder %s5410_s3, %s5406_s27 }
 0x200   : > { %p5414_p2 = scmp.lt.u32.totalorder %s5406_s27, %s6761_s0 }
 0x201   : > { %p5408_p11 = pnand %p5407_p5, %p8004_p12  ;;  %p5413_p9 = por %p5412_p10, %p5411_p4 }
 0x203   : > { %p5409_p6 = pneg %p5408_p11  ;;  %p5415_p8 = por %p5414_p2, %p5413_p9 }
 0x205   : > { %p5416_p3 = pnand %p5415_p8, %p5409_p6 }
 0x207   : > { %5419 = shalt.err (!%p5416_p3)
}
 0x208   : > { %s5420_s4 = scalar_lea.vmem %s1450_s18, 16  ;;  %s6092_s29 = smov [#allocation43]  }
 0x209   : > { %p5421_p1 = scmp.ne.s32.totalorder %s1450_s18, %s5420_s4  ;;  %s5424_s26 = sshll.u32 %s6092_s29, 4  ;;  %s5425_s26 = int_to_ptr.vmem [resolvable:$false] %s5424_s26 }
 0x20a   : > { %s5426_s6 = scalar_lea.vmem %s5425_s26, 32  ;;  %p5427_p0 = scmp.lt.s32.totalorder %s1450_s18, %s5425_s26 }
 0x20b   : > { %p5422_p7 = pnand %p5421_p1, %p8004_p12  ;;  %p5428_p5 = scmp.lt.s32.totalorder %s5426_s6, %s5420_s4 }
 0x20d   : > { %p5423_p13 = pneg %p5422_p7  ;;  %p5429_p11 = por %p5428_p5, %p5427_p0 }
 0x20f   : > { %p5430_p4 = pnand %p5429_p11, %p5423_p13 }
 0x211   : > { %5433 = shalt.err (!%p5430_p4)
}
 0x212   : > { %s8012_s3 = sld [smem:[#allocation71_spill]]  ;;  %s8013_s27 = sshll.u32 %s6040_s2, 7 }
 0x213   : > { %4758 = dma.hbm_to_vmem [thread:$0]  (%p8004_p12), %s6761_s0, 16, %s1450_s18, %s7920_s7  }
 0x214   : > { %s8014_s6 = sshll.u32 %s6463_s11, 3  ;;  %s8015_s5 = sshll.u32 %s6509_s9, 4  ;;  %s6791_s5 = int_to_ptr.vmem [resolvable:$true] %s8015_s5 }
 0x215   : > { %s972_s4 = scalar_lea.vmem [#allocation4], %s8014_s6  ;;  %s969_s14 = scalar_lea.sflag [#allocation5], %s6463_s11 }
 0x216   : > { %s979_s26 = sshll.u32 %s972_s4, 4  ;;  %p8016_p10 = scmp.ne.s32.totalorder %s7984_s21, 0  ;;  %s6787_s26 = int_to_ptr.vmem [resolvable:$true] %s979_s26 }
 0x218   : > { %s6783_s29 = scalar_lea.hbm %s8012_s3, %s8013_s27  ;;  %s5438_s0 = scalar_lea.hbm %s8012_s3, 256 }
 0x219   : > { %s5434_s17 = scalar_lea.hbm %s6783_s29, 128  ;;  %p5439_p8 = scmp.lt.u32.totalorder %s6783_s29, %s8012_s3 }
 0x21a   : > { %p5435_p6 = scmp.ne.s32.totalorder %s6783_s29, %s5434_s17  ;;  %p5440_p3 = scmp.lt.u32.totalorder %s5438_s0, %s5434_s17 }
 0x21b   : > { %p5442_p7 = scmp.lt.u32.totalorder %s5434_s17, %s6783_s29 }
 0x21c   : > { %p5436_p9 = pnand %p5435_p6, %p8016_p10  ;;  %p5441_p1 = por %p5440_p3, %p5439_p8 }
 0x21e   : > { %p5437_p2 = pneg %p5436_p9  ;;  %p5443_p13 = por %p5442_p7, %p5441_p1 }
 0x220   : > { %p5444_p0 = pnand %p5443_p13, %p5437_p2 }
 0x222   : > { %5447 = shalt.err (!%p5444_p0)
}
 0x223   : > { %s5448_s9 = scalar_lea.vmem %s6787_s26, 128  ;;  %s6093_s11 = smov [#allocation4]  }
 0x224   : > { %p5449_p5 = scmp.ne.s32.totalorder %s6787_s26, %s5448_s9  ;;  %s5452_s18 = sshll.u32 %s6093_s11, 4  ;;  %s5453_s18 = int_to_ptr.vmem [resolvable:$false] %s5452_s18 }
 0x225   : > { %s5454_s27 = scalar_lea.vmem %s5453_s18, 256  ;;  %p5455_p6 = scmp.lt.s32.totalorder %s6787_s26, %s5453_s18 }
 0x226   : > { %p5450_p11 = pnand %p5449_p5, %p8016_p10  ;;  %p5456_p9 = scmp.lt.s32.totalorder %s5454_s27, %s5448_s9 }
 0x228   : > { %p5451_p4 = pneg %p5450_p11  ;;  %p5457_p8 = por %p5456_p9, %p5455_p6 }
 0x22a   : > { %p5458_p3 = pnand %p5457_p8, %p5451_p4 }
 0x22c   : > { %5461 = shalt.err (!%p5458_p3)
}
 0x22d   : > { %4733 = dma.hbm_to_vmem [thread:$0]  (%p8016_p10), %s6783_s29, 128, %s6787_s26, %s969_s14  }
 0x22e   : > { %s5462_s17 = scalar_lea.hbm %s6505_s28, 256  ;;  %s5466_s6 = scalar_lea.hbm %s7971_s13, 512 }
 0x22f   : > { %p5463_p2 = scmp.ne.s32.totalorder %s6505_s28, %s5462_s17  ;;  %p5467_p13 = scmp.lt.u32.totalorder %s6505_s28, %s7971_s13 }
 0x230   : > { %p5468_p0 = scmp.lt.u32.totalorder %s5466_s6, %s5462_s17  ;;  %p5470_p11 = scmp.lt.u32.totalorder %s5462_s17, %s6505_s28 }
 0x231   : > { %p5464_p1 = pnand %p5463_p2, %p8016_p10 }
 0x232   : > { %p5469_p5 = por %p5468_p0, %p5467_p13 }
 0x233   : > { %p5465_p7 = pneg %p5464_p1 }
 0x234   : > { %p5471_p4 = por %p5470_p11, %p5469_p5 }
 0x236   : > { %p5472_p6 = pnand %p5471_p4, %p5465_p7 }
 0x238   : > { %5475 = shalt.err (!%p5472_p6)
}
 0x239   : > { %s5476_s4 = scalar_lea.vmem %s6791_s5, 256  ;;  %s6094_s14 = smov [#allocation9]  }
 0x23a   : > { %p5477_p9 = scmp.ne.s32.totalorder %s6791_s5, %s5476_s4  ;;  %s5480_s29 = sshll.u32 %s6094_s14, 4  ;;  %s5481_s29 = int_to_ptr.vmem [resolvable:$false] %s5480_s29 }
 0x23b   : > { %s5482_s26 = scalar_lea.vmem %s5481_s29, 512  ;;  %p5483_p2 = scmp.lt.s32.totalorder %s6791_s5, %s5481_s29 }
 0x23c   : > { %p5478_p8 = pnand %p5477_p9, %p8016_p10  ;;  %p5484_p1 = scmp.lt.s32.totalorder %s5482_s26, %s5476_s4 }
 0x23e   : > { %p5479_p3 = pneg %p5478_p8  ;;  %p5485_p13 = por %p5484_p1, %p5483_p2 }
 0x240   : > { %p5486_p0 = pnand %p5485_p13, %p5479_p3 }
 0x242   : > { %5489 = shalt.err (!%p5486_p0)
}
 0x243   : > { %s8017_s0 = smov 8   ;;  %s8018_s9 = smov 128  }
 0x244   : > { %s8019_s11 = scalar_lea.sflag [#allocation8], %s6466_s12  ;;  %s8020_s18 = sld [smem:[#allocation75_spill]] }
 0x245   : > { %4735 = dma.hbm_to_vmem [thread:$0]  (%p8016_p10), %s6505_s28, 256, %s6791_s5, %s8019_s11, %s8018_s9, %s8018_s9, %s8017_s0  }
 0x246   : > { %s6834_s17 = sshll.u32 %s6524_s8, 4  ;;  %s6837_s6 = sshll.u32 %s6036_s1, 8 }
 0x247   : > { %s1050_s4 = scalar_lea.vmem [#allocation12], %s6834_s17 }
 0x248   : > { %s1057_s14 = sshll.u32 %s1050_s4, 4  ;;  %s6844_s14 = int_to_ptr.vmem [resolvable:$true] %s1057_s14 }
 0x24a   : > { %s8021_s27 = smov %s8020_s18  ;;  %s6841_s21 = scalar_lea.hbm %s8020_s18, %s6837_s6 }
 0x24b   : > { %s5490_s29 = scalar_lea.hbm %s6841_s21, 256  ;;  %s5494_s28 = scalar_lea.hbm %s8021_s27, 512 }
 0x24c   : > { %p5491_p7 = scmp.ne.s32.totalorder %s6841_s21, %s5490_s29  ;;  %p5495_p11 = scmp.lt.u32.totalorder %s6841_s21, %s8021_s27 }
 0x24d   : > { %p5496_p4 = scmp.lt.u32.totalorder %s5494_s28, %s5490_s29  ;;  %p5498_p9 = scmp.lt.u32.totalorder %s5490_s29, %s6841_s21 }
 0x24e   : > { %p5492_p10 = pnand %p5491_p7, %p8004_p12 }
 0x24f   : > { %p5497_p6 = por %p5496_p4, %p5495_p11 }
 0x250   : > { %p5493_p5 = pneg %p5492_p10 }
 0x251   : > { %p5499_p8 = por %p5498_p9, %p5497_p6 }
 0x253   : > { %p5500_p3 = pnand %p5499_p8, %p5493_p5 }
 0x255   : > { %5503 = shalt.err (!%p5500_p3)
}
 0x256   : > { %s5504_s5 = scalar_lea.vmem %s6844_s14, 256  ;;  %s6095_s26 = smov [#allocation12]  }
 0x257   : > { %p5505_p2 = scmp.ne.s32.totalorder %s6844_s14, %s5504_s5  ;;  %s5508_s0 = sshll.u32 %s6095_s26, 4  ;;  %s5509_s0 = int_to_ptr.vmem [resolvable:$false] %s5508_s0 }
 0x258   : > { %s5510_s9 = scalar_lea.vmem %s5509_s0, 512  ;;  %p5511_p0 = scmp.lt.s32.totalorder %s6844_s14, %s5509_s0 }
 0x259   : > { %p5506_p1 = pnand %p5505_p2, %p8004_p12  ;;  %p5512_p7 = scmp.lt.s32.totalorder %s5510_s9, %s5504_s5 }
 0x25b   : > { %p5507_p13 = pneg %p5506_p1  ;;  %p5513_p10 = por %p5512_p7, %p5511_p0 }
 0x25d   : > { %p5514_p11 = pnand %p5513_p10, %p5507_p13 }
 0x25f   : > { %5517 = shalt.err (!%p5514_p11)
}
 0x260   : > { %s6096_s11 = smov 64   ;;  %s8022_s18 = sld [smem:[#allocation77_spill]] }
 0x261   : > { %s8024_s29 = sld [smem:[#allocation79_spill]]  ;;  %s6097_s28 = smov 4  }
 0x262   : > { %s8025_s5 = scalar_lea.sflag [#allocation11], %s6466_s12  ;;  %s1088_s0 = scalar_lea.vmem [#allocation15], %s6834_s17 }
 0x263   : > { %4737 = dma.hbm_to_vmem [thread:$0]  (%p8004_p12), %s6841_s21, 256, %s6844_s14, %s8025_s5, %s6096_s11, %s6096_s11, %s6097_s28  }
 0x264   : > { %s1095_s9 = sshll.u32 %s1088_s0, 4  ;;  %s6873_s9 = int_to_ptr.vmem [resolvable:$true] %s1095_s9 }
 0x266   : > { %s8023_s4 = smov %s8022_s18  ;;  %s6870_s26 = scalar_lea.hbm %s8022_s18, %s6837_s6 }
 0x267   : > { %s6877_s7 = scalar_lea.hbm %s8024_s29, %s6837_s6  ;;  %s5518_s3 = scalar_lea.hbm %s6870_s26, 256 }
 0x268   : > { %p5519_p5 = scmp.ne.s32.totalorder %s6870_s26, %s5518_s3  ;;  %s5522_s13 = scalar_lea.hbm %s8023_s4, 512 }
 0x269   : > { %p5523_p9 = scmp.lt.u32.totalorder %s6870_s26, %s8023_s4  ;;  %p5524_p8 = scmp.lt.u32.totalorder %s5522_s13, %s5518_s3 }
 0x26a   : > { %p5520_p4 = pnand %p5519_p5, %p8004_p12  ;;  %p5526_p2 = scmp.lt.u32.totalorder %s5518_s3, %s6870_s26 }
 0x26b   : > { %p5525_p3 = por %p5524_p8, %p5523_p9 }
 0x26c   : > { %p5521_p6 = pneg %p5520_p4 }
 0x26d   : > { %p5527_p1 = por %p5526_p2, %p5525_p3 }
 0x26f   : > { %p5528_p13 = pnand %p5527_p1, %p5521_p6 }
 0x271   : > { %5531 = shalt.err (!%p5528_p13)
}
 0x272   : > { %s5532_s21 = scalar_lea.vmem %s6873_s9, 256  ;;  %s6098_s14 = smov [#allocation15]  }
 0x273   : > { %p5533_p0 = scmp.ne.s32.totalorder %s6873_s9, %s5532_s21  ;;  %s5536_s18 = sshll.u32 %s6098_s14, 4  ;;  %s5537_s18 = int_to_ptr.vmem [resolvable:$false] %s5536_s18 }
 0x274   : > { %s5538_s5 = scalar_lea.vmem %s5537_s18, 512  ;;  %p5539_p11 = scmp.lt.s32.totalorder %s6873_s9, %s5537_s18 }
 0x275   : > { %p5534_p7 = pnand %p5533_p0, %p8004_p12  ;;  %p5540_p5 = scmp.lt.s32.totalorder %s5538_s5, %s5532_s21 }
 0x277   : > { %p5535_p10 = pneg %p5534_p7  ;;  %p5541_p4 = por %p5540_p5, %p5539_p11 }
 0x279   : > { %p5542_p9 = pnand %p5541_p4, %p5535_p10 }
 0x27b   : > { %5545 = shalt.err (!%p5542_p9)
}
 0x27c   : > { %s8026_s13 = scalar_lea.sflag [#allocation14], %s6466_s12  ;;  %s8027_s3 = sld [smem:[#allocation81_spill]] }
 0x27d   : > { %4739 = dma.hbm_to_vmem [thread:$0]  (%p8004_p12), %s6870_s26, 256, %s6873_s9, %s8026_s13, %s6096_s11, %s6096_s11, %s6097_s28  }
 0x27e   : > { %s1126_s0 = scalar_lea.vmem [#allocation18], %s6834_s17  ;;  %s5546_s18 = scalar_lea.hbm %s6877_s7, 256 }
 0x27f   : > { %s1133_s21 = sshll.u32 %s1126_s0, 4  ;;  %p5547_p6 = scmp.ne.s32.totalorder %s6877_s7, %s5546_s18  ;;  %s6902_s21 = int_to_ptr.vmem [resolvable:$true] %s1133_s21 }
 0x280   : > { %s5550_s5 = scalar_lea.hbm %s8024_s29, 512  ;;  %p5551_p2 = scmp.lt.u32.totalorder %s6877_s7, %s8024_s29 }
 0x281   : > { %p5548_p8 = pnand %p5547_p6, %p8004_p12  ;;  %p5552_p1 = scmp.lt.u32.totalorder %s5550_s5, %s5546_s18 }
 0x282   : > { %s6906_s14 = scalar_lea.hbm %s8027_s3, %s6837_s6  ;;  %p5554_p0 = scmp.lt.u32.totalorder %s5546_s18, %s6877_s7 }
 0x283   : > { %p5549_p3 = pneg %p5548_p8  ;;  %p5553_p13 = por %p5552_p1, %p5551_p2 }
 0x285   : > { %p5555_p7 = por %p5554_p0, %p5553_p13 }
 0x287   : > { %p5556_p10 = pnand %p5555_p7, %p5549_p3 }
 0x289   : > { %5559 = shalt.err (!%p5556_p10)
}
 0x28a   : > { %s5560_s26 = scalar_lea.vmem %s6902_s21, 256  ;;  %s6099_s9 = smov [#allocation18]  }
 0x28b   : > { %p5561_p11 = scmp.ne.s32.totalorder %s6902_s21, %s5560_s26  ;;  %s5564_s13 = sshll.u32 %s6099_s9, 4  ;;  %s5565_s13 = int_to_ptr.vmem [resolvable:$false] %s5564_s13 }
 0x28c   : > { %s5566_s0 = scalar_lea.vmem %s5565_s13, 512  ;;  %p5567_p9 = scmp.lt.s32.totalorder %s6902_s21, %s5565_s13 }
 0x28d   : > { %p5562_p5 = pnand %p5561_p11, %p8004_p12  ;;  %p5568_p6 = scmp.lt.s32.totalorder %s5566_s0, %s5560_s26 }
 0x28f   : > { %p5563_p4 = pneg %p5562_p5  ;;  %p5569_p8 = por %p5568_p6, %p5567_p9 }
 0x291   : > { %p5570_p2 = pnand %p5569_p8, %p5563_p4 }
 0x293   : > { %5573 = shalt.err (!%p5570_p2)
}
 0x294   : > { %s8028_s18 = scalar_lea.sflag [#allocation17], %s6466_s12  ;;  %s8029_s5 = sld [smem:[#allocation83_spill]] }
 0x295   : > { %4741 = dma.hbm_to_vmem [thread:$0]  (%p8004_p12), %s6877_s7, 256, %s6902_s21, %s8028_s18, %s6096_s11, %s6096_s11, %s6097_s28  }
 0x296   : > { %s1164_s26 = scalar_lea.vmem [#allocation21], %s6834_s17  ;;  %s5574_s0 = scalar_lea.hbm %s6906_s14, 256 }
 0x297   : > { %s1171_s9 = sshll.u32 %s1164_s26, 4  ;;  %p5575_p3 = scmp.ne.s32.totalorder %s6906_s14, %s5574_s0  ;;  %s6931_s9 = int_to_ptr.vmem [resolvable:$true] %s1171_s9 }
 0x298   : > { %s5578_s4 = scalar_lea.hbm %s8027_s3, 512  ;;  %p5579_p0 = scmp.lt.u32.totalorder %s6906_s14, %s8027_s3 }
 0x299   : > { %p5576_p1 = pnand %p5575_p3, %p8004_p12  ;;  %p5580_p7 = scmp.lt.u32.totalorder %s5578_s4, %s5574_s0 }
 0x29a   : > { %s6935_s13 = scalar_lea.hbm %s8029_s5, %s6837_s6  ;;  %p5582_p11 = scmp.lt.u32.totalorder %s5574_s0, %s6906_s14 }
 0x29b   : > { %p5577_p13 = pneg %p5576_p1  ;;  %p5581_p10 = por %p5580_p7, %p5579_p0 }
 0x29d   : > { %p5583_p5 = por %p5582_p11, %p5581_p10 }
 0x29f   : > { %p5584_p4 = pnand %p5583_p5, %p5577_p13 }
 0x2a1   : > { %5587 = shalt.err (!%p5584_p4)
}
 0x2a2   : > { %s5588_s7 = scalar_lea.vmem %s6931_s9, 256  ;;  %s6100_s21 = smov [#allocation21]  }
 0x2a3   : > { %p5589_p9 = scmp.ne.s32.totalorder %s6931_s9, %s5588_s7  ;;  %s5592_s18 = sshll.u32 %s6100_s21, 4  ;;  %s5593_s18 = int_to_ptr.vmem [resolvable:$false] %s5592_s18 }
 0x2a4   : > { %s5594_s26 = scalar_lea.vmem %s5593_s18, 512  ;;  %p5595_p2 = scmp.lt.s32.totalorder %s6931_s9, %s5593_s18 }
 0x2a5   : > { %p5590_p6 = pnand %p5589_p9, %p8004_p12  ;;  %p5596_p3 = scmp.lt.s32.totalorder %s5594_s26, %s5588_s7 }
 0x2a7   : > { %p5591_p8 = pneg %p5590_p6  ;;  %p5597_p1 = por %p5596_p3, %p5595_p2 }
 0x2a9   : > { %p5598_p0 = pnand %p5597_p1, %p5591_p8 }
 0x2ab   : > { %5601 = shalt.err (!%p5598_p0)
}
 0x2ac   : > { %s8030_s4 = scalar_lea.sflag [#allocation20], %s6466_s12  ;;  %s8031_s0 = sld [smem:[#allocation85_spill]] }
 0x2ad   : > { %4743 = dma.hbm_to_vmem [thread:$0]  (%p8004_p12), %s6906_s14, 256, %s6931_s9, %s8030_s4, %s6096_s11, %s6096_s11, %s6097_s28  }
 0x2ae   : > { %s1202_s7 = scalar_lea.vmem [#allocation24], %s6834_s17  ;;  %s5602_s26 = scalar_lea.hbm %s6935_s13, 256 }
 0x2af   : > { %s1209_s21 = sshll.u32 %s1202_s7, 4  ;;  %p5603_p13 = scmp.ne.s32.totalorder %s6935_s13, %s5602_s26  ;;  %s6960_s21 = int_to_ptr.vmem [resolvable:$true] %s1209_s21 }
 0x2b0   : > { %s5606_s24 = scalar_lea.hbm %s8029_s5, 512  ;;  %p5607_p11 = scmp.lt.u32.totalorder %s6935_s13, %s8029_s5 }
 0x2b1   : > { %p5604_p7 = pnand %p5603_p13, %p8004_p12  ;;  %p5608_p5 = scmp.lt.u32.totalorder %s5606_s24, %s5602_s26 }
 0x2b2   : > { %s8032_s3 = smov %s8031_s0  ;;  %s6964_s18 = scalar_lea.hbm %s8031_s0, %s6837_s6 }
 0x2b3   : > { %p5605_p10 = pneg %p5604_p7  ;;  %p5609_p4 = por %p5608_p5, %p5607_p11 }
 0x2b4   : > { %p5610_p9 = scmp.lt.u32.totalorder %s5602_s26, %s6935_s13 }
 0x2b6   : > { %p5611_p6 = por %p5610_p9, %p5609_p4 }
 0x2b8   : > { %p5612_p8 = pnand %p5611_p6, %p5605_p10 }
 0x2ba   : > { %5615 = shalt.err (!%p5612_p8)
}
 0x2bb   : > { %s5616_s14 = scalar_lea.vmem %s6960_s21, 256  ;;  %s6101_s9 = smov [#allocation24]  }
 0x2bc   : > { %p5617_p2 = scmp.ne.s32.totalorder %s6960_s21, %s5616_s14  ;;  %s5620_s4 = sshll.u32 %s6101_s9, 4  ;;  %s5621_s4 = int_to_ptr.vmem [resolvable:$false] %s5620_s4 }
 0x2bd   : > { %s5622_s0 = scalar_lea.vmem %s5621_s4, 512  ;;  %p5623_p0 = scmp.lt.s32.totalorder %s6960_s21, %s5621_s4 }
 0x2be   : > { %p5618_p3 = pnand %p5617_p2, %p8004_p12  ;;  %p5624_p13 = scmp.lt.s32.totalorder %s5622_s0, %s5616_s14 }
 0x2c0   : > { %p5619_p1 = pneg %p5618_p3  ;;  %p5625_p7 = por %p5624_p13, %p5623_p0 }
 0x2c2   : > { %p5626_p11 = pnand %p5625_p7, %p5619_p1 }
 0x2c4   : > { %5629 = shalt.err (!%p5626_p11)
}
 0x2c5   : > { %s8033_s24 = scalar_lea.sflag [#allocation23], %s6466_s12  ;;  %s8034_s7 = sld [smem:[#allocation87_spill]] }
 0x2c6   : > { %4745 = dma.hbm_to_vmem [thread:$0]  (%p8004_p12), %s6935_s13, 256, %s6960_s21, %s8033_s24, %s6096_s11, %s6096_s11, %s6097_s28  }
 0x2c7   : > { %s1240_s26 = scalar_lea.vmem [#allocation27], %s6834_s17  ;;  %s5630_s4 = scalar_lea.hbm %s6964_s18, 256 }
 0x2c8   : > { %s1247_s14 = sshll.u32 %s1240_s26, 4  ;;  %p5631_p10 = scmp.ne.s32.totalorder %s6964_s18, %s5630_s4  ;;  %s6989_s14 = int_to_ptr.vmem [resolvable:$true] %s1247_s14 }
 0x2c9   : > { %s5634_s0 = scalar_lea.hbm %s8032_s3, 512  ;;  %p5635_p9 = scmp.lt.u32.totalorder %s6964_s18, %s8032_s3 }
 0x2ca   : > { %p5632_p5 = pnand %p5631_p10, %p8004_p12  ;;  %p5636_p6 = scmp.lt.u32.totalorder %s5634_s0, %s5630_s4 }
 0x2cb   : > { %s8035_s5 = smov %s8034_s7  ;;  %s6993_s9 = scalar_lea.hbm %s8034_s7, %s6837_s6 }
 0x2cc   : > { %p5633_p4 = pneg %p5632_p5  ;;  %p5637_p8 = por %p5636_p6, %p5635_p9 }
 0x2cd   : > { %p5638_p2 = scmp.lt.u32.totalorder %s5630_s4, %s6964_s18 }
 0x2cf   : > { %p5639_p3 = por %p5638_p2, %p5637_p8 }
 0x2d1   : > { %p5640_p1 = pnand %p5639_p3, %p5633_p4 }
 0x2d3   : > { %5643 = shalt.err (!%p5640_p1)
}
 0x2d4   : > { %s5644_s13 = scalar_lea.vmem %s6989_s14, 256  ;;  %s6102_s21 = smov [#allocation27]  }
 0x2d5   : > { %p5645_p0 = scmp.ne.s32.totalorder %s6989_s14, %s5644_s13  ;;  %s5648_s24 = sshll.u32 %s6102_s21, 4  ;;  %s5649_s24 = int_to_ptr.vmem [resolvable:$false] %s5648_s24 }
 0x2d6   : > { %s5650_s7 = scalar_lea.vmem %s5649_s24, 512  ;;  %p5651_p11 = scmp.lt.s32.totalorder %s6989_s14, %s5649_s24 }
 0x2d7   : > { %p5646_p13 = pnand %p5645_p0, %p8004_p12  ;;  %p5652_p10 = scmp.lt.s32.totalorder %s5650_s7, %s5644_s13 }
 0x2d9   : > { %p5647_p7 = pneg %p5646_p13  ;;  %p5653_p5 = por %p5652_p10, %p5651_p11 }
 0x2db   : > { %p5654_p9 = pnand %p5653_p5, %p5647_p7 }
 0x2dd   : > { %5657 = shalt.err (!%p5654_p9)
}
 0x2de   : > { %s8036_s26 = scalar_lea.sflag [#allocation26], %s6466_s12  ;;  %s8037_s4 = sld [smem:[#allocation89_spill]] }
 0x2df   : > { %4747 = dma.hbm_to_vmem [thread:$0]  (%p8004_p12), %s6964_s18, 256, %s6989_s14, %s8036_s26, %s6096_s11, %s6096_s11, %s6097_s28  }
 0x2e0   : > { %s1278_s0 = scalar_lea.vmem [#allocation30], %s6834_s17  ;;  %s5658_s24 = scalar_lea.hbm %s6993_s9, 256 }
 0x2e1   : > { %s1285_s13 = sshll.u32 %s1278_s0, 4  ;;  %p5659_p4 = scmp.ne.s32.totalorder %s6993_s9, %s5658_s24  ;;  %s7018_s13 = int_to_ptr.vmem [resolvable:$true] %s1285_s13 }
 0x2e2   : > { %s5662_s7 = scalar_lea.hbm %s8035_s5, 512  ;;  %p5663_p2 = scmp.lt.u32.totalorder %s6993_s9, %s8035_s5 }
 0x2e3   : > { %p5660_p6 = pnand %p5659_p4, %p8004_p12  ;;  %p5664_p3 = scmp.lt.u32.totalorder %s5662_s7, %s5658_s24 }
 0x2e4   : > { %s7022_s21 = scalar_lea.hbm %s8037_s4, %s6837_s6  ;;  %p5666_p0 = scmp.lt.u32.totalorder %s5658_s24, %s6993_s9 }
 0x2e5   : > { %p5661_p8 = pneg %p5660_p6  ;;  %p5665_p1 = por %p5664_p3, %p5663_p2 }
 0x2e7   : > { %p5667_p13 = por %p5666_p0, %p5665_p1 }
 0x2e9   : > { %p5668_p7 = pnand %p5667_p13, %p5661_p8 }
 0x2eb   : > { %5671 = shalt.err (!%p5668_p7)
}
 0x2ec   : > { %s5672_s18 = scalar_lea.vmem %s7018_s13, 256  ;;  %s6103_s6 = smov [#allocation30]  }
 0x2ed   : > { %p5673_p11 = scmp.ne.s32.totalorder %s7018_s13, %s5672_s18  ;;  %s5676_s14 = sshll.u32 %s6103_s6, 4  ;;  %s5677_s14 = int_to_ptr.vmem [resolvable:$false] %s5676_s14 }
 0x2ee   : > { %s5678_s26 = scalar_lea.vmem %s5677_s14, 512  ;;  %p5679_p9 = scmp.lt.s32.totalorder %s7018_s13, %s5677_s14 }
 0x2ef   : > { %p5674_p10 = pnand %p5673_p11, %p8004_p12  ;;  %p5680_p4 = scmp.lt.s32.totalorder %s5678_s26, %s5672_s18 }
 0x2f1   : > { %p5675_p5 = pneg %p5674_p10  ;;  %p5681_p6 = por %p5680_p4, %p5679_p9 }
 0x2f3   : > { %p5682_p2 = pnand %p5681_p6, %p5675_p5 }
 0x2f5   : > { %5685 = shalt.err (!%p5682_p2)
}
 0x2f6   : > { %s8038_s0 = scalar_lea.sflag [#allocation29], %s6466_s12  ;;  %s1316_s24 = scalar_lea.vmem [#allocation33], %s6834_s17 }
 0x2f7   : > { %4749 = dma.hbm_to_vmem [thread:$0]  (%p8004_p12), %s6993_s9, 256, %s7018_s13, %s8038_s0, %s6096_s11, %s6096_s11, %s6097_s28  }
 0x2f8   : > { %s1323_s7 = sshll.u32 %s1316_s24, 4  ;;  %s4390_s18 = sshll.u32 %s6524_s8, 5  ;;  %s7048_s7 = int_to_ptr.vmem [resolvable:$true] %s1323_s7 }
 0x2f9   : > { %s5686_s6 = scalar_lea.hbm %s7022_s21, 256  ;;  %s5690_s14 = scalar_lea.hbm %s8037_s4, 512 }
 0x2fa   : > { %p5687_p8 = scmp.ne.s32.totalorder %s7022_s21, %s5686_s6  ;;  %p5691_p0 = scmp.lt.u32.totalorder %s7022_s21, %s8037_s4 }
 0x2fb   : > { %p5692_p13 = scmp.lt.u32.totalorder %s5690_s14, %s5686_s6  ;;  %p5694_p11 = scmp.lt.u32.totalorder %s5686_s6, %s7022_s21 }
 0x2fc   : > { %p5688_p3 = pnand %p5687_p8, %p8004_p12 }
 0x2fd   : > { %p5693_p7 = por %p5692_p13, %p5691_p0 }
 0x2fe   : > { %p5689_p1 = pneg %p5688_p3 }
 0x2ff   : > { %p5695_p10 = por %p5694_p11, %p5693_p7 }
 0x301   : > { %p5696_p5 = pnand %p5695_p10, %p5689_p1 }
 0x303   : > { %5699 = shalt.err (!%p5696_p5)
}
 0x304   : > { %s5700_s17 = scalar_lea.vmem %s7048_s7, 256  ;;  %s6104_s9 = smov [#allocation33]  }
 0x305   : > { %p5701_p9 = scmp.ne.s32.totalorder %s7048_s7, %s5700_s17  ;;  %s5704_s13 = sshll.u32 %s6104_s9, 4  ;;  %s5705_s13 = int_to_ptr.vmem [resolvable:$false] %s5704_s13 }
 0x306   : > { %s5706_s26 = scalar_lea.vmem %s5705_s13, 512  ;;  %p5707_p2 = scmp.lt.s32.totalorder %s7048_s7, %s5705_s13 }
 0x307   : > { %p5702_p4 = pnand %p5701_p9, %p8004_p12  ;;  %p5708_p8 = scmp.lt.s32.totalorder %s5706_s26, %s5700_s17 }
 0x309   : > { %p5703_p6 = pneg %p5702_p4  ;;  %p5709_p3 = por %p5708_p8, %p5707_p2 }
 0x30b   : > { %p5710_p0 = pnand %p5709_p3, %p5703_p6 }
 0x30d   : > { %5713 = shalt.err (!%p5710_p0)
}
 0x30e   : > { %s8039_s0 = scalar_lea.sflag [#allocation32], %s6466_s12  ;;  %s8040_s24 = sld [smem:[#allocation91_spill]] }
 0x30f   : > { %4751 = dma.hbm_to_vmem [thread:$0]  (%p8004_p12), %s7022_s21, 256, %s7048_s7, %s8039_s0, %s6096_s11, %s6096_s11, %s6097_s28  }
 0x310   : > { %s4495_s6 = sshll.u32 %s6036_s1, 9  ;;  %s1354_s14 = scalar_lea.vmem [#allocation36], %s4390_s18 }
 0x311   : > { %s1361_s17 = sshll.u32 %s1354_s14, 4  ;;  %s7078_s17 = int_to_ptr.vmem [resolvable:$true] %s1361_s17 }
 0x314   : > { %s7076_s9 = scalar_lea.hbm %s8040_s24, %s4495_s6  ;;  %s5718_s26 = scalar_lea.hbm %s8040_s24, 1024 }
 0x315   : > { %s5714_s13 = scalar_lea.hbm %s7076_s9, 512  ;;  %p5719_p11 = scmp.lt.u32.totalorder %s7076_s9, %s8040_s24 }
 0x316   : > { %p5715_p1 = scmp.ne.s32.totalorder %s7076_s9, %s5714_s13  ;;  %p5720_p10 = scmp.lt.u32.totalorder %s5718_s26, %s5714_s13 }
 0x317   : > { %p5722_p9 = scmp.lt.u32.totalorder %s5714_s13, %s7076_s9 }
 0x318   : > { %p5716_p13 = pnand %p5715_p1, %p8004_p12  ;;  %p5721_p5 = por %p5720_p10, %p5719_p11 }
 0x31a   : > { %p5717_p7 = pneg %p5716_p13  ;;  %p5723_p4 = por %p5722_p9, %p5721_p5 }
 0x31c   : > { %p5724_p6 = pnand %p5723_p4, %p5717_p7 }
 0x31e   : > { %5727 = shalt.err (!%p5724_p6)
}
 0x31f   : > { %s5728_s21 = scalar_lea.vmem %s7078_s17, 512  ;;  %s6105_s7 = smov [#allocation36]  }
 0x320   : > { %p5729_p2 = scmp.ne.s32.totalorder %s7078_s17, %s5728_s21  ;;  %s5732_s18 = sshll.u32 %s6105_s7, 4  ;;  %s5733_s18 = int_to_ptr.vmem [resolvable:$false] %s5732_s18 }
 0x321   : > { %s5734_s0 = scalar_lea.vmem %s5733_s18, 1024  ;;  %p5735_p0 = scmp.lt.s32.totalorder %s7078_s17, %s5733_s18 }
 0x322   : > { %p5730_p8 = pnand %p5729_p2, %p8004_p12  ;;  %p5736_p1 = scmp.lt.s32.totalorder %s5734_s0, %s5728_s21 }
 0x324   : > { %p5731_p3 = pneg %p5730_p8  ;;  %p5737_p13 = por %p5736_p1, %p5735_p0 }
 0x326   : > { %p5738_p11 = pnand %p5737_p13, %p5731_p3 }
 0x328   : > { %5741 = shalt.err (!%p5738_p11)
}
 0x329   : > { %s8041_s6 = scalar_lea.sflag [#allocation35], %s6466_s12  ;;  %s8042_s14 = sld [smem:[#allocation93_spill]] }
 0x32a   : > { %s8043_s13 = sld [smem:[#allocation95_spill]]  ;;  %s1391_s21 = scalar_lea.vmem [#allocation39], %s6524_s8 }
 0x32b   : > { %4753 = dma.hbm_to_vmem [thread:$0]  (%p8004_p12), %s7076_s9, 512, %s7078_s17, %s8041_s6, %s6096_s11, %s6096_s11, %s6097_s28  }
 0x32c   : > { %s1398_s7 = sshll.u32 %s1391_s21, 4  ;;  %s1399_s7 = int_to_ptr.vmem [resolvable:$true] %s1398_s7 }
 0x32f   : > { %s7104_s26 = scalar_lea.hbm %s8042_s14, %s6547_s23  ;;  %s5746_s3 = scalar_lea.hbm %s8042_s14, 32 }
 0x330   : > { %s7109_s18 = scalar_lea.hbm %s8043_s13, %s6547_s23  ;;  %s5742_s0 = scalar_lea.hbm %s7104_s26, 16 }
 0x331   : > { %p5743_p7 = scmp.ne.s32.totalorder %s7104_s26, %s5742_s0  ;;  %p5747_p9 = scmp.lt.u32.totalorder %s7104_s26, %s8042_s14 }
 0x332   : > { %p5748_p4 = scmp.lt.u32.totalorder %s5746_s3, %s5742_s0  ;;  %p5750_p2 = scmp.lt.u32.totalorder %s5742_s0, %s7104_s26 }
 0x333   : > { %p5744_p10 = pnand %p5743_p7, %p8004_p12 }
 0x334   : > { %p5749_p6 = por %p5748_p4, %p5747_p9 }
 0x335   : > { %p5745_p5 = pneg %p5744_p10 }
 0x336   : > { %p5751_p8 = por %p5750_p2, %p5749_p6 }
 0x338   : > { %p5752_p3 = pnand %p5751_p8, %p5745_p5 }
 0x33a   : > { %5755 = shalt.err (!%p5752_p3)
}
 0x33b   : > { %s5756_s11 = scalar_lea.vmem %s1399_s7, 16  ;;  %s6106_s28 = smov [#allocation39]  }
 0x33c   : > { %p5757_p0 = scmp.ne.s32.totalorder %s1399_s7, %s5756_s11  ;;  %s5760_s17 = sshll.u32 %s6106_s28, 4  ;;  %s5761_s17 = int_to_ptr.vmem [resolvable:$false] %s5760_s17 }
 0x33d   : > { %s5762_s9 = scalar_lea.vmem %s5761_s17, 32  ;;  %p5763_p11 = scmp.lt.s32.totalorder %s1399_s7, %s5761_s17 }
 0x33e   : > { %p5758_p1 = pnand %p5757_p0, %p8004_p12  ;;  %p5764_p7 = scmp.lt.s32.totalorder %s5762_s9, %s5756_s11 }
 0x340   : > { %p5759_p13 = pneg %p5758_p1  ;;  %p5765_p10 = por %p5764_p7, %p5763_p11 }
 0x342   : > { %p5766_p4 = pnand %p5765_p10, %p5759_p13 }
 0x344   : > { %5769 = shalt.err (!%p5766_p4)
}
 0x345   : > { %s8044_s3 = scalar_lea.sflag [#allocation38], %s6466_s12  ;;  %s8045_s6 = sld [smem:[#allocation97_spill]] }
 0x346   : > { %4755 = dma.hbm_to_vmem [thread:$0]  (%p8004_p12), %s7104_s26, 16, %s1399_s7, %s8044_s3  }
 0x347   : > { %s1425_s21 = scalar_lea.vmem [#allocation42], %s6524_s8  ;;  %s5770_s28 = scalar_lea.hbm %s7109_s18, 16 }
 0x348   : > { %s1432_s0 = sshll.u32 %s1425_s21, 4  ;;  %p5771_p5 = scmp.ne.s32.totalorder %s7109_s18, %s5770_s28  ;;  %s1433_s0 = int_to_ptr.vmem [resolvable:$true] %s1432_s0 }
 0x349   : > { %s5774_s17 = scalar_lea.hbm %s8043_s13, 32  ;;  %p5775_p2 = scmp.lt.u32.totalorder %s7109_s18, %s8043_s13 }
 0x34a   : > { %p5772_p9 = pnand %p5771_p5, %p8004_p12  ;;  %p5776_p8 = scmp.lt.u32.totalorder %s5774_s17, %s5770_s28 }
 0x34b   : > { %s7129_s11 = scalar_lea.hbm %s8045_s6, %s6547_s23  ;;  %p5778_p0 = scmp.lt.u32.totalorder %s5770_s28, %s7109_s18 }
 0x34c   : > { %p5773_p6 = pneg %p5772_p9  ;;  %p5777_p3 = por %p5776_p8, %p5775_p2 }
 0x34e   : > { %p5779_p1 = por %p5778_p0, %p5777_p3 }
 0x350   : > { %p5780_p13 = pnand %p5779_p1, %p5773_p6 }
 0x352   : > { %5783 = shalt.err (!%p5780_p13)
}
 0x353   : > { %s5784_s9 = scalar_lea.vmem %s1433_s0, 16  ;;  %s6107_s26 = smov [#allocation42]  }
 0x354   : > { %p5785_p11 = scmp.ne.s32.totalorder %s1433_s0, %s5784_s9  ;;  %s5788_s7 = sshll.u32 %s6107_s26, 4  ;;  %s5789_s7 = int_to_ptr.vmem [resolvable:$false] %s5788_s7 }
 0x355   : > { %s5790_s3 = scalar_lea.vmem %s5789_s7, 32  ;;  %p5791_p4 = scmp.lt.s32.totalorder %s1433_s0, %s5789_s7 }
 0x356   : > { %p5786_p7 = pnand %p5785_p11, %p8004_p12  ;;  %p5792_p5 = scmp.lt.s32.totalorder %s5790_s3, %s5784_s9 }
 0x358   : > { %p5787_p10 = pneg %p5786_p7  ;;  %p5793_p9 = por %p5792_p5, %p5791_p4 }
 0x35a   : > { %p5794_p2 = pnand %p5793_p9, %p5787_p10 }
 0x35c   : > { %5797 = shalt.err (!%p5794_p2)
}
 0x35d   : > { %s8046_s21 = scalar_lea.sflag [#allocation41], %s6466_s12  ;;  %s1459_s28 = scalar_lea.vmem [#allocation45], %s6524_s8 }
 0x35e   : > { %4757 = dma.hbm_to_vmem [thread:$0]  (%p8004_p12), %s7109_s18, 16, %s1433_s0, %s8046_s21  }
 0x35f   : > { %s1466_s17 = sshll.u32 %s1459_s28, 4  ;;  %s5798_s9 = scalar_lea.hbm %s7129_s11, 16  ;;  %s1467_s17 = int_to_ptr.vmem [resolvable:$true] %s1466_s17 }
 0x360   : > { %p5799_p6 = scmp.ne.s32.totalorder %s7129_s11, %s5798_s9  ;;  %s5802_s26 = scalar_lea.hbm %s8045_s6, 32 }
 0x361   : > { %p5803_p0 = scmp.lt.u32.totalorder %s7129_s11, %s8045_s6  ;;  %p5804_p1 = scmp.lt.u32.totalorder %s5802_s26, %s5798_s9 }
 0x362   : > { %p5800_p8 = pnand %p5799_p6, %p8004_p12  ;;  %p5806_p11 = scmp.lt.u32.totalorder %s5798_s9, %s7129_s11 }
 0x363   : > { %p5805_p13 = por %p5804_p1, %p5803_p0 }
 0x364   : > { %p5801_p3 = pneg %p5800_p8 }
 0x365   : > { %p5807_p7 = por %p5806_p11, %p5805_p13 }
 0x367   : > { %p5808_p10 = pnand %p5807_p7, %p5801_p3 }
 0x369   : > { %5811 = shalt.err (!%p5808_p10)
}
 0x36a   : > { %s5812_s7 = scalar_lea.vmem %s1467_s17, 16  ;;  %s6108_s18 = smov [#allocation45]  }
 0x36b   : > { %p5813_p4 = scmp.ne.s32.totalorder %s1467_s17, %s5812_s7  ;;  %s5816_s0 = sshll.u32 %s6108_s18, 4  ;;  %s5817_s0 = int_to_ptr.vmem [resolvable:$false] %s5816_s0 }
 0x36c   : > { %s5818_s3 = scalar_lea.vmem %s5817_s0, 32  ;;  %p5819_p2 = scmp.lt.s32.totalorder %s1467_s17, %s5817_s0 }
 0x36d   : > { %p5814_p5 = pnand %p5813_p4, %p8004_p12  ;;  %p5820_p6 = scmp.lt.s32.totalorder %s5818_s3, %s5812_s7 }
 0x36f   : > { %p5815_p9 = pneg %p5814_p5  ;;  %p5821_p8 = por %p5820_p6, %p5819_p2 }
 0x371   : > { %p5822_p0 = pnand %p5821_p8, %p5815_p9 }
 0x373   : > { %5825 = shalt.err (!%p5822_p0)
}
 0x374   : > { %s8047_s21 = scalar_lea.sflag [#allocation44], %s6466_s12  ;;  %s8048_s28 = sld [smem:[#allocation98_spill]] }
 0x375   : > { %4759 = dma.hbm_to_vmem [thread:$0]  (%p8004_p12), %s7129_s11, 16, %s1467_s17, %s8047_s21  }
 0x376   : > { %s1476_s7 = scalar_lea.vmem [#allocation46], %s6524_s8  ;;  %s1474_s0 = scalar_lea.sflag [#allocation47], %s6466_s12 }
 0x377   : > { %s1483_s18 = sshll.u32 %s1476_s7, 4  ;;  %s1484_s18 = int_to_ptr.vmem [resolvable:$true] %s1483_s18 }
 0x37a   : > { %s8049_s9 = smov %s8048_s28  ;;  %s7164_s26 = scalar_lea.hbm %s8048_s28, %s6547_s23 }
 0x37b   : > { %s5826_s3 = scalar_lea.hbm %s7164_s26, 16  ;;  %s5830_s4 = scalar_lea.hbm %s8049_s9, 32 }
 0x37c   : > { %p5827_p3 = scmp.ne.s32.totalorder %s7164_s26, %s5826_s3  ;;  %p5831_p11 = scmp.lt.u32.totalorder %s7164_s26, %s8049_s9 }
 0x37d   : > { %p5832_p7 = scmp.lt.u32.totalorder %s5830_s4, %s5826_s3  ;;  %p5834_p4 = scmp.lt.u32.totalorder %s5826_s3, %s7164_s26 }
 0x37e   : > { %p5828_p1 = pnand %p5827_p3, %p8004_p12 }
 0x37f   : > { %p5833_p10 = por %p5832_p7, %p5831_p11 }
 0x380   : > { %p5829_p13 = pneg %p5828_p1 }
 0x381   : > { %p5835_p5 = por %p5834_p4, %p5833_p10 }
 0x383   : > { %p5836_p9 = pnand %p5835_p5, %p5829_p13 }
 0x385   : > { %5839 = shalt.err (!%p5836_p9)
}
 0x386   : > { %s5840_s23 = scalar_lea.vmem %s1484_s18, 16  ;;  %s6109_s12 = smov [#allocation46]  }
 0x387   : > { %p5841_p2 = scmp.ne.s32.totalorder %s1484_s18, %s5840_s23  ;;  %s5844_s8 = sshll.u32 %s6109_s12, 4  ;;  %s5845_s8 = int_to_ptr.vmem [resolvable:$false] %s5844_s8 }
 0x388   : > { %s5846_s11 = scalar_lea.vmem %s5845_s8, 32  ;;  %p5847_p0 = scmp.lt.s32.totalorder %s1484_s18, %s5845_s8 }
 0x389   : > { %p5842_p6 = pnand %p5841_p2, %p8004_p12  ;;  %p5848_p3 = scmp.lt.s32.totalorder %s5846_s11, %s5840_s23 }
 0x38b   : > { %p5843_p8 = pneg %p5842_p6  ;;  %p5849_p1 = por %p5848_p3, %p5847_p0 }
 0x38d   : > { %p5850_p7 = pnand %p5849_p1, %p5843_p8 }
 0x38f   : > { %5853 = shalt.err (!%p5850_p7)
}
 0x390   : > { %4760 = dma.hbm_to_vmem [thread:$0]  (%p8004_p12), %s7164_s26, 16, %s1484_s18, %s1474_s0  }
 0x391 PF: > { %p8050_p13 = scmp.ne.s32.totalorder %s7997_s30, 0 }
 0x393   : > { %1492 = sbr.rel (%p8050_p13) target bundleno = 5775 (0x168f), region = 140 }
 0x39a   : > { %s7184_s4 = sand.u32 1, %s6020_s22   ;;  %p8051_p11 = scmp.ne.s32.totalorder %s7986_s19, 0 }
 0x39b   : > { %s7187_s17 = sshll.u32 %s7184_s4, 3  ;;  %s1495_s21 = scalar_lea.sflag [#allocation5], %s7184_s4 }
 0x39c   : > { %5927 = dma.done.wait (%p8051_p11), %s1495_s21, 128  }
 0x39d   : > { %5929 = vsyncadd (%p8051_p11), %s1495_s21, 4294967168  ;;  %s7196_s20 = sand.u32 1, %s6336_s10   ;;  %s4402_s30 = sshll.u32 %s7184_s4, 4 }
 0x39e   : > { %s1504_s26 = scalar_lea.sflag [#allocation8], %s7196_s20  ;;  %s7200_s7 = scalar_lea.vmem [#allocation7], %s4402_s30 }
 0x39f   : > { %5931 = dma.done.wait (%p8051_p11), %s1504_s26, 512  }
 0x3a0   : > { %5933 = vsyncadd (%p8051_p11), %s1504_s26, 4294966784  ;;  %s7206_s18 = scalar_lea.vmem [#allocation9], %s4402_s30  ;;  %s1522_s0 = scalar_lea.sflag [#allocation11], %s7196_s20 }
 0x3a1   : > { %5935 = dma.done.wait (%p8051_p11), %s1522_s0, 128  }
 0x3a2   : > { %5937 = vsyncadd (%p8051_p11), %s1522_s0, 4294967168  ;;  %s8052_s23 = sld [smem:[#allocation111_spill]]  ;;  %s7215_s12 = sand.u32 1, %s6008_s15  }
 0x3a3   : > { %s7218_s8 = sshll.u32 %s7215_s12, 4 }
 0x3a4   : > { %s7221_s11 = scalar_lea.vmem [#allocation12], %s7218_s8 }
 0x3a8   : > { %p8053_p12 = scmp.ne.s32.totalorder %s8052_s23, 0 }
 0x3aa   : > { %5939 = dma.done.wait (%p8053_p12), %s1522_s0, 256  }
 0x3ab   : > { %5941 = vsyncadd (%p8053_p12), %s1522_s0, 4294967040  ;;  %s1540_s19 = scalar_lea.sflag [#allocation14], %s7196_s20 }
 0x3ac   : > { %5943 = dma.done.wait (%p8053_p12), %s1540_s19, 272  }
 0x3ad   : > { %5945 = vsyncadd (%p8053_p12), %s1540_s19, 4294967024  ;;  %s7234_s30 = scalar_lea.vmem [#allocation15], %s7218_s8  ;;  %s1557_s26 = scalar_lea.sflag [#allocation17], %s7196_s20 }
 0x3ae   : > { %5947 = dma.done.wait (%p8053_p12), %s1557_s26, 272  }
 0x3af   : > { %5949 = vsyncadd (%p8053_p12), %s1557_s26, 4294967024  ;;  %s7243_s0 = scalar_lea.vmem [#allocation18], %s7218_s8  ;;  %s1574_s19 = scalar_lea.sflag [#allocation20], %s7196_s20 }
 0x3b0   : > { %5951 = dma.done.wait (%p8053_p12), %s1574_s19, 272  }
 0x3b1   : > { %5953 = vsyncadd (%p8053_p12), %s1574_s19, 4294967024  ;;  %s7252_s3 = scalar_lea.vmem [#allocation21], %s7218_s8  ;;  %s1591_s26 = scalar_lea.sflag [#allocation23], %s7196_s20 }
 0x3b2   : > { %5955 = dma.done.wait (%p8053_p12), %s1591_s26, 272  }
 0x3b3   : > { %5957 = vsyncadd (%p8053_p12), %s1591_s26, 4294967024  ;;  %s7261_s28 = scalar_lea.vmem [#allocation24], %s7218_s8  ;;  %s1608_s19 = scalar_lea.sflag [#allocation26], %s7196_s20 }
 0x3b4   : > { %5959 = dma.done.wait (%p8053_p12), %s1608_s19, 272  }
 0x3b5   : > { %5961 = vsyncadd (%p8053_p12), %s1608_s19, 4294967024  ;;  %s7270_s21 = scalar_lea.vmem [#allocation27], %s7218_s8  ;;  %s1625_s26 = scalar_lea.sflag [#allocation29], %s7196_s20 }
 0x3b6   : > { %5963 = dma.done.wait (%p8053_p12), %s1625_s26, 272  }
 0x3b7   : > { %5965 = vsyncadd (%p8053_p12), %s1625_s26, 4294967024  ;;  %s7279_s5 = scalar_lea.vmem [#allocation30], %s7218_s8  ;;  %s1642_s19 = scalar_lea.sflag [#allocation32], %s7196_s20 }
 0x3b8   : > { %5967 = dma.done.wait (%p8053_p12), %s1642_s19, 272  }
 0x3b9   : > { %5969 = vsyncadd (%p8053_p12), %s1642_s19, 4294967024  ;;  %s7288_s6 = scalar_lea.vmem [#allocation33], %s7218_s8  ;;  %s1659_s26 = scalar_lea.sflag [#allocation35], %s7196_s20 }
 0x3ba   : > { %5971 = dma.done.wait (%p8053_p12), %s1659_s26, 528  }
 0x3bb   : > { %5973 = vsyncadd (%p8053_p12), %s1659_s26, 4294966768  ;;  %s4413_s9 = sshll.u32 %s7215_s12, 5  ;;  %s1676_s19 = scalar_lea.sflag [#allocation38], %s7196_s20 }
 0x3bc   : > { %s7297_s14 = scalar_lea.vmem [#allocation36], %s4413_s9 }
 0x3bd   : > { %5975 = dma.done.wait (%p8053_p12), %s1676_s19, 32  }
 0x3be   : > { %5977 = vsyncadd (%p8053_p12), %s1676_s19, 4294967264  ;;  %s1692_s26 = scalar_lea.sflag [#allocation41], %s7196_s20 }
 0x3bf   : > { %5979 = dma.done.wait (%p8053_p12), %s1692_s26, 32  }
 0x3c0   : > { %5981 = vsyncadd (%p8053_p12), %s1692_s26, 4294967264  ;;  %s1702_s9 = scalar_lea.vmem [#allocation42], %s7215_s12  ;;  %s1708_s24 = scalar_lea.sflag [#allocation44], %s7196_s20 }
 0x3c1   : > { %s1710_s25 = scalar_lea.vmem [#allocation43], %s7215_s12 }
 0x3c2   : > { %5983 = dma.done.wait (%p8053_p12), %s1708_s24, 32  }
 0x3c3   : > { %5985 = vsyncadd (%p8053_p12), %s1708_s24, 4294967264  ;;  %s1718_s19 = scalar_lea.vmem [#allocation45], %s7215_s12  ;;  %s1724_s13 = scalar_lea.sflag [#allocation47], %s7196_s20 }
 0x3c4   : > { %s1726_s8 = scalar_lea.vmem [#allocation46], %s7215_s12 }
 0x3c5   : > { %5987 = dma.done.wait (%p8053_p12), %s1724_s13, 16  }
 0x3c6   : > { %5989 = vsyncadd (%p8053_p12), %s1724_s13, 4294967280  ;;  %p8054_p10 = scmp.eq.s32.totalorder %s6336_s10, 0 }
 0x3c8   : > { %5991 = dma.done.wait (%p8054_p10), [#allocation47], 16   ;;  %p8055_p4 = pmov %p8054_p10 }
 0x3ca   : > { %5993 = vsyncadd (%p8055_p4), [#allocation47], 4294967280  ;;  %p8056_p5 = pmov %p8055_p4 }
 0x3cb   : > { %p8057_p9 = pmov %p8055_p4 }
 0x3cc   : > { %5995 = dma.done.wait (%p8056_p5), [#allocation50], 16  }
 0x3cd   : > { %5997 = vsyncadd (%p8057_p9), [#allocation50], 4294967280  ;;  %v7335_v0 = vld [vmem:[%s7221_s11] sm:$0xf]  ;;  %v7338_v1 = vld [vmem:[%s7221_s11 + $0x4] sm:$0xf] }
 0x3ce   : > { %v7341_v2 = vld [vmem:[%s7221_s11 + $0x8] sm:$0xf]  ;;  %v7344_v3 = vld [vmem:[%s7221_s11 + $0xc] sm:$0xf]  ;;  %s8058_s10 = scalar_lea.vmem [#allocation13], %s7215_s12  ;;  %s8059_s24 = scalar_lea.vmem [#allocation16], %s7215_s12 }
 0x3cf   : > { %v7348_v4 = vld [vmem:[%s8058_s10] ss:$0 sm:$0xff]  ;;  %v7351_v5 = vld [vmem:[%s7234_s30] sm:$0xf]  ;;  %v7357_v7 = vld [vmem:[%s7234_s30 + $0x8] sm:$0xf] }
 0x3d0   : > { %v7354_v6 = vld [vmem:[%s7234_s30 + $0x4] sm:$0xf]  ;;  %v7360_v8 = vld [vmem:[%s7234_s30 + $0xc] sm:$0xf]  ;;  %s8060_s13 = scalar_lea.vmem [#allocation19], %s7215_s12  ;;  %s8061_s20 = scalar_lea.vmem [#allocation22], %s7215_s12 }
 0x3d1   : > { %v7364_v9 = vld [vmem:[%s8059_s24] ss:$0 sm:$0xff]  ;;  %v7367_v10 = vld [vmem:[%s7243_s0] sm:$0xf]  ;;  %v7373_v12 = vld [vmem:[%s7243_s0 + $0x8] sm:$0xf] }
 0x3d2   : > { %v7370_v11 = vld [vmem:[%s7243_s0 + $0x4] sm:$0xf]  ;;  %v7376_v13 = vld [vmem:[%s7243_s0 + $0xc] sm:$0xf]  ;;  %v7402_v21 = vld [vmem:[%s7261_s28 + $0x4] sm:$0xf] }
 0x3d3   : > { %v7380_v14 = vld [vmem:[%s8060_s13] ss:$0 sm:$0xff]  ;;  %v7386_v16 = vld [vmem:[%s7252_s3 + $0x4] sm:$0xf]  ;;  %v7389_v17 = vld [vmem:[%s7252_s3 + $0x8] sm:$0xf] }
 0x3d4   : > { %v7383_v15 = vld [vmem:[%s7252_s3] sm:$0xf]  ;;  %v7392_v18 = vld [vmem:[%s7252_s3 + $0xc] sm:$0xf]  ;;  %s8062_s23 = scalar_lea.vmem [#allocation25], %s7215_s12  ;;  %s8063_s3 = scalar_lea.vmem [#allocation28], %s7215_s12 }
 0x3d5   : > { %v7396_v19 = vld [vmem:[%s8061_s20] ss:$0 sm:$0xff]  ;;  %v7405_v22 = vld [vmem:[%s7261_s28 + $0x8] sm:$0xf]  ;;  %v7408_v23 = vld [vmem:[%s7261_s28 + $0xc] sm:$0xf] }
 0x3d6   : > { %v7399_v20 = vld [vmem:[%s7261_s28] sm:$0xf]  ;;  %v7418_v26 = vld [vmem:[%s7270_s21 + $0x4] sm:$0xf]  ;;  %v7421_v27 = vld [vmem:[%s7270_s21 + $0x8] sm:$0xf] }
 0x3d7   : > { %v7412_v24 = vld [vmem:[%s8062_s23] ss:$0 sm:$0xff]  ;;  %v7415_v25 = vld [vmem:[%s7270_s21] sm:$0xf]  ;;  %v7434_v31 = vld [vmem:[%s7279_s5 + $0x4] sm:$0xf] }
 0x3d8   : > { %v7424_v28 = vld [vmem:[%s7270_s21 + $0xc] sm:$0xf]  ;;  %v7431_v30 = vld [vmem:[%s7279_s5] sm:$0xf]  ;;  %s8064_s28 = scalar_lea.vmem [#allocation31], %s7215_s12  ;;  %s8065_s11 = scalar_lea.vmem [#allocation34], %s7215_s12 }
 0x3d9   : > { %v7428_v29 = vld [vmem:[%s8063_s3] ss:$0 sm:$0xff]  ;;  %v7437_v32 = vld [vmem:[%s7279_s5 + $0x8] sm:$0xf]  ;;  %v7447_v35 = vld [vmem:[%s7288_s6] sm:$0xf] }
 0x3da   : > { %v7440_v33 = vld [vmem:[%s7279_s5 + $0xc] sm:$0xf]  ;;  %v7450_v36 = vld [vmem:[%s7288_s6 + $0x4] sm:$0xf]  ;;  %v7472_v43 = vld [vmem:[%s7297_s14 + $0xc] sm:$0xf] }
 0x3db   : > { %v7444_v34 = vld [vmem:[%s8064_s28] ss:$0 sm:$0xff]  ;;  %v7456_v38 = vld [vmem:[%s7288_s6 + $0xc] sm:$0xf]  ;;  %v7463_v40 = vld [vmem:[%s7297_s14] sm:$0xf] }
 0x3dc   : > { %v7453_v37 = vld [vmem:[%s7288_s6 + $0x8] sm:$0xf]  ;;  %v7475_v44 = vld [vmem:[%s7297_s14 + $0x10] sm:$0xf]  ;;  %v7484_v47 = vld [vmem:[%s7297_s14 + $0x1c] sm:$0xf] }
 0x3dd   : > { %v7460_v39 = vld [vmem:[%s8065_s11] ss:$0 sm:$0xff]  ;;  %v7466_v41 = vld [vmem:[%s7297_s14 + $0x4] sm:$0xf]  ;;  %v7469_v42 = vld [vmem:[%s7297_s14 + $0x8] sm:$0xf] }
 0x3de   : > { %v7478_v45 = vld [vmem:[%s7297_s14 + $0x14] sm:$0xf]  ;;  %v7481_v46 = vld [vmem:[%s7297_s14 + $0x18] sm:$0xf]  ;;  %s8066_s5 = scalar_lea.vmem [#allocation37], %s7215_s12  ;;  %s8068_s6 = scalar_lea.vmem [#allocation39], %s7215_s12 }
 0x3df   : > { %v7488_v48 = vld [vmem:[%s8066_s5] ss:$0 sm:$0xff]  ;;  %s8069_s21 = scalar_lea.vmem [#allocation40], %s7215_s12  ;;  %s1930_s14 = scalar_lea.vmem [#allocation51], %s7187_s17 }
 0x3e0   : > { %8067 = vst [vmem:[#allocation114_spill] sm:$0xff] %v7488_v48  ;;  %v7492_v49 = vld [vmem:[%s8068_s6] ss:$0 sm:$0xff]  ;;  %s8072_s30 = sld [smem:[#allocation104_spill]] }
 0x3e1   : > { %v7496_v50 = vld [vmem:[%s8069_s21] ss:$0 sm:$0xff] }
 0x3e2   : > { %v7500_v51 = vld [vmem:[%s1702_s9] ss:$0 sm:$0xff] }
 0x3e3   : > { %v7504_v52 = vld [vmem:[%s1710_s25] ss:$0 sm:$0xff] }
 0x3e4   : > { %v7508_v53 = vld [vmem:[%s1718_s19] ss:$0 sm:$0xff] }
 0x3e5   : > { %8070 = vst [vmem:[#allocation115_spill] sm:$0xff] %v7508_v53  ;;  %v7512_v54 = vld [vmem:[%s1726_s8] ss:$0 sm:$0xff] }
 0x3e6   : > { %8071 = vst [vmem:[#allocation116_spill] sm:$0xff] %v7512_v54  ;;  %p4417_p2 = scmp.ne.s32.totalorder %s8072_s30, 0 }
 0x3e7   : > { %s8073_s0 = scalar_lea.vmem (!%p4417_p2), [#allocation4], %s7187_s17  ;;  %vm1992_vm0 = vcmask (!%p4417_p2), 261120   ;;  %v1994_v56 = vld [vmem:[%s7200_s7] sm:$0xff] (!%p4417_p2)  ;;  %v1995_v59 = vld [vmem:[%s7200_s7 + $0x8] sm:$0xff] (!%p4417_p2) }
 0x3e8   : > { %1990 = sbr.rel (%p4417_p2) target bundleno = 1007 (0x3ef), region = 264  ;;  %v1991_v55 = vld [vmem:[%s8073_s0] sm:$0xff] (!%p4417_p2)  ;;  %v1996_v57 = vld [vmem:[%s7206_s18] sm:$0xff] (!%p4417_p2) }
 0x3e9   : > { %1993 = vst.msk [vmem:[#allocation2] sm:$0xff] (!%p4417_p2), %vm1992_vm0, %v1991_v55  ;;  %v1998_v58 = vadd.f32 (!%p4417_p2), %v1996_v57, %v1994_v56  ;;  %v1997_v60 = vld [vmem:[%s7206_s18 + $0x8] sm:$0xff] (!%p4417_p2) }
 0x3ea   : > { %v1999_v61 = vadd.f32 (!%p4417_p2), %v1997_v60, %v1995_v59 }
 0x3eb   : > { %2000 = vst.msk [vmem:[#allocation3] sm:$0xff] (!%p4417_p2), %vm1992_vm0, %v1998_v58 }
 0x3ec   : > { %2001 = vst.msk [vmem:[#allocation3 + $0x8] sm:$0xff] (!%p4417_p2), %vm1992_vm0, %v1999_v61 }
 0x3ef PF: > { %v4419_v62 = vcombine.low %v7335_v0, %v7338_v1  ;;  %s8074_s25 = scalar_lea.vmem [#allocation10], %s7187_s17  ;;  %v7936_v53 = vmov 0.0   ;;  %vm6111_vm1 = vmmov 0   ;;  %v4420_v56 = vcombine.low %v7341_v2, %v7344_v3  ;;  %s6112_s18 = smov 104  }
 0x3f0   : > { %v7524_v63 = vld [vmem:[#allocation2] sm:$0xff]  ;;  %v7528_v54 = vld [vmem:[%s8074_s25] sm:$0xff]  ;;  %4557 = vmatprep.subr.bf16.mxu1 %v7936_v53  ;;  %4561 = vmatprep.mubr.msk.bf16.mxu1 %vm6111_vm1, %v7936_v53  ;;  %vm2028_vm2 = vcmask 261120   ;;  %v4423_v58 = vcombine.low %v7351_v5, %v7354_v6  ;;  %s6113_s12 = smov 120   ;;  %v4424_v60 = vcombine.low %v7357_v7, %v7360_v8  ;;  %s6114_s8 = smov 112   ;;  %vm2165_vm3 = vcmask 64512  }
 0x3f1   : > { %v2008_v55 = vadd.f32 %v7528_v54, %v7524_v63  ;;  %4558 = vmatpush3.bf16.msra.mxu1 %v4419_v62  ;;  %4573 = vmatprep.subr.bf16.mxu0 %v7936_v53  ;;  %s6115_s26 = smov 96   ;;  %vm2410_vm4 = vcmask 1043456   ;;  %s6116_s9 = smov 8   ;;  %vm2605_vm5 = vcmask 130048   ;;  %vm2607_vm6 = vcmask 195584  }
 0x3f2   : > { %4559 = vmatprep.subr.bf16.mxu1 %v7936_v53  ;;  %4575 = vmatprep.mubr.msk.bf16.mxu0 %vm6111_vm1, %v7936_v53  ;;  %s6117_s19 = smov 16   ;;  %s6118_s10 = smov 24   ;;  %vm3554_vm7 = vcmask 523264  }
 0x3f3   : > { %v2009_v0 = vpack.c.bf16 %v2008_v55, %v2008_v55 }
 0x3f5   : > { %4560 = vmatpush3.bf16.msra.mxu1 %v4420_v56 }
 0x3f6   : > { %4565 = vmatprep.subr.bf16.mxu1 %v7936_v53 }
 0x3f8   : > { %4562 = vmatmul.mubr.msk.bf16.vlgmr.msra.gmra.mrb[0].mxu1 %vm2028_vm2, %v2009_v0 }
 0x3f9   : > { %4569 = vmatprep.mubr.msk.bf16.mxu1 %vm6111_vm1, %v7936_v53  ;;  %4566 = vmatpush3.bf16.msra.mxu1 %v4423_v58 }
 0x3fa   : > { %4567 = vmatprep.subr.bf16.mxu1 %v7936_v53 }
 0x3fd   : > { %4568 = vmatpush3.bf16.msra.mxu1 %v4424_v60 }
 0x3fe   : > { %4579 = vmatprep.subr.bf16.mxu1 %v7936_v53 }
 0x4cb   : > { %v2066_v1 = vpop.f32.mrb[0].mxu1 }
 0x4cc   : > { %v2067_v2 = vadd.f32 %v7348_v4, %v2066_v1  ;;  %v4563_v3 = vpop.f32.mrb[1].mxu1  ;;  %v2072_v4 = vpack.c.bf16 %v7524_v63, %v7524_v63 }
 0x4cd   : > { %v2069_v57 = vpop.f32.mrb[2].mxu1 }
 0x4ce   : > { %2141 = vrot.lane.b32.xlu1 %v2067_v2, %s6112_s18  ;;  %2135 = vrot.lane.b32.xlu0 %v2067_v2, %s6113_s12  ;;  %v4564_v59 = vpop.f32.mrb[3].mxu1  ;;  %v2144_v61 = vpack.c.bf16 %v2067_v2, %v2067_v2 }
 0x4cf   : > { %4570 = vmatmul.mubr.msk.bf16.vlgmr.msra.gmra.mrb[4].mxu1 %vm2028_vm2, %v2072_v4 }
 0x4d0   : > { %4581 = vmatprep.mubr.msk.bf16.mxu1 %vm6111_vm1, %v7936_v53 }
 0x4d2   : > { %2138 = vrot.lane.b32.xlu0 %v2067_v2, %s6114_s8  ;;  %2163 = vrot.lane.b32.xlu1 %v2144_v61, %s6115_s26 }
 0x540   : > { %v2142_v5 = vpop.permute.xlu1 %2141  ;;  %v2136_v6 = vpop.permute.xlu0 %2135 }
 0x541   : > { %v2145_v7 = vpack.c.bf16 %v2136_v6, %v2136_v6  ;;  %v2147_v55 = vpack.c.bf16 %v2142_v5, %v2142_v5 }
 0x543   : > { %2213 = vrot.lane.b32.xlu0 %v2145_v7, %s6115_s26 }
 0x544   : > { %v2139_v8 = vpop.permute.xlu0 %2138  ;;  %v2164_v62 = vpop.permute.xlu1 %2163 }
 0x545   : > { %v2146_v56 = vpack.c.bf16 %v2139_v8, %v2139_v8  ;;  %v2170_v0 = vsel %vm2165_vm3, %v2164_v62, 0 }
 0x546   : > { %4574 = vmatpush3.bf16.xpose.msra.mxu0 %v2170_v0 }
 0x547   : > { %2311 = vrot.lane.b32.xlu0 %v2147_v55, %s6115_s26  ;;  %2262 = vrot.lane.b32.xlu1 %v2146_v56, %s6115_s26 }
 0x548   : > { %4585 = vmatprep.subr.bf16.mxu0 %v7936_v53 }
 0x54d   : > { %4576 = vmatmul.mubr.msk.bf16.vlgmr.msra.gmra.mrb[0].mxu0 %vm2165_vm3, %v2144_v61 }
 0x54e   : > { %4587 = vmatprep.mubr.msk.bf16.mxu0 %vm6111_vm1, %v7936_v53 }
 0x5a2   : > { %v2128_v1 = vpop.f32.mrb[4].mxu1 }
 0x5a3   : > { %v4571_v2 = vpop.f32.mrb[5].mxu1  ;;  %v7568_v60 = vadd.f32 %v7364_v9, %v2128_v1 }
 0x5a4   : > { %v2131_v3 = vpop.f32.mrb[6].mxu1 }
 0x5a5   : > { %v4572_v57 = vpop.f32.mrb[7].mxu1  ;;  %v2158_v6 = vpack.c.bf16 %v7568_v60, %v7568_v60 }
 0x5a7   : > { %v2412_v9 = vsel %vm2410_vm4, %v2158_v6, 0 }
 0x5b5   : > { %v2214_v58 = vpop.permute.xlu0 %2213 }
 0x5b6   : > { %v2219_v59 = vsel %vm2165_vm3, %v2214_v58, 0 }
 0x5b7   : > { %4580 = vmatpush3.bf16.xpose.msra.mxu1 %v2219_v59 }
 0x5b8   : > { %4591 = vmatprep.subr.bf16.mxu1 %v7936_v53 }
 0x5b9   : > { %v2263_v4 = vpop.permute.xlu1 %2262  ;;  %v2312_v61 = vpop.permute.xlu0 %2311 }
 0x5ba   : > { %v2268_v5 = vsel %vm2165_vm3, %v2263_v4, 0  ;;  %v2317_v8 = vsel %vm2165_vm3, %v2312_v61, 0 }
 0x5bb   : > { %4586 = vmatpush3.bf16.xpose.msra.mxu0 %v2268_v5 }
 0x5bc   : > { %4597 = vmatprep.subr.bf16.mxu0 %v7936_v53 }
 0x5be   : > { %4582 = vmatmul.mubr.msk.bf16.vlgmr.msra.gmra.mrb[8].mxu1 %vm2165_vm3, %v2145_v7 }
 0x5bf   : > { %4592 = vmatpush3.bf16.xpose.msra.mxu1 %v2317_v8  ;;  %4593 = vmatprep.mubr.msk.bf16.mxu1 %vm6111_vm1, %v7936_v53 }
 0x5c0   : > { %4603 = vmatprep.subr.bf16.mxu1 %v7936_v53 }
 0x5c2   : > { %4588 = vmatmul.mubr.msk.bf16.vlgmr.msra.gmra.mrb[4].mxu0 %vm2165_vm3, %v2146_v56 }
 0x5c3   : > { %4598 = vmatpush3.bf16.msra.mxu0 %v2412_v9  ;;  %4599 = vmatprep.mubr.msk.bf16.mxu0 %vm6111_vm1, %v7936_v53 }
 0x5c4   : > { %4609 = vmatprep.subr.bf16.mxu0 %v7936_v53 }
 0x5c6   : > { %4594 = vmatmul.mubr.msk.bf16.vlgmr.msra.gmra.mrb[12].mxu1 %vm2165_vm3, %v2147_v55 }
 0x5c7   : > { %4605 = vmatprep.mubr.msk.bf16.mxu1 %vm6111_vm1, %v7936_v53 }
 0x620   : > { %v2206_v7 = vpop.f32.mrb[0].mxu0 }
 0x621   : > { %v4577_v62 = vpop.f32.mrb[1].mxu0  ;;  %v2359_v0 = vsel %vm2165_vm3, %v2206_v7, -inf }
 0x622   : > { %2360 = vmax.xlane.f32.xlu1 %v2359_v0  ;;  %v2209_v1 = vpop.f32.mrb[2].mxu0 }
 0x623   : > { %v4578_v2 = vpop.f32.mrb[3].mxu0 }
 0x691   : > { %v2255_v3 = vpop.f32.mrb[8].mxu1 }
 0x692   : > { %v4583_v56 = vpop.f32.mrb[9].mxu1  ;;  %v2362_v57 = vsel %vm2165_vm3, %v2255_v3, -inf }
 0x693   : > { %2363 = vmax.xlane.f32.xlu0 %v2362_v57  ;;  %v2258_v58 = vpop.f32.mrb[10].mxu1 }
 0x694   : > { %v4584_v59 = vpop.f32.mrb[11].mxu1 }
 0x695   : > { %v2304_v4 = vpop.f32.mrb[4].mxu0 }
 0x696   : > { %v4589_v5 = vpop.f32.mrb[5].mxu0  ;;  %v2365_v55 = vsel %vm2165_vm3, %v2304_v4, -inf }
 0x697   : > { %v2307_v61 = vpop.f32.mrb[6].mxu0  ;;  %2366 = vmax.xlane.f32.xlu0 %v2365_v55 }
 0x698   : > { %v4590_v6 = vpop.f32.mrb[7].mxu0 }
 0x699   : > { %v2353_v8 = vpop.f32.mrb[12].mxu1 }
 0x69a   : > { %v4595_v9 = vpop.f32.mrb[13].mxu1  ;;  %v2368_v62 = vsel %vm2165_vm3, %v2353_v8, -inf }
 0x69b   : > { %2369 = vmax.xlane.f32.xlu1 %v2368_v62  ;;  %v2356_v0 = vpop.f32.mrb[14].mxu1 }
 0x69c   : > { %v4596_v1 = vpop.f32.mrb[15].mxu1 }
 0x6af   : > { %v2361_v2 = vpop.xlane.xlu1 %2360 }
 0x6b0   : > { %v2371_v56 = vsub.f32 %v2206_v7, %v2361_v2 }
 0x6b2   : > { %v2375_v53 = vmul.f32 1.442695, %v2371_v56 }
 0x6b4   : > { %4974 = vpow2.f32 %v2375_v53 }
 0x6be   : > { %v4975_v57 = vpop.eup %4974 }
 0x6bf   : > { %v2383_v58 = vsel %vm2165_vm3, %v4975_v57, 0.0 }
 0x6c0   : > { %2384 = vadd.xlane.f32.xlu0 %v2383_v58 }
 0x720   : > { %v2364_v59 = vpop.xlane.xlu0 %2363 }
 0x721   : > { %v2372_v5 = vsub.f32 %v2255_v3, %v2364_v59  ;;  %v8075_v59 = vmov 0.0  }
 0x723   : > { %v2377_v61 = vmul.f32 1.442695, %v2372_v5 }
 0x724   : > { %v2367_v55 = vpop.xlane.xlu0 %2366 }
 0x725   : > { %4976 = vpow2.f32 %v2377_v61  ;;  %v2373_v6 = vsub.f32 %v2304_v4, %v2367_v55 }
 0x727   : > { %v2379_v9 = vmul.f32 1.442695, %v2373_v6 }
 0x728   : > { %v2370_v53 = vpop.xlane.xlu1 %2369 }
 0x729   : > { %4978 = vpow2.f32 %v2379_v9  ;;  %v2374_v4 = vsub.f32 %v2353_v8, %v2370_v53 }
 0x72b   : > { %v2381_v1 = vmul.f32 1.442695, %v2374_v4 }
 0x72f   : > { %v4977_v48 = vpop.eup %4976 }
 0x730   : > { %v2386_v62 = vsel %vm2165_vm3, %v4977_v48, 0.0 }
 0x731   : > { %2387 = vadd.xlane.f32.xlu1 %v2386_v62 }
 0x733   : > { %v4979_v0 = vpop.eup %4978 }
 0x734   : > { %v2389_v7 = vsel %vm2165_vm3, %v4979_v0, 0.0 }
 0x735   : > { %2390 = vadd.xlane.f32.xlu0 %v2389_v7 }
 0x742   : > { %2152 = vrot.lane.b32.xlu1 %v7568_v60, %s6114_s8 }
 0x74b   : > { %2149 = vrot.lane.b32.xlu0 %v7568_v60, %s6113_s12 }
 0x74d   : > { %v2385_v3 = vpop.xlane.xlu0 %2384 }
 0x74e   : > { %4980 = vrcp.f32 %v2385_v3 }
 0x74f   : > { %4982 = vpow2.f32 %v2381_v1 }
 0x758   : > { %v4981_v2 = vpop.eup %4980 }
 0x759   : > { %v2399_v56 = vmul.f32 %v4981_v2, %v4975_v57  ;;  %v4983_v5 = vpop.eup %4982 }
 0x75a   : > { %v2392_v61 = vsel %vm2165_vm3, %v4983_v5, 0.0 }
 0x75b   : > { %v2403_v58 = vpack.c.bf16 %v2399_v56, %v2399_v56 }
 0x75d   : > { %4600 = vmatmul.mubr.msk.bf16.vlgmr.msra.gmra.mrb[8].mxu0 %vm2165_vm3, %v2403_v58 }
 0x75e   : > { %4611 = vmatprep.mubr.msk.bf16.mxu0 %vm6111_vm1, %v8075_v59 }
 0x766   : > { %2393 = vadd.xlane.f32.xlu1 %v2392_v61 }
 0x777   : > { %2155 = vrot.lane.b32.xlu1 %v7568_v60, %s6112_s18 }
 0x7be   : > { %v2388_v55 = vpop.xlane.xlu1 %2387 }
 0x7bf   : > { %4984 = vrcp.f32 %v2388_v55 }
 0x7c2   : > { %v2391_v8 = vpop.xlane.xlu0 %2390  ;;  %v2153_v6 = vpop.permute.xlu1 %2152 }
 0x7c3   : > { %4986 = vrcp.f32 %v2391_v8  ;;  %v2160_v9 = vpack.c.bf16 %v2153_v6, %v2153_v6 }
 0x7c5   : > { %v2504_v57 = vsel %vm2410_vm4, %v2160_v9, 0 }
 0x7c6   : > { %v2150_v62 = vpop.permute.xlu0 %2149  ;;  %4610 = vmatpush3.bf16.msra.mxu0 %v2504_v57 }
 0x7c7   : > { %v2159_v7 = vpack.c.bf16 %v2150_v62, %v2150_v62  ;;  %4621 = vmatprep.subr.bf16.mxu0 %v8075_v59 }
 0x7c9   : > { %v4985_v53 = vpop.eup %4984  ;;  %v2458_v3 = vsel %vm2410_vm4, %v2159_v7, 0 }
 0x7ca   : > { %v2400_v4 = vmul.f32 %v4985_v53, %v4977_v48  ;;  %4604 = vmatpush3.bf16.msra.mxu1 %v2458_v3  ;;  %v4435_v53 = vcombine.low %v7367_v10, %v7370_v11  ;;  %v4436_v10 = vcombine.low %v7373_v12, %v7376_v13 }
 0x7cb   : > { %4615 = vmatprep.subr.bf16.mxu1 %v8075_v59 }
 0x7cc   : > { %v2404_v60 = vpack.c.bf16 %v2400_v4, %v2400_v4 }
 0x7cd   : > { %v4987_v1 = vpop.eup %4986 }
 0x7ce   : > { %v2401_v2 = vmul.f32 %v4987_v1, %v4979_v0  ;;  %4606 = vmatmul.mubr.msk.bf16.vlgmr.msra.gmra.mrb[16].mxu1 %vm2165_vm3, %v2404_v60 }
 0x7cf   : > { %4617 = vmatprep.mubr.msk.bf16.mxu1 %vm6111_vm1, %v8075_v59 }
 0x7d0   : > { %v2405_v56 = vpack.c.bf16 %v2401_v2, %v2401_v2 }
 0x7d2   : > { %4612 = vmatmul.mubr.msk.bf16.vlgmr.msra.gmra.mrb[12].mxu0 %vm2165_vm3, %v2405_v56 }
 0x7d3   : > { %4625 = vmatprep.mubr.msk.bf16.mxu0 %vm6111_vm1, %v8075_v59  ;;  %4622 = vmatpush3.bf16.msra.mxu0 %v4435_v53 }
 0x7d4   : > { %4623 = vmatprep.subr.bf16.mxu0 %v8075_v59 }
 0x7d7   : > { %4624 = vmatpush3.bf16.msra.mxu0 %v4436_v10 }
 0x7d8   : > { %4637 = vmatprep.subr.bf16.mxu0 %v8075_v59 }
 0x7f3   : > { %v2394_v58 = vpop.xlane.xlu1 %2393 }
 0x7f4   : > { %4988 = vrcp.f32 %v2394_v58 }
 0x7f7   : > { %v2156_v48 = vpop.permute.xlu1 %2155 }
 0x7f8   : > { %v2161_v61 = vpack.c.bf16 %v2156_v48, %v2156_v48 }
 0x7fa   : > { %v2550_v55 = vsel %vm2410_vm4, %v2161_v61, 0 }
 0x7fb   : > { %4616 = vmatpush3.bf16.msra.mxu1 %v2550_v55 }
 0x7fc   : > { %4629 = vmatprep.subr.bf16.mxu1 %v8075_v59 }
 0x7fe   : > { %v4989_v0 = vpop.eup %4988 }
 0x7ff   : > { %v2402_v8 = vmul.f32 %v4989_v0, %v4983_v5 }
 0x801   : > { %v2406_v6 = vpack.c.bf16 %v2402_v8, %v2402_v8 }
 0x803   : > { %4618 = vmatmul.mubr.msk.bf16.vlgmr.msra.gmra.mrb[20].mxu1 %vm2165_vm3, %v2406_v6 }
 0x804   : > { %4633 = vmatprep.mubr.msk.bf16.mxu1 %vm6111_vm1, %v8075_v59 }
 0x830   : > { %v2448_v9 = vpop.f32.mrb[8].mxu0 }
 0x831   : > { %v4601_v57 = vpop.f32.mrb[9].mxu0 }
 0x832   : > { %v2451_v62 = vpop.f32.mrb[10].mxu0 }
 0x833   : > { %v4602_v7 = vpop.f32.mrb[11].mxu0 }
 0x8a1   : > { %v2494_v3 = vpop.f32.mrb[16].mxu1 }
 0x8a2   : > { %2593 = vrot.lane.b32.xlu0 %v2494_v3, %s6116_s9  ;;  %v4607_v5 = vpop.f32.mrb[17].mxu1 }
 0x8a3   : > { %v2497_v4 = vpop.f32.mrb[18].mxu1 }
 0x8a4   : > { %v4608_v60 = vpop.f32.mrb[19].mxu1 }
 0x8a5   : > { %v2540_v1 = vpop.f32.mrb[12].mxu0 }
 0x8a6   : > { %2597 = vrot.lane.b32.xlu1 %v2540_v1, %s6117_s19  ;;  %v4613_v2 = vpop.f32.mrb[13].mxu0  ;;  %v4445_v1 = vcombine.low %v7399_v20, %v7402_v21  ;;  %v4441_v20 = vcombine.low %v7383_v15, %v7386_v16  ;;  %v4442_v21 = vcombine.low %v7389_v17, %v7392_v18 }
 0x8a7   : > { %v2543_v56 = vpop.f32.mrb[14].mxu0 }
 0x8a8   : > { %v4614_v58 = vpop.f32.mrb[15].mxu0  ;;  %4630 = vmatpush3.bf16.msra.mxu1 %v4441_v20 }
 0x8a9   : > { %4631 = vmatprep.subr.bf16.mxu1 %v8075_v59 }
 0x8ac   : > { %4632 = vmatpush3.bf16.msra.mxu1 %v4442_v21 }
 0x8ad   : > { %4645 = vmatprep.subr.bf16.mxu1 %v8075_v59 }
 0x8d6   : > { %v2586_v11 = vpop.f32.mrb[20].mxu1 }
 0x8d7   : > { %2601 = vrot.lane.b32.xlu0 %v2586_v11, %s6118_s10  ;;  %v4619_v48 = vpop.f32.mrb[21].mxu1  ;;  %v4446_v11 = vcombine.low %v7405_v22, %v7408_v23 }
 0x8d8   : > { %v2589_v61 = vpop.f32.mrb[22].mxu1  ;;  %v2006_v48 = vld [vmem:[#allocation3 + $0x8] sm:$0xff] }
 0x8d9   : > { %v4620_v55 = vpop.f32.mrb[23].mxu1 }
 0x914   : > { %v2594_v0 = vpop.permute.xlu0 %2593 }
 0x915   : > { %v2604_v6 = vsel %vm2165_vm3, %v2448_v9, %v2594_v0 }
 0x918   : > { %v2598_v8 = vpop.permute.xlu1 %2597 }
 0x919   : > { %v2606_v57 = vsel %vm2605_vm5, %v2604_v6, %v2598_v8 }
 0x949   : > { %v2602_v62 = vpop.permute.xlu0 %2601 }
 0x94a   : > { %v2608_v12 = vsel %vm2607_vm6, %v2606_v57, %v2602_v62 }
 0x94b   : > { %v2609_v13 = vpack.c.bf16 %v2608_v12, %v2608_v12 }
 0x94d   : > { %4626 = vmatmul.mubr.msk.bf16.vlgmr.msra.gmra.mrb[16].mxu0 %vm2028_vm2, %v2609_v13 }
 0x94e   : > { %4641 = vmatprep.mubr.msk.bf16.mxu0 %vm6111_vm1, %v8075_v59  ;;  %4638 = vmatpush3.bf16.msra.mxu0 %v4445_v1 }
 0x94f   : > { %4639 = vmatprep.subr.bf16.mxu0 %v8075_v59 }
 0x952   : > { %4640 = vmatpush3.bf16.msra.mxu0 %v4446_v11 }
 0x953   : > { %4653 = vmatprep.subr.bf16.mxu0 %v8075_v59 }
 0xa20   : > { %v2665_v7 = vpop.f32.mrb[16].mxu0 }
 0xa21   : > { %v2666_v53 = vadd.f32 %v7380_v14, %v2665_v7  ;;  %v4627_v3 = vpop.f32.mrb[17].mxu0 }
 0xa22   : > { %v2668_v5 = vpop.f32.mrb[18].mxu0  ;;  %v2003_v3 = vld [vmem:[%s7200_s7] sm:$0xff] }
 0xa23   : > { %v4628_v4 = vpop.f32.mrb[19].mxu0  ;;  %v2671_v60 = vadd.f32 %v2666_v53, %v7524_v63  ;;  %v2005_v63 = vld [vmem:[#allocation3] sm:$0xff]  ;;  %v4449_v53 = vcombine.low %v7415_v25, %v7418_v26  ;;  %v2004_v5 = vld [vmem:[%s7200_s7 + $0x8] sm:$0xff]  ;;  %s8079_s7 = sld [smem:[#allocation104_spill]] }
 0xa24   : > { %v2763_v61 = vpack.c.bf16 %v2006_v48, %v2005_v63  ;;  %v2826_v4 = vpack.c.bf16 %v2004_v5, %v2003_v3 }
 0xa25   : > { %v2672_v9 = vsel %vm2028_vm2, %v2671_v60, 0.0 }
 0xa26   : > { %2673 = vadd.xlane.f32.xlu1 %v2672_v9  ;;  %4642 = vmatmul.mubr.msk.bf16.vlgmr.msra.gmra.mrb[20].mxu0 %vm2028_vm2, %v2763_v61 }
 0xa27   : > { %4655 = vmatprep.mubr.msk.bf16.mxu0 %vm6111_vm1, %v8075_v59 }
 0xa29   : > { %p4478_p6 = scmp.ne.s32.totalorder %s8079_s7, 1 }
 0xab3   : > { %v2674_v2 = vpop.xlane.xlu1 %2673 }
 0xab4   : > { %v2676_v56 = vmul.f32 0.03125, %v2674_v2 }
 0xab6   : > { %v2677_v58 = vsub.f32 %v2671_v60, %v2676_v56 }
 0xab8   : > { %v2678_v10 = vmul.f32 %v2677_v58, %v2677_v58 }
 0xaba   : > { %v2679_v14 = vsel %vm2028_vm2, %v2678_v10, 0.0 }
 0xabb   : > { %2680 = vadd.xlane.f32.xlu0 %v2679_v14 }
 0xaf9   : > { %v2819_v17 = vpop.f32.mrb[20].mxu0 }
 0xafa   : > { %v2820_v18 = vadd.f32 %v7412_v24, %v2819_v17  ;;  %v4643_v62 = vpop.f32.mrb[21].mxu0 }
 0xafb   : > { %v2822_v12 = vpop.f32.mrb[22].mxu0 }
 0xb48   : > { %v2681_v22 = vpop.xlane.xlu0 %2680 }
 0xb49   : > { %v2682_v23 = vmul.f32 0.03125, %v2681_v22 }
 0xb4b   : > { %v2683_v55 = vadd.f32 1e-05, %v2682_v23 }
 0xb4d   : > { %4990 = vrsqrt.f32 %v2683_v55 }
 0xb57   : > { %v4991_v0 = vpop.eup %4990 }
 0xb58   : > { %v2685_v8 = vmul.f32 %v4991_v0, %v2677_v58 }
 0xb5a   : > { %v2692_v6 = vmul.f32 %v7492_v49, %v2685_v8  ;;  %v2823_v49 = vadd.f32 %v7412_v24, %v2822_v12  ;;  %v4450_v24 = vcombine.low %v7421_v27, %v7424_v28 }
 0xb5c   : > { %v7655_v57 = vadd.f32 %v7496_v50, %v2692_v6  ;;  %v4644_v50 = vpop.f32.mrb[23].mxu0  ;;  %v4944_v13 = vpack.i.bf16 %v2823_v49, %v2820_v18  ;;  %v2923_v7 = vpack.c.bf16 %v2823_v49, %v2820_v18 }
 0xb5e   : > { %v2700_v15 = vadd.f32 %v7655_v57, %v7528_v54  ;;  %4945 = vrot.lane.b32.xlu0 %v4944_v13, %s6113_s12  ;;  %4950 = vrot.lane.b32.xlu1 %v4944_v13, %s6114_s8  ;;  %v2955_v54 = vsel %vm2165_vm3, %v2923_v7, 0 }
 0xb5f   : > { %4654 = vmatpush3.bf16.xpose.msra.mxu0 %v2955_v54 }
 0xb60   : > { %v2701_v16 = vpack.c.bf16 %v2700_v15, %v2700_v15  ;;  %4665 = vmatprep.subr.bf16.mxu0 %v8075_v59 }
 0xb62   : > { %4634 = vmatmul.mubr.msk.bf16.vlgmr.msra.gmra.mrb[24].mxu1 %vm2028_vm2, %v2701_v16  ;;  %4955 = vrot.lane.b32.xlu0 %v4944_v13, %s6112_s18 }
 0xb63   : > { %4649 = vmatprep.mubr.msk.bf16.mxu1 %vm6111_vm1, %v8075_v59  ;;  %4646 = vmatpush3.bf16.msra.mxu1 %v4449_v53 }
 0xb64   : > { %4647 = vmatprep.subr.bf16.mxu1 %v8075_v59 }
 0xb67   : > { %4648 = vmatpush3.bf16.msra.mxu1 %v4450_v24 }
 0xb68   : > { %4659 = vmatprep.subr.bf16.mxu1 %v8075_v59 }
 0xb6a   : > { %4650 = vmatmul.mubr.msk.bf16.vlgmr.msra.gmra.mrb[28].mxu1 %vm2028_vm2, %v2826_v4 }
 0xb6b   : > { %4661 = vmatprep.mubr.msk.bf16.mxu1 %vm6111_vm1, %v8075_v59 }
 0xbd0   : > { %v4946_v60 = vpop.permute.xlu0 %4945  ;;  %v4951_v27 = vpop.permute.xlu1 %4950 }
 0xbd1   : > { %v4948_v9 = vunpack.i.h.bf16 %v4946_v60  ;;  %v4947_v25 = vunpack.i.l.bf16 %v4946_v60  ;;  %v4953_v28 = vunpack.i.h.bf16 %v4951_v27  ;;  %v4952_v2 = vunpack.i.l.bf16 %v4951_v27 }
 0xbd3   : > { %v2924_v26 = vpack.c.bf16 %v4948_v9, %v4947_v25  ;;  %v2925_v56 = vpack.c.bf16 %v4953_v28, %v4952_v2 }
 0xbd4   : > { %v4956_v23 = vpop.permute.xlu0 %4955 }
 0xbd5   : > { %v3001_v1 = vsel %vm2165_vm3, %v2924_v26, 0  ;;  %v3047_v61 = vsel %vm2165_vm3, %v2925_v56, 0  ;;  %v4958_v55 = vunpack.i.h.bf16 %v4956_v23  ;;  %v4957_v0 = vunpack.i.l.bf16 %v4956_v23 }
 0xbd6   : > { %4660 = vmatpush3.bf16.xpose.msra.mxu1 %v3001_v1 }
 0xbd7   : > { %4671 = vmatprep.subr.bf16.mxu1 %v8075_v59  ;;  %v2926_v8 = vpack.c.bf16 %v4958_v55, %v4957_v0 }
 0xbd9   : > { %v3093_v18 = vsel %vm2165_vm3, %v2926_v8, 0 }
 0xc35   : > { %v2757_v58 = vpop.f32.mrb[24].mxu1 }
 0xc36   : > { %v2758_v10 = vadd.f32 %v7396_v19, %v2757_v58  ;;  %v4635_v14 = vpop.f32.mrb[25].mxu1 }
 0xc37   : > { %v2760_v11 = vpop.f32.mrb[26].mxu1 }
 0xc38   : > { %v2899_v63 = vpack.c.bf16 %v2758_v10, %v2758_v10  ;;  %2896 = vrot.lane.b32.xlu0 %v2758_v10, %s6112_s18  ;;  %2890 = vrot.lane.b32.xlu1 %v2758_v10, %s6113_s12  ;;  %v4636_v48 = vpop.f32.mrb[27].mxu1 }
 0xc3a   : > { %4656 = vmatmul.mubr.msk.bf16.vlgmr.msra.gmra.mrb[24].mxu0 %vm2165_vm3, %v2899_v63 }
 0xc3b   : > { %4666 = vmatpush3.bf16.xpose.msra.mxu0 %v3047_v61  ;;  %4667 = vmatprep.mubr.msk.bf16.mxu0 %vm6111_vm1, %v8075_v59 }
 0xc3c   : > { %2893 = vrot.lane.b32.xlu1 %v2758_v10, %s6114_s8  ;;  %4677 = vmatprep.subr.bf16.mxu0 %v8075_v59 }
 0xc3d   : > { %v2882_v19 = vpop.f32.mrb[28].mxu1 }
 0xc3e   : > { %v4651_v20 = vpop.f32.mrb[29].mxu1  ;;  %v7692_v15 = vadd.f32 %v7428_v29, %v2882_v19 }
 0xc3f   : > { %v2885_v21 = vpop.f32.mrb[30].mxu1 }
 0xc40   : > { %v4652_v22 = vpop.f32.mrb[31].mxu1  ;;  %v7695_v16 = vadd.f32 %v7428_v29, %v2885_v21 }
 0xc42   : > { %v2947_v12 = vpack.c.bf16 %v7695_v16, %v7692_v15 }
 0xcaa   : > { %v2891_v6 = vpop.permute.xlu1 %2890  ;;  %v2897_v50 = vpop.permute.xlu0 %2896 }
 0xcab   : > { %v2900_v17 = vpack.c.bf16 %v2891_v6, %v2891_v6  ;;  %v2902_v29 = vpack.c.bf16 %v2897_v50, %v2897_v50 }
 0xcad   : > { %4662 = vmatmul.mubr.msk.bf16.vlgmr.msra.gmra.mrb[32].mxu1 %vm2165_vm3, %v2900_v17 }
 0xcae   : > { %4672 = vmatpush3.bf16.xpose.msra.mxu1 %v3093_v18  ;;  %v2894_v62 = vpop.permute.xlu1 %2893  ;;  %4673 = vmatprep.mubr.msk.bf16.mxu1 %vm6111_vm1, %v8075_v59 }
 0xcaf   : > { %v2901_v49 = vpack.c.bf16 %v2894_v62, %v2894_v62  ;;  %4683 = vmatprep.subr.bf16.mxu1 %v8075_v59  ;;  %v4964_v62 = vpack.i.bf16 %v7695_v16, %v7692_v15 }
 0xcb1   : > { %4668 = vmatmul.mubr.msk.bf16.vlgmr.msra.gmra.mrb[28].mxu0 %vm2165_vm3, %v2901_v49 }
 0xcb2   : > { %4678 = vmatpush3.bf16.msra.mxu0 %v2947_v12  ;;  %4679 = vmatprep.mubr.msk.bf16.mxu0 %vm6111_vm1, %v8075_v59 }
 0xcb3   : > { %4689 = vmatprep.subr.bf16.mxu0 %v8075_v59 }
 0xcb5   : > { %4674 = vmatmul.mubr.msk.bf16.vlgmr.msra.gmra.mrb[36].mxu1 %vm2165_vm3, %v2902_v29 }
 0xcb6   : > { %4685 = vmatprep.mubr.msk.bf16.mxu1 %vm6111_vm1, %v8075_v59 }
 0xd0d   : > { %v2991_v13 = vpop.f32.mrb[24].mxu0 }
 0xd0e   : > { %v4657_v7 = vpop.f32.mrb[25].mxu0  ;;  %v3135_v54 = vsel %vm2605_vm5, %v2991_v13, -inf }
 0xd0f   : > { %3136 = vmax.xlane.f32.xlu1 %v3135_v54  ;;  %v2994_v53 = vpop.f32.mrb[26].mxu0 }
 0xd10   : > { %v4658_v24 = vpop.f32.mrb[27].mxu0 }
 0xd80   : > { %v3037_v3 = vpop.f32.mrb[32].mxu1 }
 0xd81   : > { %v4663_v5 = vpop.f32.mrb[33].mxu1  ;;  %v3138_v4 = vsel %vm2605_vm5, %v3037_v3, -inf }
 0xd82   : > { %3139 = vmax.xlane.f32.xlu0 %v3138_v4  ;;  %v3040_v60 = vpop.f32.mrb[34].mxu1 }
 0xd83   : > { %v4664_v9 = vpop.f32.mrb[35].mxu1 }
 0xd84   : > { %v3083_v25 = vpop.f32.mrb[28].mxu0 }
 0xd85   : > { %v4669_v26 = vpop.f32.mrb[29].mxu0  ;;  %v3141_v1 = vsel %vm2605_vm5, %v3083_v25, -inf }
 0xd86   : > { %v3086_v27 = vpop.f32.mrb[30].mxu0  ;;  %3142 = vmax.xlane.f32.xlu0 %v3141_v1 }
 0xd87   : > { %v4670_v28 = vpop.f32.mrb[31].mxu0 }
 0xd88   : > { %v3129_v2 = vpop.f32.mrb[36].mxu1 }
 0xd89   : > { %v4675_v56 = vpop.f32.mrb[37].mxu1  ;;  %v3144_v58 = vsel %vm2605_vm5, %v3129_v2, -inf }
 0xd8a   : > { %3145 = vmax.xlane.f32.xlu1 %v3144_v58  ;;  %v3132_v10 = vpop.f32.mrb[38].mxu1 }
 0xd8b   : > { %v4676_v14 = vpop.f32.mrb[39].mxu1 }
 0xd9c   : > { %v3137_v11 = vpop.xlane.xlu1 %3136 }
 0xd9d   : > { %v3147_v63 = vsub.f32 %v2991_v13, %v3137_v11 }
 0xd9f   : > { %v3151_v48 = vmul.f32 1.442695, %v3147_v63 }
 0xda1   : > { %4992 = vpow2.f32 %v3151_v48 }
 0xdab   : > { %v4993_v61 = vpop.eup %4992 }
 0xdac   : > { %v3159_v19 = vsel %vm2605_vm5, %v4993_v61, 0.0 }
 0xdad   : > { %3160 = vadd.xlane.f32.xlu0 %v3159_v19 }
 0xe0f   : > { %v3140_v20 = vpop.xlane.xlu0 %3139 }
 0xe10   : > { %v3148_v21 = vsub.f32 %v3037_v3, %v3140_v20 }
 0xe12   : > { %v3153_v22 = vmul.f32 1.442695, %v3148_v21 }
 0xe13   : > { %v3143_v23 = vpop.xlane.xlu0 %3142 }
 0xe14   : > { %4994 = vpow2.f32 %v3153_v22  ;;  %v3149_v55 = vsub.f32 %v3083_v25, %v3143_v23 }
 0xe16   : > { %v3155_v0 = vmul.f32 1.442695, %v3149_v55 }
 0xe17   : > { %v3146_v49 = vpop.xlane.xlu1 %3145 }
 0xe18   : > { %4996 = vpow2.f32 %v3155_v0  ;;  %v3150_v50 = vsub.f32 %v3129_v2, %v3146_v49 }
 0xe1a   : > { %v3157_v29 = vmul.f32 1.442695, %v3150_v50 }
 0xe1e   : > { %v4995_v8 = vpop.eup %4994 }
 0xe1f   : > { %v3162_v6 = vsel %vm2605_vm5, %v4995_v8, 0.0 }
 0xe20   : > { %3163 = vadd.xlane.f32.xlu1 %v3162_v6 }
 0xe22   : > { %v4997_v17 = vpop.eup %4996 }
 0xe23   : > { %v3165_v18 = vsel %vm2605_vm5, %v4997_v17, 0.0 }
 0xe24   : > { %3166 = vadd.xlane.f32.xlu0 %v3165_v18 }
 0xe31   : > { %4965 = vrot.lane.b32.xlu1 %v4964_v62, %s6114_s8 }
 0xe3a   : > { %4960 = vrot.lane.b32.xlu0 %v4964_v62, %s6113_s12  ;;  %v3161_v12 = vpop.xlane.xlu0 %3160 }
 0xe3b   : > { %4998 = vrcp.f32 %v3161_v12 }
 0xe3c   : > { %5000 = vpow2.f32 %v3157_v29 }
 0xe45   : > { %v4999_v13 = vpop.eup %4998 }
 0xe46   : > { %v3175_v7 = vmul.f32 %v4999_v13, %v4993_v61  ;;  %v5001_v53 = vpop.eup %5000  ;;  %v4462_v13 = vcombine.low %v7437_v32, %v7440_v33 }
 0xe47   : > { %v3168_v15 = vsel %vm2605_vm5, %v5001_v53, 0.0 }
 0xe48   : > { %v3179_v54 = vpack.c.bf16 %v3175_v7, %v3175_v7 }
 0xe4a   : > { %4680 = vmatmul.mubr.msk.bf16.vlgmr.msra.gmra.mrb[32].mxu0 %vm2605_vm5, %v3179_v54 }
 0xe4b   : > { %4691 = vmatprep.mubr.msk.bf16.mxu0 %vm6111_vm1, %v8075_v59 }
 0xe55   : > { %3169 = vadd.xlane.f32.xlu1 %v3168_v15 }
 0xe66   : > { %4970 = vrot.lane.b32.xlu1 %v4964_v62, %s6112_s18 }
 0xead   : > { %v3164_v16 = vpop.xlane.xlu1 %3163 }
 0xeae   : > { %5002 = vrcp.f32 %v3164_v16 }
 0xeb1   : > { %v3167_v24 = vpop.xlane.xlu0 %3166  ;;  %v4966_v3 = vpop.permute.xlu1 %4965 }
 0xeb2   : > { %5004 = vrcp.f32 %v3167_v24  ;;  %v4968_v5 = vunpack.i.h.bf16 %v4966_v3  ;;  %v4967_v4 = vunpack.i.l.bf16 %v4966_v3 }
 0xeb4   : > { %v2949_v60 = vpack.c.bf16 %v4968_v5, %v4967_v4 }
 0xeb5   : > { %v4961_v9 = vpop.permute.xlu0 %4960 }
 0xeb6   : > { %v4963_v25 = vunpack.i.h.bf16 %v4961_v9  ;;  %v4962_v26 = vunpack.i.l.bf16 %v4961_v9  ;;  %4690 = vmatpush3.bf16.msra.mxu0 %v2949_v60 }
 0xeb7   : > { %4701 = vmatprep.subr.bf16.mxu0 %v8075_v59 }
 0xeb8   : > { %v5003_v1 = vpop.eup %5002  ;;  %v2948_v27 = vpack.c.bf16 %v4963_v25, %v4962_v26 }
 0xeb9   : > { %v3176_v28 = vmul.f32 %v5003_v1, %v4995_v8  ;;  %v4461_v8 = vcombine.low %v7431_v30, %v7434_v31 }
 0xeba   : > { %4684 = vmatpush3.bf16.msra.mxu1 %v2948_v27 }
 0xebb   : > { %v3180_v2 = vpack.c.bf16 %v3176_v28, %v3176_v28  ;;  %4695 = vmatprep.subr.bf16.mxu1 %v8075_v59 }
 0xebc   : > { %v5005_v56 = vpop.eup %5004 }
 0xebd   : > { %v3177_v58 = vmul.f32 %v5005_v56, %v4997_v17  ;;  %4686 = vmatmul.mubr.msk.bf16.vlgmr.msra.gmra.mrb[40].mxu1 %vm2605_vm5, %v3180_v2 }
 0xebe   : > { %4697 = vmatprep.mubr.msk.bf16.mxu1 %vm6111_vm1, %v8075_v59 }
 0xebf   : > { %v3181_v10 = vpack.c.bf16 %v3177_v58, %v3177_v58 }
 0xec1   : > { %4692 = vmatmul.mubr.msk.bf16.vlgmr.msra.gmra.mrb[36].mxu0 %vm2605_vm5, %v3181_v10  ;;  %v4467_v10 = vcombine.low %v7447_v35, %v7450_v36 }
 0xec2   : > { %4705 = vmatprep.mubr.msk.bf16.mxu0 %vm6111_vm1, %v8075_v59  ;;  %4702 = vmatpush3.bf16.msra.mxu0 %v4461_v8 }
 0xec3   : > { %4703 = vmatprep.subr.bf16.mxu0 %v8075_v59 }
 0xec6   : > { %4704 = vmatpush3.bf16.msra.mxu0 %v4462_v13 }
 0xec7   : > { %4717 = vmatprep.subr.bf16.mxu0 %v8075_v59 }
 0xee2   : > { %v3170_v14 = vpop.xlane.xlu1 %3169 }
 0xee3   : > { %5006 = vrcp.f32 %v3170_v14  ;;  %v4472_v14 = vcombine.low %v7469_v42, %v7472_v43  ;;  %v4474_v42 = vcombine.low %v7481_v46, %v7484_v47 }
 0xee6   : > { %v4971_v11 = vpop.permute.xlu1 %4970 }
 0xee7   : > { %v4973_v63 = vunpack.i.h.bf16 %v4971_v11  ;;  %v4972_v48 = vunpack.i.l.bf16 %v4971_v11 }
 0xee9   : > { %v2950_v61 = vpack.c.bf16 %v4973_v63, %v4972_v48 }
 0xeeb   : > { %4696 = vmatpush3.bf16.msra.mxu1 %v2950_v61 }
 0xeec   : > { %4709 = vmatprep.subr.bf16.mxu1 %v8075_v59 }
 0xeed   : > { %v5007_v19 = vpop.eup %5006 }
 0xeee   : > { %v3178_v20 = vmul.f32 %v5007_v19, %v5001_v53 }
 0xef0   : > { %v3182_v21 = vpack.c.bf16 %v3178_v20, %v3178_v20 }
 0xef2   : > { %4698 = vmatmul.mubr.msk.bf16.vlgmr.msra.gmra.mrb[44].mxu1 %vm2605_vm5, %v3182_v21 }
 0xef3   : > { %4713 = vmatprep.mubr.msk.bf16.mxu1 %vm6111_vm1, %v8075_v59  ;;  %4710 = vmatpush3.bf16.msra.mxu1 %v4467_v10 }
 0xef4   : > { %4711 = vmatprep.subr.bf16.mxu1 %v8075_v59 }
 0xf1d   : > { %v3220_v22 = vpop.f32.mrb[32].mxu0 }
 0xf1e   : > { %v4681_v23 = vpop.f32.mrb[33].mxu0 }
 0xf1f   : > { %v3223_v55 = vpop.f32.mrb[34].mxu0  ;;  %v8076_v23 = vld [vmem:[#allocation114_spill] sm:$0xff] }
 0xf20   : > { %v4682_v0 = vpop.f32.mrb[35].mxu0 }
 0xf90   : > { %v3263_v6 = vpop.f32.mrb[40].mxu1 }
 0xf91   : > { %3356 = vrot.lane.b32.xlu0 %v3263_v6, %s6116_s9  ;;  %v4687_v17 = vpop.f32.mrb[41].mxu1 }
 0xf92   : > { %v3266_v18 = vpop.f32.mrb[42].mxu1 }
 0xf93   : > { %v4688_v62 = vpop.f32.mrb[43].mxu1 }
 0xf94   : > { %v3306_v12 = vpop.f32.mrb[36].mxu0 }
 0xf95   : > { %3360 = vrot.lane.b32.xlu1 %v3306_v12, %s6117_s19  ;;  %v4693_v49 = vpop.f32.mrb[37].mxu0 }
 0xf96   : > { %v3309_v50 = vpop.f32.mrb[38].mxu0 }
 0xf97   : > { %v4694_v29 = vpop.f32.mrb[39].mxu0 }
 0xf98   : > { %v8077_v29 = vld [vmem:[#allocation115_spill] sm:$0xff] }
 0xfc5   : > { %v3349_v30 = vpop.f32.mrb[44].mxu1 }
 0xfc6   : > { %3364 = vrot.lane.b32.xlu0 %v3349_v30, %s6118_s10  ;;  %v4699_v31 = vpop.f32.mrb[45].mxu1  ;;  %v8078_v30 = vld [vmem:[#allocation116_spill] sm:$0xff] }
 0xfc7   : > { %v3352_v7 = vpop.f32.mrb[46].mxu1 }
 0xfc8   : > { %v4700_v54 = vpop.f32.mrb[47].mxu1 }
0x1003   : > { %v3357_v53 = vpop.permute.xlu0 %3356 }
0x1004   : > { %v3367_v16 = vsel %vm2165_vm3, %v3220_v22, %v3357_v53 }
0x1007   : > { %v3361_v15 = vpop.permute.xlu1 %3360 }
0x1008   : > { %v3368_v24 = vsel %vm2605_vm5, %v3367_v16, %v3361_v15 }
0x1038   : > { %v3365_v3 = vpop.permute.xlu0 %3364 }
0x1039   : > { %v3369_v5 = vsel %vm2607_vm6, %v3368_v24, %v3365_v3 }
0x103a   : > { %v3370_v4 = vpack.c.bf16 %v3369_v5, %v3369_v5 }
0x103c   : > { %4706 = vmatmul.mubr.msk.bf16.vlgmr.msra.gmra.mrb[40].mxu0 %vm2028_vm2, %v3370_v4 }
0x103d   : > { %4725 = vmatprep.mubr.msk.bf16.mxu0 %vm6111_vm1, %v8075_v59 }
0x110f   : > { %v3426_v32 = vpop.f32.mrb[40].mxu0 }
0x1110   : > { %v3427_v33 = vadd.f32 %v7444_v34, %v3426_v32  ;;  %v4707_v60 = vpop.f32.mrb[41].mxu0  ;;  %v4468_v34 = vcombine.low %v7453_v37, %v7456_v38 }
0x1111   : > { %v3429_v9 = vpop.f32.mrb[42].mxu0 }
0x1112   : > { %v4708_v25 = vpop.f32.mrb[43].mxu0  ;;  %v3432_v26 = vadd.f32 %v3427_v33, %v7655_v57  ;;  %4712 = vmatpush3.bf16.msra.mxu1 %v4468_v34  ;;  %v4471_v57 = vcombine.low %v7463_v40, %v7466_v41  ;;  %v4473_v41 = vcombine.low %v7475_v44, %v7478_v45  ;;  %v4479_v33 = vld [vmem:[#allocation48] ss:$0 sm:$0xff] (!%p4478_p6)  ;;  %v4480_v9 = vld [vmem:[#allocation49] ss:$0 sm:$0xff] (!%p4478_p6) }
0x1114   : > { %v3433_v1 = vsel %vm2028_vm2, %v3432_v26, 0.0  ;;  %4718 = vmatpush3.bf16.msra.mxu0 %v4471_v57 }
0x1115   : > { %3434 = vadd.xlane.f32.xlu1 %v3433_v1  ;;  %4719 = vmatprep.subr.bf16.mxu0 %v8075_v59 }
0x1118   : > { %4720 = vmatpush3.bf16.msra.mxu0 %v4472_v14 }
0x1119   : > { %4721 = vmatprep.subr.bf16.mxu0 %v8075_v59 }
0x111c   : > { %4722 = vmatpush3.bf16.msra.mxu0 %v4473_v41 }
0x111d   : > { %4723 = vmatprep.subr.bf16.mxu0 %v8075_v59 }
0x1120   : > { %4724 = vmatpush3.bf16.msra.mxu0 %v4474_v42 }
0x11a2   : > { %v3435_v27 = vpop.xlane.xlu1 %3434 }
0x11a3   : > { %v3436_v28 = vmul.f32 0.03125, %v3435_v27 }
0x11a5   : > { %v3437_v2 = vsub.f32 %v3432_v26, %v3436_v28 }
0x11a7   : > { %v3438_v56 = vmul.f32 %v3437_v2, %v3437_v2 }
0x11a9   : > { %v3439_v58 = vsel %vm2028_vm2, %v3438_v56, 0.0 }
0x11aa   : > { %3440 = vadd.xlane.f32.xlu0 %v3439_v58 }
0x1237   : > { %v3441_v35 = vpop.xlane.xlu0 %3440 }
0x1238   : > { %v3442_v36 = vmul.f32 0.03125, %v3441_v35 }
0x123a   : > { %v3443_v11 = vadd.f32 1e-05, %v3442_v36 }
0x123c   : > { %5008 = vrsqrt.f32 %v3443_v11 }
0x1246   : > { %v5009_v63 = vpop.eup %5008 }
0x1247   : > { %v3445_v48 = vmul.f32 %v5009_v63, %v3437_v2 }
0x1249   : > { %v3452_v37 = vmul.f32 %v7500_v51, %v3445_v48 }
0x124b   : > { %v3459_v38 = vadd.f32 %v7504_v52, %v3452_v37 }
0x124d   : > { %v3460_v40 = vpack.c.bf16 %v3459_v38, %v3459_v38 }
0x124f   : > { %4714 = vmatmul.mubr.msk.bf16.vlgmr.msra.gmra.mrb[48].mxu1 %vm2028_vm2, %v3460_v40 }
0x1322   : > { %v3516_v43 = vpop.f32.mrb[48].mxu1 }
0x1323   : > { %v3517_v61 = vadd.f32 %v7460_v39, %v3516_v43  ;;  %v4715_v19 = vpop.f32.mrb[49].mxu1 }
0x1324   : > { %v3519_v51 = vpop.f32.mrb[50].mxu1 }
0x1325   : > { %v3522_v20 = vmax.f32 %v3517_v61, 0.0  ;;  %v4716_v52 = vpop.f32.mrb[51].mxu1 }
0x1327   : > { %v3523_v21 = vpack.c.bf16 %v3522_v20, %v3522_v20 }
0x1329   : > { %4726 = vmatmul.mubr.msk.bf16.vlgmr.msra.gmra.mrb[44].mxu0 %vm3554_vm7, %v3523_v21 }
0x13fc   : > { %v3592_v22 = vpop.f32.mrb[44].mxu0 }
0x13fd   : > { %v3593_v44 = vadd.f32 %v8076_v23, %v3592_v22  ;;  %v4727_v45 = vpop.f32.mrb[45].mxu0 }
0x13fe   : > { %v3595_v55 = vpop.f32.mrb[46].mxu0 }
0x13ff   : > { %v4728_v59 = vpop.f32.mrb[47].mxu0  ;;  %v3598_v0 = vadd.f32 %v3593_v44, %v3459_v38 }
0x1401   : > { %v3599_v46 = vsel %vm2028_vm2, %v3598_v0, 0.0 }
0x1402   : > { %3600 = vadd.xlane.f32.xlu0 %v3599_v46 }
0x148f   : > { %v3601_v47 = vpop.xlane.xlu0 %3600 }
0x1490   : > { %v3602_v8 = vmul.f32 0.03125, %v3601_v47 }
0x1492   : > { %v3603_v39 = vsub.f32 %v3598_v0, %v3602_v8 }
0x1494   : > { %v3604_v6 = vmul.f32 %v3603_v39, %v3603_v39 }
0x1496   : > { %v3605_v17 = vsel %vm2028_vm2, %v3604_v6, 0.0 }
0x1497   : > { %3606 = vadd.xlane.f32.xlu1 %v3605_v17 }
0x1524   : > { %v3607_v18 = vpop.xlane.xlu1 %3606 }
0x1525   : > { %v3608_v62 = vmul.f32 0.03125, %v3607_v18 }
0x1527   : > { %v3609_v12 = vadd.f32 1e-05, %v3608_v62 }
0x1529   : > { %5010 = vrsqrt.f32 %v3609_v12 }
0x1533   : > { %v5011_v49 = vpop.eup %5010 }
0x1534   : > { %v3611_v50 = vmul.f32 %v5011_v49, %v3603_v39  ;;  %3630 = sbr.rel (%p4478_p6) target bundleno = 5748 (0x1674), region = 268 }
0x1536   : > { %v3618_v13 = vmul.f32 %v8077_v29, %v3611_v50 }
0x1538   : > { %v3625_v31 = vadd.f32 %v8078_v30, %v3618_v13 }
0x153a   : > { %3626 = vst.msk [vmem:[#allocation2] sm:$0xff] %vm2028_vm2, %v3625_v31  ;;  %v3633_v7 = vsel (!%p4478_p6), %vm2028_vm2, %v3625_v31, 0.0 }
0x153b   : > { %3634 = vadd.xlane.f32.xlu0 %v3633_v7 }
0x15c8   : > { %v3635_v54 = vpop.xlane.xlu0 %3634 }
0x15c9   : > { %v3636_v53 = vmul.f32 0.03125, %v3635_v54 }
0x15cb   : > { %v3637_v15 = vsub.f32 %v3625_v31, %v3636_v53 }
0x15cd   : > { %v3638_v16 = vmul.f32 %v3637_v15, %v3637_v15 }
0x15cf   : > { %v3639_v24 = vsel %vm2028_vm2, %v3638_v16, 0.0 }
0x15d0   : > { %3640 = vadd.xlane.f32.xlu0 %v3639_v24 }
0x165d   : > { %v3641_v3 = vpop.xlane.xlu0 %3640 }
0x165e   : > { %v3642_v5 = vmul.f32 0.03125, %v3641_v3 }
0x1660   : > { %v3643_v4 = vadd.f32 1e-05, %v3642_v5 }
0x1662   : > { %5012 = vrsqrt.f32 %v3643_v4 }
0x166c   : > { %v5013_v32 = vpop.eup %5012 }
0x166d   : > { %v3645_v60 = vmul.f32 %v5013_v32, %v3637_v15 }
0x166f   : > { %v3652_v25 = vmul.f32 %v4479_v33, %v3645_v60 }
0x1671   : > { %v3659_v26 = vadd.f32 %v4480_v9, %v3652_v25 }
0x1673   : > { %3660 = vst.msk [vmem:[%s1930_s14] sm:$0xff] %vm2028_vm2, %v3659_v26 }
0x1674 PF: > { %s8080_s24 = sld [smem:[#allocation105_spill]]  ;;  %s8082_s20 = sld [smem:[#allocation112_spill]] }
0x1675   : > { %s8081_s13 = sld [smem:[#allocation101_spill]]  ;;  %s3675_s28 = sshll.u32 %s1930_s14, 4  ;;  %s3676_s28 = int_to_ptr.vmem [resolvable:$true] %s3675_s28 }
0x1676   : > { %s3662_s11 = scalar_lea.sflag [#allocation6], %s7184_s4  ;;  %s5854_s5 = scalar_lea.vmem %s3676_s28, 128 }
0x1677   : > { %p5855_p8 = scmp.ne.s32.totalorder %s3676_s28, %s5854_s5  ;;  %s6119_s6 = smov [#allocation51]  }
0x1678   : > { %s5858_s21 = sshll.u32 %s6119_s6, 4  ;;  %s5859_s21 = int_to_ptr.vmem [resolvable:$false] %s5858_s21 }
0x1679   : > { %s5860_s30 = scalar_lea.vmem %s5859_s21, 256  ;;  %p5861_p7 = scmp.lt.s32.totalorder %s3676_s28, %s5859_s21 }
0x167a   : > { %s4482_s23 = sshll.u32 %s8080_s24, 7  ;;  %p8083_p0 = scmp.ne.s32.totalorder %s8082_s20, 0 }
0x167b   : > { %s7792_s3 = scalar_lea.hbm %s8081_s13, %s4482_s23  ;;  %p5862_p13 = scmp.lt.s32.totalorder %s5860_s30, %s5854_s5 }
0x167c   : > { %p5856_p3 = pnand %p5855_p8, %p8083_p0 }
0x167d   : > { %p5863_p11 = por %p5862_p13, %p5861_p7 }
0x167e   : > { %p5857_p1 = pneg %p5856_p3 }
0x1680   : > { %p5864_p12 = pnand %p5863_p11, %p5857_p1 }
0x1682   : > { %5867 = shalt.err (!%p5864_p12)
}
0x1683   : > { %s5868_s4 = scalar_lea.hbm %s7792_s3, 128  ;;  %s5872_s17 = scalar_lea.hbm %s8081_s13, 256 }
0x1684   : > { %p5869_p10 = scmp.ne.s32.totalorder %s7792_s3, %s5868_s4  ;;  %p5873_p9 = scmp.lt.u32.totalorder %s7792_s3, %s8081_s13 }
0x1685   : > { %p5874_p2 = scmp.lt.u32.totalorder %s5872_s17, %s5868_s4  ;;  %p5876_p8 = scmp.lt.u32.totalorder %s5868_s4, %s7792_s3 }
0x1686   : > { %p5870_p4 = pnand %p5869_p10, %p8083_p0 }
0x1687   : > { %p5875_p6 = por %p5874_p2, %p5873_p9 }
0x1688   : > { %p5871_p5 = pneg %p5870_p4 }
0x1689   : > { %p5877_p3 = por %p5876_p8, %p5875_p6 }
0x168b   : > { %p5878_p1 = pnand %p5877_p3, %p5871_p5 }
0x168d   : > { %5881 = shalt.err (!%p5878_p1)
}
0x168e   : > { %4793 = dma.vmem_to_hbm [thread:$0]  (%p8083_p0), %s3676_s28, 128, %s7792_s3, %s3662_s11  }
0x168f PF: > { %s8084_s14 = sld [smem:[#allocation106_spill]]  ;;  %s8085_s0 = sld [smem:[#allocation102_spill]] }
0x1690   : > { %s8086_s25 = sld [smem:[#allocation113_spill]] }
0x1695   : > { %p4810_p7 = scmp.ge.s32.totalorder %s8084_s14, 2  ;;  %s3687_s18 = sand.u32 1, %s8085_s0  }
0x1696   : > { %p8087_p13 = scmp.ne.s32.totalorder %s8086_s25, 0  ;;  %s3688_s12 = scalar_lea.sflag [#allocation6], %s3687_s18 }
0x1698   : > { %p4803_p11 = pnand %p4810_p7, %p8087_p13 }
0x169a   : > { %5999 = dma.done.wait (!%p4803_p11), %s3688_s12, 128  }
0x169b   : > { %6001 = vsyncadd (!%p4803_p11), %s3688_s12, 4294967168  ;;  %s120_s7 = sadd.s32 1, %s8084_s14   ;;  %s8088_s8 = sld [smem:[#allocation109_spill]] }
0x169c   : > { %p117_p12 = scmp.ge.s32.totalorder %s120_s7, 6   ;;  %s8089_s26 = sld [smem:[#allocation103_spill]] }
0x169d   : > { %s8090_s23 = sld [smem:[#allocation110_spill]]  ;;  %s8091_s9 = sld [smem:[#allocation107_spill]] }
0x169e   : > { %s8092_s19 = sld [smem:[#allocation108_spill]]  ;;  %s8093_s0 = smov %s6008_s15 }
0x169f   : > { %s8094_s15 = smov %s6012_s16  ;;  %s8096_s18 = smov %s6020_s22 }
0x16a0   : > { %s8099_s28 = smov %s6040_s2  ;;  %119 = sbr.rel (!%p117_p12) target bundleno = 106 (0x6a), region = 556 }
0x16a1   : > { %s8095_s16 = smov %s8088_s8 }
0x16a2   : > { %s8097_s22 = smov %s8089_s26  ;;  %s8098_s26 = smov %s6036_s1 }
0x16a3   : > { %s8100_s1 = smov %s8091_s9 }
0x16a4   : > { %s8101_s2 = smov %s8092_s19 }
0x16a7   :  { %3693 = vsyncpa [#allocation5], 1 }
0x16a8   :  { %3695 = vsyncpa [#allocation5 + $0x1], 1 }
0x16a9   :  { %3696 = vsyncpa [#allocation8], 1 }
0x16aa   :  { %3698 = vsyncpa [#allocation8 + $0x1], 1 }
0x16ab   :  { %3699 = vsyncpa [#allocation11], 1 }
0x16ac   :  { %3701 = vsyncpa [#allocation11 + $0x1], 1 }
0x16ad   :  { %3702 = vsyncpa [#allocation14], 1 }
0x16ae   :  { %3704 = vsyncpa [#allocation14 + $0x1], 1 }
0x16af   :  { %3705 = vsyncpa [#allocation17], 1 }
0x16b0   :  { %3707 = vsyncpa [#allocation17 + $0x1], 1 }
0x16b1   :  { %3708 = vsyncpa [#allocation20], 1 }
0x16b2   :  { %3710 = vsyncpa [#allocation20 + $0x1], 1 }
0x16b3   :  { %3711 = vsyncpa [#allocation23], 1 }
0x16b4   :  { %3713 = vsyncpa [#allocation23 + $0x1], 1 }
0x16b5   :  { %3714 = vsyncpa [#allocation26], 1 }
0x16b6   :  { %3716 = vsyncpa [#allocation26 + $0x1], 1 }
0x16b7   :  { %3717 = vsyncpa [#allocation29], 1 }
0x16b8   :  { %3719 = vsyncpa [#allocation29 + $0x1], 1 }
0x16b9   :  { %3720 = vsyncpa [#allocation32], 1 }
0x16ba   :  { %3722 = vsyncpa [#allocation32 + $0x1], 1 }
0x16bb   :  { %3723 = vsyncpa [#allocation35], 1 }
0x16bc   :  { %3725 = vsyncpa [#allocation35 + $0x1], 1 }
0x16bd   :  { %3726 = vsyncpa [#allocation38], 1 }
0x16be   :  { %3728 = vsyncpa [#allocation38 + $0x1], 1 }
0x16bf   :  { %3729 = vsyncpa [#allocation41], 1 }
0x16c0   :  { %3731 = vsyncpa [#allocation41 + $0x1], 1 }
0x16c1   :  { %3732 = vsyncpa [#allocation44], 1 }
0x16c2   :  { %3734 = vsyncpa [#allocation44 + $0x1], 1 }
0x16c3   :  { %3735 = vsyncpa [#allocation47], 1 }
0x16c4   :  { %3737 = vsyncpa [#allocation47 + $0x1], 1 }
0x16c5   :  { %3738 = vsyncpa [#allocation50], 1 }
0x16c6   :  { %3739 = vsyncpa [#allocation6], 1 }
0x16c7   :  { %3741 = vsyncpa [#allocation6 + $0x1], 1 }

</bundles_post_ra>
